<compile_context>
chip_gen: v6e
topology: v6e:2x2x1
jax: 0.10.0
libtpu: 0.0.40
codegen_flags: <defaults>
</compile_context>

<pallas_src>
import functools
import math

import jax
import jax.numpy as jnp
from jax import lax
from jax.experimental import pallas as pl
from jax.experimental.pallas import tpu as pltpu

# ------------------------- model hyperparameters ---------------------------
D_MODEL = 32
N_HEADS = 4
EXPAND = 2
D_INNER = EXPAND * D_MODEL          # 64
D_CONV = 4
D_STATE = 16
DT_RANK = math.ceil(D_MODEL / 16)   # 2
LAYER_NORM_EPS = 1e-5

N_LAYERS = 2                        # mamba layers
N_ATTN_LAYERS = 1
N_MAMBA_PER_ATTN = 2

# which params live in the bf16 matmul slab vs. the f32 vector slab
MM_NAMES = {'mamba': ('w_in', 'w_dcb', 'w_out'),
            'attn': ('w_qkv', 'w_o')}
VEC_NAMES = {'mamba': ('norm_w', 'conv_w', 'conv_b', 'b_dt', 'A_log_T', 'D'),
             'attn': ('b_qkv', 'b_o')}
SLAB_LANES = 128
MM_ROW_ALIGN = 16     # bf16 sublane packing
VEC_ROW_ALIGN = 8     # f32 sublane tile


def _silu(x):
    return x * jax.nn.sigmoid(x)


def _softplus(x):
    # softplus(x) = max(x,0) + log(1 + exp(-|x|))   (one exp, one log)
    return jnp.maximum(x, 0.0) + jnp.log(1.0 + jnp.exp(-jnp.abs(x)))


# ----------------------------- per-layer bodies -----------------------------
def _mamba_block(x, get, hs_ref, *, batch, seq):
    """Mamba residual block on batch-folded tokens x: (B*L, D)."""
    BL = batch * seq
    ED, N = D_INNER, D_STATE

    norm_w = get('norm_w')        # (1, D)        f32
    w_in = get('w_in')            # (D, 2*ED)     bf16
    conv_w = get('conv_w')        # (D_CONV, ED)  f32
    conv_b = get('conv_b')        # (1, ED)       f32
    w_dcb = get('w_dcb')          # (ED, ED+2N)   bf16
    b_dt = get('b_dt')            # (1, ED)       f32
    a_logT = get('A_log_T')       # (N, ED)       f32
    d_vec = get('D')              # (1, ED)       f32
    w_out = get('w_out')          # (ED, D)       bf16

    # ---- RMSNorm (pre-norm of the residual block) ----
    ms = jnp.mean(x * x, axis=-1, keepdims=True)
    xn = x * lax.rsqrt(ms + LAYER_NORM_EPS) * norm_w

    # ---- fused in_proj -> [x | z], single lane-dense (BL, 128) matmul ----
    xz = jnp.dot(xn.astype(jnp.bfloat16), w_in, preferred_element_type=jnp.float32)
    xin = xz[:, :ED]                                    # (BL, ED)
    z = xz[:, ED:]                                      # (BL, ED)

    # ---- depthwise causal conv1d along L of each sample (batch folded) ----
    row = lax.broadcasted_iota(jnp.int32, (BL, ED), 0)
    if (seq & (seq - 1)) == 0:
        pos = row & (seq - 1)                           # row % seq (power of 2)
    else:
        pos = row % seq
    acc = jnp.zeros((BL, ED), jnp.float32) + conv_b
    for k in range(D_CONV):
        s = D_CONV - 1 - k
        if s == 0:
            shifted = xin
        else:
            shifted = jnp.where(pos >= s, pltpu.roll(xin, shift=s, axis=0), 0.0)
        acc = acc + shifted * conv_w[k:k + 1, :]
    xc = _silu(acc)                                     # (BL, ED)

    # ---- fused x_proj: [delta_raw | C | B] in ONE MXU push ----
    proj = jnp.dot(xc.astype(jnp.bfloat16), w_dcb,
                   preferred_element_type=jnp.float32)  # (BL, ED+2N)
    delta = _softplus(proj[:, :ED] + b_dt)              # (BL, ED)
    c_mat = proj[:, ED:ED + N]                          # (BL, N)
    b_mat = proj[:, ED + N:ED + 2 * N]                  # (BL, N)

    # ---- hoisted per-step tensors (off the recurrence critical path) ----
    a_T = -jnp.exp(a_logT)                              # (N, ED)
    dx = delta * xc                                     # (BL, ED)
    dA = jnp.exp(delta[:, None, :] * a_T[None, :, :])   # (BL, N, ED), one EUP pass
    bx = b_mat[:, :, None] * dx[:, None, :]             # (BL, N, ED)
    dA = dA.reshape(batch, seq, N, ED)
    bx = bx.reshape(batch, seq, N, ED)

    # ---- selective scan: only h = dA*h + bx on the carried chain ----
    h = jnp.zeros((batch, 1, N, ED), jnp.float32)
    for t in range(seq):
        h = dA[:, t:t + 1] * h + bx[:, t:t + 1]
        hs_ref[:, t:t + 1] = h                          # stream states to VMEM

    # ---- y = C . h, batched (one multiply + sublane reduce, no tiny matmuls)
    hs = hs_ref[...]                                    # (B, L, N, ED)
    c4 = c_mat.reshape(batch, seq, N)
    y = jnp.sum(c4[:, :, :, None] * hs, axis=2)         # (B, L, ED)
    y = y.reshape(BL, ED) + d_vec * xc                  # (BL, ED)

    # ---- gate with silu(z), out_proj, residual add ----
    out = jnp.dot((y * _silu(z)).astype(jnp.bfloat16), w_out,
                  preferred_element_type=jnp.float32)
    return out + x


def _attn_block(x, get, *, batch, seq, n_heads):
    """MultiheadAttention on batch-folded tokens with a block-diagonal mask."""
    BL = batch * seq
    D = x.shape[-1]
    dh = D // n_heads

    w_qkv = get('w_qkv')          # (D, 3D) bf16
    b_qkv = get('b_qkv')          # (1, 3D) f32
    w_o = get('w_o')              # (D, D)  bf16
    b_o = get('b_o')              # (1, D)  f32

    qkv = jnp.dot(x.astype(jnp.bfloat16), w_qkv,
                  preferred_element_type=jnp.float32) + b_qkv
    q = qkv[:, :D] * (1.0 / math.sqrt(dh))
    k = qkv[:, D:2 * D]
    v = qkv[:, 2 * D:]

    # block-diagonal sample mask (tokens only attend within their own sample)
    ri = lax.broadcasted_iota(jnp.int32, (BL, BL), 0)
    ci = lax.broadcasted_iota(jnp.int32, (BL, BL), 1)
    if (seq & (seq - 1)) == 0:
        shift = seq.bit_length() - 1
        same = (ri >> shift) == (ci >> shift)
    else:
        same = (ri // seq) == (ci // seq)

    # TODO(synk): attention dropout is a no-op here (eval semantics / p=0).
    heads = []
    for hh in range(n_heads):
        sl = slice(hh * dh, (hh + 1) * dh)
        s = lax.dot_general(q[:, sl], k[:, sl],
                            dimension_numbers=(((1,), (1,)), ((), ())),
                            preferred_element_type=jnp.float32)     # (BL, BL)
        s = jnp.where(same, s, -1e30)
        s = s - jnp.max(s, axis=-1, keepdims=True)
        p = jnp.exp(s)
        p = p * pl.reciprocal(jnp.sum(p, axis=-1, keepdims=True), approx=False)
        heads.append(jnp.dot(p, v[:, sl], preferred_element_type=jnp.float32))
    attn = jnp.concatenate(heads, axis=-1)                          # (BL, D)
    return jnp.dot(attn.astype(jnp.bfloat16), w_o,
                   preferred_element_type=jnp.float32) + b_o


# ----------------------------- fused-stack kernel ---------------------------
def mambattn_kernel(x_ref, mm_ref, vec_ref, o_ref, hs_ref, *,
                    kinds, meta, batch, seq):
    x = x_ref[...]                        # (B*L, D) f32 — whole batch
    for kind, entry in zip(kinds, meta):
        def get(name, _entry=entry):
            slab, r0, nr, nc = _entry[name]
            ref = mm_ref if slab == 'mm' else vec_ref
            return ref[r0:r0 + nr, 0:nc]
        if kind == 'mamba':
            x = _mamba_block(x, get, hs_ref, batch=batch, seq=seq)
        else:
            x = _attn_block(x, get, batch=batch, seq=seq, n_heads=N_HEADS)
    o_ref[...] = x.astype(o_ref.dtype)


# ----------------------------- packing & wrapper ----------------------------
def pack_mambattn_params(layers):
    """Pack all layer params into one bf16 matmul slab + one f32 vector slab."""
    kinds = tuple(k for k, _ in layers)
    meta = []
    mm_parts, vec_parts = [], []
    mm_r = vec_r = 0
    for kind, p in layers:
        entry = {}
        for name in MM_NAMES[kind]:
            w = p[name]
            r, c = w.shape
            pr = (-r) % MM_ROW_ALIGN
            entry[name] = ('mm', mm_r, r, c)
            mm_parts.append(jnp.pad(w.astype(jnp.bfloat16),
                                    ((0, pr), (0, SLAB_LANES - c))))
            mm_r += r + pr
        for name in VEC_NAMES[kind]:
            w = p[name]
            r, c = w.shape
            pr = (-r) % VEC_ROW_ALIGN
            entry[name] = ('vec', vec_r, r, c)
            vec_parts.append(jnp.pad(w.astype(jnp.float32),
                                     ((0, pr), (0, SLAB_LANES - c))))
            vec_r += r + pr
        meta.append(entry)
    slab_mm = jnp.concatenate(mm_parts, axis=0)       # (R_mm, 128) bf16
    slab_vec = jnp.concatenate(vec_parts, axis=0)     # (R_vec, 128) f32
    return kinds, tuple(meta), slab_mm, slab_vec


def mambattn_forward(x, kinds, meta, slab_mm, slab_vec):
    B, L, D = x.shape
    x2d = x.reshape(B * L, D)
    kernel = functools.partial(mambattn_kernel, kinds=kinds, meta=meta,
                               batch=B, seq=L)
    out = pl.pallas_call(
        kernel,
        out_shape=jax.ShapeDtypeStruct((B * L, D), x.dtype),
        grid=(1,),
        in_specs=[
            pl.BlockSpec((B * L, D), lambda i: (0, 0)),
            pl.BlockSpec(slab_mm.shape, lambda i: (0, 0)),
            pl.BlockSpec(slab_vec.shape, lambda i: (0, 0)),
        ],
        out_specs=pl.BlockSpec((B * L, D), lambda i: (0, 0)),
        scratch_shapes=[pltpu.VMEM((B, L, D_STATE, D_INNER), jnp.float32)],
        compiler_params=pltpu.CompilerParams(
            dimension_semantics=("arbitrary",)),
    )(x2d, slab_mm, slab_vec)
    return out.reshape(B, L, D)


# ----------------------------- parameter init ------------------------------
def init_mamba_params(key):
    ks = jax.random.split(key, 8)
    rn = lambda k, shape, s: jax.random.normal(k, shape, jnp.float32) * s
    w_in_x = rn(ks[0], (D_MODEL, D_INNER), D_MODEL ** -0.5)
    w_in_z = rn(ks[1], (D_MODEL, D_INNER), D_MODEL ** -0.5)
    w_delta = rn(ks[3], (D_INNER, DT_RANK), D_INNER ** -0.5)
    w_b = rn(ks[4], (D_INNER, D_STATE), D_INNER ** -0.5)
    w_c = rn(ks[5], (D_INNER, D_STATE), D_INNER ** -0.5)
    w_dt = rn(ks[6], (DT_RANK, D_INNER), DT_RANK ** -0.5)
    return {
        'norm_w': jnp.ones((1, D_MODEL), jnp.float32),
        # fused in_proj:  [w_in_x | w_in_z]  -> (32, 128)
        'w_in': jnp.concatenate([w_in_x, w_in_z], axis=1),
        'conv_w': rn(ks[2], (D_CONV, D_INNER), 0.2),
        'conv_b': jnp.zeros((1, D_INNER), jnp.float32),
        # fused x_proj (dt low-rank folded, B folded in):
        #   [w_delta @ w_dt | w_C | w_B] -> (64, 96)
        'w_dcb': jnp.concatenate([w_delta @ w_dt, w_c, w_b], axis=1),
        'b_dt': jnp.full((1, D_INNER), -4.0, jnp.float32),
        # A_log in transposed (d_state, d_inner) layout for the scan
        'A_log_T': jnp.log(jnp.broadcast_to(
            jnp.arange(1, D_STATE + 1, dtype=jnp.float32)[:, None],
            (D_STATE, D_INNER))),
        'D': jnp.ones((1, D_INNER), jnp.float32),
        'w_out': rn(ks[7], (D_INNER, D_MODEL), D_INNER ** -0.5),
    }


def init_attn_params(key):
    k1, k2 = jax.random.split(key)
    return {
        'w_qkv': jax.random.normal(k1, (D_MODEL, 3 * D_MODEL), jnp.float32) * (D_MODEL ** -0.5),
        'b_qkv': jnp.zeros((1, 3 * D_MODEL), jnp.float32),
        'w_o': jax.random.normal(k2, (D_MODEL, D_MODEL), jnp.float32) * (D_MODEL ** -0.5),
        'b_o': jnp.zeros((1, D_MODEL), jnp.float32),
    }


def build_mambattn_layers(key):
    """Replicates MambAttn.__init__ layer-stacking logic."""
    layers = []
    total_blocks = N_LAYERS + N_ATTN_LAYERS
    for i in range(total_blocks):
        key, sub = jax.random.split(key)
        if (i + 1) % (N_MAMBA_PER_ATTN + 1) == 0:
            layers.append(('attn', init_attn_params(sub)))
        else:
            layers.append(('mamba', init_mamba_params(sub)))
    # last_layer == 'attn': last layer is already attention -> nothing appended.
    return layers


# ----------------------------------- main -----------------------------------
if __name__ == "__main__":
    key = jax.random.PRNGKey(0)
    k_x, k_params = jax.random.split(key)

    B, L = 2, 8
    x = jax.random.normal(k_x, (B, L, D_MODEL), jnp.float32)

    layers = build_mambattn_layers(k_params)
    kinds, meta, slab_mm, slab_vec = pack_mambattn_params(layers)

    out = mambattn_forward(x, kinds, meta, slab_mm, slab_vec)
    out = jax.block_until_ready(out)

    assert out.shape == (B, L, D_MODEL)
    assert jnp.all(jnp.isfinite(out))
    print("KERNEL_OK")
</pallas_src>

<mosaic_0001>
module attributes {stable_mosaic.version = 11 : i64} {
  func.func @mambattn_kernel(%arg0: i32, %arg1: memref<16x32xf32, #tpu.memory_space<vmem>>, %arg2: memref<384x128xbf16, #tpu.memory_space<vmem>>, %arg3: memref<128x128xf32, #tpu.memory_space<vmem>>, %arg4: memref<16x32xf32, #tpu.memory_space<vmem>>, %arg5: memref<2x8x16x64xf32, #tpu.memory_space<vmem>>) attributes {dimension_semantics = [#tpu.dimension_semantics<arbitrary>], iteration_bounds = array<i64: 1>, scalar_prefetch = 0 : i64, scratch_operands = 1 : i64, tpu.core_type = #tpu.core_type<tc>, window_params = [{pipeline_mode = #tpu.pipeline_mode<synchronous>, transform_indices = @transform_0, window_bounds = array<i64: 16, 32>}, {pipeline_mode = #tpu.pipeline_mode<synchronous>, transform_indices = @transform_1, window_bounds = array<i64: 384, 128>}, {pipeline_mode = #tpu.pipeline_mode<synchronous>, transform_indices = @transform_2, window_bounds = array<i64: 128, 128>}, {pipeline_mode = #tpu.pipeline_mode<synchronous>, transform_indices = @transform_3, window_bounds = array<i64: 16, 32>}]} {
    %c0 = arith.constant 0 : index
    %c0_0 = arith.constant 0 : index
    %0 = vector.load %arg1[%c0, %c0_0] : memref<16x32xf32, #tpu.memory_space<vmem>>, vector<16x32xf32>
    %c0_1 = arith.constant 0 : index
    %c0_2 = arith.constant 0 : index
    %1 = vector.load %arg3[%c0_1, %c0_2] : memref<128x128xf32, #tpu.memory_space<vmem>>, vector<1x32xf32>
    %c0_3 = arith.constant 0 : index
    %c0_4 = arith.constant 0 : index
    %2 = vector.load %arg2[%c0_3, %c0_4] : memref<384x128xbf16, #tpu.memory_space<vmem>>, vector<32x128xbf16>
    %c8 = arith.constant 8 : index
    %c0_5 = arith.constant 0 : index
    %3 = vector.load %arg3[%c8, %c0_5] : memref<128x128xf32, #tpu.memory_space<vmem>>, vector<4x64xf32>
    %c16 = arith.constant 16 : index
    %c0_6 = arith.constant 0 : index
    %4 = vector.load %arg3[%c16, %c0_6] : memref<128x128xf32, #tpu.memory_space<vmem>>, vector<1x64xf32>
    %c32 = arith.constant 32 : index
    %c0_7 = arith.constant 0 : index
    %5 = vector.load %arg2[%c32, %c0_7] : memref<384x128xbf16, #tpu.memory_space<vmem>>, vector<64x96xbf16>
    %c24 = arith.constant 24 : index
    %c0_8 = arith.constant 0 : index
    %6 = vector.load %arg3[%c24, %c0_8] : memref<128x128xf32, #tpu.memory_space<vmem>>, vector<1x64xf32>
    %c32_9 = arith.constant 32 : index
    %c0_10 = arith.constant 0 : index
    %7 = vector.load %arg3[%c32_9, %c0_10] : memref<128x128xf32, #tpu.memory_space<vmem>>, vector<16x64xf32>
    %c48 = arith.constant 48 : index
    %c0_11 = arith.constant 0 : index
    %8 = vector.load %arg3[%c48, %c0_11] : memref<128x128xf32, #tpu.memory_space<vmem>>, vector<1x64xf32>
    %c96 = arith.constant 96 : index
    %c0_12 = arith.constant 0 : index
    %9 = vector.load %arg2[%c96, %c0_12] : memref<384x128xbf16, #tpu.memory_space<vmem>>, vector<64x32xbf16>
    %10 = arith.mulf %0, %0 : vector<16x32xf32>
    %cst = arith.constant dense<0.000000e+00> : vector<16xf32>
    %11 = vector.multi_reduction <add>, %10, %cst [1] : vector<16x32xf32> to vector<16xf32>
    %12 = vector.shape_cast %11 : vector<16xf32> to vector<16x1xf32>
    %cst_13 = arith.constant 3.200000e+01 : f32
    %13 = vector.broadcast %cst_13 : f32 to vector<16x1xf32>
    %14 = arith.divf %12, %13 : vector<16x1xf32>
    %cst_14 = arith.constant 9.99999974E-6 : f32
    %15 = vector.broadcast %cst_14 : f32 to vector<16x1xf32>
    %16 = arith.addf %14, %15 : vector<16x1xf32>
    %17 = math.rsqrt %16 : vector<16x1xf32>
    %18 = vector.broadcast %17 : vector<16x1xf32> to vector<16x32xf32>
    %19 = arith.mulf %0, %18 : vector<16x32xf32>
    %20 = vector.broadcast %1 : vector<1x32xf32> to vector<16x32xf32>
    %21 = arith.mulf %19, %20 : vector<16x32xf32>
    %22 = arith.truncf %21 : vector<16x32xf32> to vector<16x32xbf16>
    %cst_15 = arith.constant dense<0.000000e+00> : vector<16x128xf32>
    %23 = tpu.matmul %22, %2, %cst_15 {dimension_numbers = #tpu.dot_dimension_numbers<[1], [0], [0], [1], [0, 0, 1, 1], [], []>} : vector<16x32xbf16>, vector<32x128xbf16>, vector<16x128xf32> -> vector<16x128xf32>
    %24 = vector.extract_strided_slice %23 {offsets = [0, 0], sizes = [16, 64], strides = [1, 1]} : vector<16x128xf32> to vector<16x64xf32>
    %25 = vector.extract_strided_slice %23 {offsets = [0, 64], sizes = [16, 64], strides = [1, 1]} : vector<16x128xf32> to vector<16x64xf32>
    %26 = tpu.iota {dimensions = array<i32: 0>} : vector<16x64xi32>
    %c7_i32 = arith.constant 7 : i32
    %27 = vector.broadcast %c7_i32 : i32 to vector<16x64xi32>
    %28 = arith.andi %26, %27 : vector<16x64xi32>
    %cst_16 = arith.constant 0.000000e+00 : f32
    %29 = vector.broadcast %cst_16 : f32 to vector<16x64xf32>
    %30 = vector.broadcast %4 : vector<1x64xf32> to vector<16x64xf32>
    %31 = arith.addf %29, %30 : vector<16x64xf32>
    %c3_i32 = arith.constant 3 : i32
    %32 = vector.broadcast %c3_i32 : i32 to vector<16x64xi32>
    %33 = arith.cmpi sge, %28, %32 : vector<16x64xi32>
    %c3_i32_17 = arith.constant 3 : i32
    %34 = tpu.dynamic_rotate %24 by %c3_i32_17 dim 0 : vector<16x64xf32>, i32 -> vector<16x64xf32>
    %cst_18 = arith.constant 0.000000e+00 : f32
    %35 = vector.broadcast %cst_18 : f32 to vector<16x64xf32>
    %36 = arith.select %33, %34, %35 : vector<16x64xi1>, vector<16x64xf32>
    %37 = vector.extract_strided_slice %3 {offsets = [0, 0], sizes = [1, 64], strides = [1, 1]} : vector<4x64xf32> to vector<1x64xf32>
    %38 = vector.broadcast %37 : vector<1x64xf32> to vector<16x64xf32>
    %39 = arith.mulf %36, %38 : vector<16x64xf32>
    %40 = arith.addf %31, %39 : vector<16x64xf32>
    %c2_i32 = arith.constant 2 : i32
    %41 = vector.broadcast %c2_i32 : i32 to vector<16x64xi32>
    %42 = arith.cmpi sge, %28, %41 : vector<16x64xi32>
    %c2_i32_19 = arith.constant 2 : i32
    %43 = tpu.dynamic_rotate %24 by %c2_i32_19 dim 0 : vector<16x64xf32>, i32 -> vector<16x64xf32>
    %cst_20 = arith.constant 0.000000e+00 : f32
    %44 = vector.broadcast %cst_20 : f32 to vector<16x64xf32>
    %45 = arith.select %42, %43, %44 : vector<16x64xi1>, vector<16x64xf32>
    %46 = vector.extract_strided_slice %3 {offsets = [1, 0], sizes = [1, 64], strides = [1, 1]} : vector<4x64xf32> to vector<1x64xf32>
    %47 = vector.broadcast %46 : vector<1x64xf32> to vector<16x64xf32>
    %48 = arith.mulf %45, %47 : vector<16x64xf32>
    %49 = arith.addf %40, %48 : vector<16x64xf32>
    %c1_i32 = arith.constant 1 : i32
    %50 = vector.broadcast %c1_i32 : i32 to vector<16x64xi32>
    %51 = arith.cmpi sge, %28, %50 : vector<16x64xi32>
    %c1_i32_21 = arith.constant 1 : i32
    %52 = tpu.dynamic_rotate %24 by %c1_i32_21 dim 0 : vector<16x64xf32>, i32 -> vector<16x64xf32>
    %cst_22 = arith.constant 0.000000e+00 : f32
    %53 = vector.broadcast %cst_22 : f32 to vector<16x64xf32>
    %54 = arith.select %51, %52, %53 : vector<16x64xi1>, vector<16x64xf32>
    %55 = vector.extract_strided_slice %3 {offsets = [2, 0], sizes = [1, 64], strides = [1, 1]} : vector<4x64xf32> to vector<1x64xf32>
    %56 = vector.broadcast %55 : vector<1x64xf32> to vector<16x64xf32>
    %57 = arith.mulf %54, %56 : vector<16x64xf32>
    %58 = arith.addf %49, %57 : vector<16x64xf32>
    %59 = vector.extract_strided_slice %3 {offsets = [3, 0], sizes = [1, 64], strides = [1, 1]} : vector<4x64xf32> to vector<1x64xf32>
    %60 = vector.broadcast %59 : vector<1x64xf32> to vector<16x64xf32>
    %61 = arith.mulf %24, %60 : vector<16x64xf32>
    %62 = arith.addf %58, %61 : vector<16x64xf32>
    %63 = arith.negf %62 : vector<16x64xf32>
    %64 = math.exp %63 : vector<16x64xf32>
    %cst_23 = arith.constant 1.000000e+00 : f32
    %65 = vector.broadcast %cst_23 : f32 to vector<16x64xf32>
    %66 = arith.addf %65, %64 : vector<16x64xf32>
    %67 = arith.divf %65, %66 : vector<16x64xf32>
    %68 = arith.mulf %62, %67 : vector<16x64xf32>
    %69 = arith.truncf %68 : vector<16x64xf32> to vector<16x64xbf16>
    %cst_24 = arith.constant dense<0.000000e+00> : vector<16x96xf32>
    %70 = tpu.matmul %69, %5, %cst_24 {dimension_numbers = #tpu.dot_dimension_numbers<[1], [0], [0], [1], [0, 0, 1, 1], [], []>} : vector<16x64xbf16>, vector<64x96xbf16>, vector<16x96xf32> -> vector<16x96xf32>
    %71 = vector.extract_strided_slice %70 {offsets = [0, 0], sizes = [16, 64], strides = [1, 1]} : vector<16x96xf32> to vector<16x64xf32>
    %72 = vector.broadcast %6 : vector<1x64xf32> to vector<16x64xf32>
    %73 = arith.addf %71, %72 : vector<16x64xf32>
    %cst_25 = arith.constant 0.000000e+00 : f32
    %74 = vector.broadcast %cst_25 : f32 to vector<16x64xf32>
    %75 = arith.maximumf %73, %74 : vector<16x64xf32>
    %76 = math.absf %73 : vector<16x64xf32>
    %cst_26 = arith.constant 0.000000e+00 : f32
    %77 = vector.broadcast %cst_26 : f32 to vector<16x64xf32>
    %78 = arith.subf %77, %76 : vector<16x64xf32>
    %79 = math.exp %78 : vector<16x64xf32>
    %cst_27 = arith.constant 1.000000e+00 : f32
    %80 = vector.broadcast %cst_27 : f32 to vector<16x64xf32>
    %81 = arith.addf %80, %79 : vector<16x64xf32>
    %82 = math.log %81 : vector<16x64xf32>
    %83 = arith.addf %75, %82 : vector<16x64xf32>
    %84 = vector.extract_strided_slice %70 {offsets = [0, 64], sizes = [16, 16], strides = [1, 1]} : vector<16x96xf32> to vector<16x16xf32>
    %85 = vector.extract_strided_slice %70 {offsets = [0, 80], sizes = [16, 16], strides = [1, 1]} : vector<16x96xf32> to vector<16x16xf32>
    %86 = math.exp %7 : vector<16x64xf32>
    %cst_28 = arith.constant 0.000000e+00 : f32
    %87 = vector.broadcast %cst_28 : f32 to vector<16x64xf32>
    %88 = arith.subf %87, %86 : vector<16x64xf32>
    %89 = arith.mulf %83, %68 : vector<16x64xf32>
    %90 = vector.shape_cast %83 : vector<16x64xf32> to vector<16x1x64xf32>
    %91 = vector.shape_cast %88 : vector<16x64xf32> to vector<1x16x64xf32>
    %92 = vector.broadcast %90 : vector<16x1x64xf32> to vector<16x16x64xf32>
    %93 = vector.broadcast %91 : vector<1x16x64xf32> to vector<16x16x64xf32>
    %94 = arith.mulf %92, %93 : vector<16x16x64xf32>
    %95 = math.exp %94 : vector<16x16x64xf32>
    %96 = vector.shape_cast %85 : vector<16x16xf32> to vector<16x16x1xf32>
    %97 = vector.shape_cast %89 : vector<16x64xf32> to vector<16x1x64xf32>
    %98 = vector.broadcast %96 : vector<16x16x1xf32> to vector<16x16x64xf32>
    %99 = vector.broadcast %97 : vector<16x1x64xf32> to vector<16x16x64xf32>
    %100 = arith.mulf %98, %99 : vector<16x16x64xf32>
    %101 = vector.shape_cast %95 : vector<16x16x64xf32> to vector<2x8x16x64xf32>
    %102 = vector.shape_cast %100 : vector<16x16x64xf32> to vector<2x8x16x64xf32>
    %cst_29 = arith.constant 0.000000e+00 : f32
    %103 = vector.broadcast %cst_29 : f32 to vector<2x1x16x64xf32>
    %104 = vector.extract_strided_slice %101 {offsets = [0, 0, 0, 0], sizes = [2, 1, 16, 64], strides = [1, 1, 1, 1]} : vector<2x8x16x64xf32> to vector<2x1x16x64xf32>
    %105 = arith.mulf %104, %103 : vector<2x1x16x64xf32>
    %106 = vector.extract_strided_slice %102 {offsets = [0, 0, 0, 0], sizes = [2, 1, 16, 64], strides = [1, 1, 1, 1]} : vector<2x8x16x64xf32> to vector<2x1x16x64xf32>
    %107 = arith.addf %105, %106 : vector<2x1x16x64xf32>
    %c0_30 = arith.constant 0 : index
    %c0_31 = arith.constant 0 : index
    %c0_32 = arith.constant 0 : index
    %c0_33 = arith.constant 0 : index
    %108 = vector.load %arg5[%c0_30, %c0_31, %c0_32, %c0_33] : memref<2x8x16x64xf32, #tpu.memory_space<vmem>>, vector<2x1x16x64xf32>
    tpu.vector_store %arg5[%c0_30, %c0_31, %c0_32, %c0_33], %107 {strides = array<i32>} : memref<2x8x16x64xf32, #tpu.memory_space<vmem>>, vector<2x1x16x64xf32>,
    %109 = vector.extract_strided_slice %101 {offsets = [0, 1, 0, 0], sizes = [2, 1, 16, 64], strides = [1, 1, 1, 1]} : vector<2x8x16x64xf32> to vector<2x1x16x64xf32>
    %110 = arith.mulf %109, %107 : vector<2x1x16x64xf32>
    %111 = vector.extract_strided_slice %102 {offsets = [0, 1, 0, 0], sizes = [2, 1, 16, 64], strides = [1, 1, 1, 1]} : vector<2x8x16x64xf32> to vector<2x1x16x64xf32>
    %112 = arith.addf %110, %111 : vector<2x1x16x64xf32>
    %c0_34 = arith.constant 0 : index
    %c1 = arith.constant 1 : index
    %c0_35 = arith.constant 0 : index
    %c0_36 = arith.constant 0 : index
    %113 = vector.load %arg5[%c0_34, %c1, %c0_35, %c0_36] : memref<2x8x16x64xf32, #tpu.memory_space<vmem>>, vector<2x1x16x64xf32>
    tpu.vector_store %arg5[%c0_34, %c1, %c0_35, %c0_36], %112 {strides = array<i32>} : memref<2x8x16x64xf32, #tpu.memory_space<vmem>>, vector<2x1x16x64xf32>,
    %114 = vector.extract_strided_slice %101 {offsets = [0, 2, 0, 0], sizes = [2, 1, 16, 64], strides = [1, 1, 1, 1]} : vector<2x8x16x64xf32> to vector<2x1x16x64xf32>
    %115 = arith.mulf %114, %112 : vector<2x1x16x64xf32>
    %116 = vector.extract_strided_slice %102 {offsets = [0, 2, 0, 0], sizes = [2, 1, 16, 64], strides = [1, 1, 1, 1]} : vector<2x8x16x64xf32> to vector<2x1x16x64xf32>
    %117 = arith.addf %115, %116 : vector<2x1x16x64xf32>
    %c0_37 = arith.constant 0 : index
    %c2 = arith.constant 2 : index
    %c0_38 = arith.constant 0 : index
    %c0_39 = arith.constant 0 : index
    %118 = vector.load %arg5[%c0_37, %c2, %c0_38, %c0_39] : memref<2x8x16x64xf32, #tpu.memory_space<vmem>>, vector<2x1x16x64xf32>
    tpu.vector_store %arg5[%c0_37, %c2, %c0_38, %c0_39], %117 {strides = array<i32>} : memref<2x8x16x64xf32, #tpu.memory_space<vmem>>, vector<2x1x16x64xf32>,
    %119 = vector.extract_strided_slice %101 {offsets = [0, 3, 0, 0], sizes = [2, 1, 16, 64], strides = [1, 1, 1, 1]} : vector<2x8x16x64xf32> to vector<2x1x16x64xf32>
    %120 = arith.mulf %119, %117 : vector<2x1x16x64xf32>
    %121 = vector.extract_strided_slice %102 {offsets = [0, 3, 0, 0], sizes = [2, 1, 16, 64], strides = [1, 1, 1, 1]} : vector<2x8x16x64xf32> to vector<2x1x16x64xf32>
    %122 = arith.addf %120, %121 : vector<2x1x16x64xf32>
    %c0_40 = arith.constant 0 : index
    %c3 = arith.constant 3 : index
    %c0_41 = arith.constant 0 : index
    %c0_42 = arith.constant 0 : index
    %123 = vector.load %arg5[%c0_40, %c3, %c0_41, %c0_42] : memref<2x8x16x64xf32, #tpu.memory_space<vmem>>, vector<2x1x16x64xf32>
    tpu.vector_store %arg5[%c0_40, %c3, %c0_41, %c0_42], %122 {strides = array<i32>} : memref<2x8x16x64xf32, #tpu.memory_space<vmem>>, vector<2x1x16x64xf32>,
    %124 = vector.extract_strided_slice %101 {offsets = [0, 4, 0, 0], sizes = [2, 1, 16, 64], strides = [1, 1, 1, 1]} : vector<2x8x16x64xf32> to vector<2x1x16x64xf32>
    %125 = arith.mulf %124, %122 : vector<2x1x16x64xf32>
    %126 = vector.extract_strided_slice %102 {offsets = [0, 4, 0, 0], sizes = [2, 1, 16, 64], strides = [1, 1, 1, 1]} : vector<2x8x16x64xf32> to vector<2x1x16x64xf32>
    %127 = arith.addf %125, %126 : vector<2x1x16x64xf32>
    %c0_43 = arith.constant 0 : index
    %c4 = arith.constant 4 : index
    %c0_44 = arith.constant 0 : index
    %c0_45 = arith.constant 0 : index
    %128 = vector.load %arg5[%c0_43, %c4, %c0_44, %c0_45] : memref<2x8x16x64xf32, #tpu.memory_space<vmem>>, vector<2x1x16x64xf32>
    tpu.vector_store %arg5[%c0_43, %c4, %c0_44, %c0_45], %127 {strides = array<i32>} : memref<2x8x16x64xf32, #tpu.memory_space<vmem>>, vector<2x1x16x64xf32>,
    %129 = vector.extract_strided_slice %101 {offsets = [0, 5, 0, 0], sizes = [2, 1, 16, 64], strides = [1, 1, 1, 1]} : vector<2x8x16x64xf32> to vector<2x1x16x64xf32>
    %130 = arith.mulf %129, %127 : vector<2x1x16x64xf32>
    %131 = vector.extract_strided_slice %102 {offsets = [0, 5, 0, 0], sizes = [2, 1, 16, 64], strides = [1, 1, 1, 1]} : vector<2x8x16x64xf32> to vector<2x1x16x64xf32>
    %132 = arith.addf %130, %131 : vector<2x1x16x64xf32>
    %c0_46 = arith.constant 0 : index
    %c5 = arith.constant 5 : index
    %c0_47 = arith.constant 0 : index
    %c0_48 = arith.constant 0 : index
    %133 = vector.load %arg5[%c0_46, %c5, %c0_47, %c0_48] : memref<2x8x16x64xf32, #tpu.memory_space<vmem>>, vector<2x1x16x64xf32>
    tpu.vector_store %arg5[%c0_46, %c5, %c0_47, %c0_48], %132 {strides = array<i32>} : memref<2x8x16x64xf32, #tpu.memory_space<vmem>>, vector<2x1x16x64xf32>,
    %134 = vector.extract_strided_slice %101 {offsets = [0, 6, 0, 0], sizes = [2, 1, 16, 64], strides = [1, 1, 1, 1]} : vector<2x8x16x64xf32> to vector<2x1x16x64xf32>
    %135 = arith.mulf %134, %132 : vector<2x1x16x64xf32>
    %136 = vector.extract_strided_slice %102 {offsets = [0, 6, 0, 0], sizes = [2, 1, 16, 64], strides = [1, 1, 1, 1]} : vector<2x8x16x64xf32> to vector<2x1x16x64xf32>
    %137 = arith.addf %135, %136 : vector<2x1x16x64xf32>
    %c0_49 = arith.constant 0 : index
    %c6 = arith.constant 6 : index
    %c0_50 = arith.constant 0 : index
    %c0_51 = arith.constant 0 : index
    %138 = vector.load %arg5[%c0_49, %c6, %c0_50, %c0_51] : memref<2x8x16x64xf32, #tpu.memory_space<vmem>>, vector<2x1x16x64xf32>
    tpu.vector_store %arg5[%c0_49, %c6, %c0_50, %c0_51], %137 {strides = array<i32>} : memref<2x8x16x64xf32, #tpu.memory_space<vmem>>, vector<2x1x16x64xf32>,
    %139 = vector.extract_strided_slice %101 {offsets = [0, 7, 0, 0], sizes = [2, 1, 16, 64], strides = [1, 1, 1, 1]} : vector<2x8x16x64xf32> to vector<2x1x16x64xf32>
    %140 = arith.mulf %139, %137 : vector<2x1x16x64xf32>
    %141 = vector.extract_strided_slice %102 {offsets = [0, 7, 0, 0], sizes = [2, 1, 16, 64], strides = [1, 1, 1, 1]} : vector<2x8x16x64xf32> to vector<2x1x16x64xf32>
    %142 = arith.addf %140, %141 : vector<2x1x16x64xf32>
    %c0_52 = arith.constant 0 : index
    %c7 = arith.constant 7 : index
    %c0_53 = arith.constant 0 : index
    %c0_54 = arith.constant 0 : index
    %143 = vector.load %arg5[%c0_52, %c7, %c0_53, %c0_54] : memref<2x8x16x64xf32, #tpu.memory_space<vmem>>, vector<2x1x16x64xf32>
    tpu.vector_store %arg5[%c0_52, %c7, %c0_53, %c0_54], %142 {strides = array<i32>} : memref<2x8x16x64xf32, #tpu.memory_space<vmem>>, vector<2x1x16x64xf32>,
    %c0_55 = arith.constant 0 : index
    %c0_56 = arith.constant 0 : index
    %c0_57 = arith.constant 0 : index
    %c0_58 = arith.constant 0 : index
    %144 = vector.load %arg5[%c0_55, %c0_56, %c0_57, %c0_58] : memref<2x8x16x64xf32, #tpu.memory_space<vmem>>, vector<2x8x16x64xf32>
    %145 = vector.shape_cast %84 : vector<16x16xf32> to vector<2x8x16xf32>
    %146 = vector.shape_cast %145 : vector<2x8x16xf32> to vector<2x8x16x1xf32>
    %147 = vector.broadcast %146 : vector<2x8x16x1xf32> to vector<2x8x16x64xf32>
    %148 = arith.mulf %147, %144 : vector<2x8x16x64xf32>
    %cst_59 = arith.constant dense<0.000000e+00> : vector<2x8x64xf32>
    %149 = vector.multi_reduction <add>, %148, %cst_59 [2] : vector<2x8x16x64xf32> to vector<2x8x64xf32>
    %150 = vector.shape_cast %149 : vector<2x8x64xf32> to vector<16x64xf32>
    %151 = vector.broadcast %8 : vector<1x64xf32> to vector<16x64xf32>
    %152 = arith.mulf %151, %68 : vector<16x64xf32>
    %153 = arith.addf %150, %152 : vector<16x64xf32>
    %154 = arith.negf %25 : vector<16x64xf32>
    %155 = math.exp %154 : vector<16x64xf32>
    %cst_60 = arith.constant 1.000000e+00 : f32
    %156 = vector.broadcast %cst_60 : f32 to vector<16x64xf32>
    %157 = arith.addf %156, %155 : vector<16x64xf32>
    %158 = arith.divf %156, %157 : vector<16x64xf32>
    %159 = arith.mulf %25, %158 : vector<16x64xf32>
    %160 = arith.mulf %153, %159 : vector<16x64xf32>
    %161 = arith.truncf %160 : vector<16x64xf32> to vector<16x64xbf16>
    %cst_61 = arith.constant dense<0.000000e+00> : vector<16x32xf32>
    %162 = tpu.matmul %161, %9, %cst_61 {dimension_numbers = #tpu.dot_dimension_numbers<[1], [0], [0], [1], [0, 0, 1, 1], [], []>} : vector<16x64xbf16>, vector<64x32xbf16>, vector<16x32xf32> -> vector<16x32xf32>
    %163 = arith.addf %162, %0 : vector<16x32xf32>
    %c56 = arith.constant 56 : index
    %c0_62 = arith.constant 0 : index
    %164 = vector.load %arg3[%c56, %c0_62] : memref<128x128xf32, #tpu.memory_space<vmem>>, vector<1x32xf32>
    %c160 = arith.constant 160 : index
    %c0_63 = arith.constant 0 : index
    %165 = vector.load %arg2[%c160, %c0_63] : memref<384x128xbf16, #tpu.memory_space<vmem>>, vector<32x128xbf16>
    %c64 = arith.constant 64 : index
    %c0_64 = arith.constant 0 : index
    %166 = vector.load %arg3[%c64, %c0_64] : memref<128x128xf32, #tpu.memory_space<vmem>>, vector<4x64xf32>
    %c72 = arith.constant 72 : index
    %c0_65 = arith.constant 0 : index
    %167 = vector.load %arg3[%c72, %c0_65] : memref<128x128xf32, #tpu.memory_space<vmem>>, vector<1x64xf32>
    %c192 = arith.constant 192 : index
    %c0_66 = arith.constant 0 : index
    %168 = vector.load %arg2[%c192, %c0_66] : memref<384x128xbf16, #tpu.memory_space<vmem>>, vector<64x96xbf16>
    %c80 = arith.constant 80 : index
    %c0_67 = arith.constant 0 : index
    %169 = vector.load %arg3[%c80, %c0_67] : memref<128x128xf32, #tpu.memory_space<vmem>>, vector<1x64xf32>
    %c88 = arith.constant 88 : index
    %c0_68 = arith.constant 0 : index
    %170 = vector.load %arg3[%c88, %c0_68] : memref<128x128xf32, #tpu.memory_space<vmem>>, vector<16x64xf32>
    %c104 = arith.constant 104 : index
    %c0_69 = arith.constant 0 : index
    %171 = vector.load %arg3[%c104, %c0_69] : memref<128x128xf32, #tpu.memory_space<vmem>>, vector<1x64xf32>
    %c256 = arith.constant 256 : index
    %c0_70 = arith.constant 0 : index
    %172 = vector.load %arg2[%c256, %c0_70] : memref<384x128xbf16, #tpu.memory_space<vmem>>, vector<64x32xbf16>
    %173 = arith.mulf %163, %163 : vector<16x32xf32>
    %cst_71 = arith.constant dense<0.000000e+00> : vector<16xf32>
    %174 = vector.multi_reduction <add>, %173, %cst_71 [1] : vector<16x32xf32> to vector<16xf32>
    %175 = vector.shape_cast %174 : vector<16xf32> to vector<16x1xf32>
    %cst_72 = arith.constant 3.200000e+01 : f32
    %176 = vector.broadcast %cst_72 : f32 to vector<16x1xf32>
    %177 = arith.divf %175, %176 : vector<16x1xf32>
    %cst_73 = arith.constant 9.99999974E-6 : f32
    %178 = vector.broadcast %cst_73 : f32 to vector<16x1xf32>
    %179 = arith.addf %177, %178 : vector<16x1xf32>
    %180 = math.rsqrt %179 : vector<16x1xf32>
    %181 = vector.broadcast %180 : vector<16x1xf32> to vector<16x32xf32>
    %182 = arith.mulf %163, %181 : vector<16x32xf32>
    %183 = vector.broadcast %164 : vector<1x32xf32> to vector<16x32xf32>
    %184 = arith.mulf %182, %183 : vector<16x32xf32>
    %185 = arith.truncf %184 : vector<16x32xf32> to vector<16x32xbf16>
    %cst_74 = arith.constant dense<0.000000e+00> : vector<16x128xf32>
    %186 = tpu.matmul %185, %165, %cst_74 {dimension_numbers = #tpu.dot_dimension_numbers<[1], [0], [0], [1], [0, 0, 1, 1], [], []>} : vector<16x32xbf16>, vector<32x128xbf16>, vector<16x128xf32> -> vector<16x128xf32>
    %187 = vector.extract_strided_slice %186 {offsets = [0, 0], sizes = [16, 64], strides = [1, 1]} : vector<16x128xf32> to vector<16x64xf32>
    %188 = vector.extract_strided_slice %186 {offsets = [0, 64], sizes = [16, 64], strides = [1, 1]} : vector<16x128xf32> to vector<16x64xf32>
    %189 = tpu.iota {dimensions = array<i32: 0>} : vector<16x64xi32>
    %c7_i32_75 = arith.constant 7 : i32
    %190 = vector.broadcast %c7_i32_75 : i32 to vector<16x64xi32>
    %191 = arith.andi %189, %190 : vector<16x64xi32>
    %cst_76 = arith.constant 0.000000e+00 : f32
    %192 = vector.broadcast %cst_76 : f32 to vector<16x64xf32>
    %193 = vector.broadcast %167 : vector<1x64xf32> to vector<16x64xf32>
    %194 = arith.addf %192, %193 : vector<16x64xf32>
    %c3_i32_77 = arith.constant 3 : i32
    %195 = vector.broadcast %c3_i32_77 : i32 to vector<16x64xi32>
    %196 = arith.cmpi sge, %191, %195 : vector<16x64xi32>
    %c3_i32_78 = arith.constant 3 : i32
    %197 = tpu.dynamic_rotate %187 by %c3_i32_78 dim 0 : vector<16x64xf32>, i32 -> vector<16x64xf32>
    %cst_79 = arith.constant 0.000000e+00 : f32
    %198 = vector.broadcast %cst_79 : f32 to vector<16x64xf32>
    %199 = arith.select %196, %197, %198 : vector<16x64xi1>, vector<16x64xf32>
    %200 = vector.extract_strided_slice %166 {offsets = [0, 0], sizes = [1, 64], strides = [1, 1]} : vector<4x64xf32> to vector<1x64xf32>
    %201 = vector.broadcast %200 : vector<1x64xf32> to vector<16x64xf32>
    %202 = arith.mulf %199, %201 : vector<16x64xf32>
    %203 = arith.addf %194, %202 : vector<16x64xf32>
    %c2_i32_80 = arith.constant 2 : i32
    %204 = vector.broadcast %c2_i32_80 : i32 to vector<16x64xi32>
    %205 = arith.cmpi sge, %191, %204 : vector<16x64xi32>
    %c2_i32_81 = arith.constant 2 : i32
    %206 = tpu.dynamic_rotate %187 by %c2_i32_81 dim 0 : vector<16x64xf32>, i32 -> vector<16x64xf32>
    %cst_82 = arith.constant 0.000000e+00 : f32
    %207 = vector.broadcast %cst_82 : f32 to vector<16x64xf32>
    %208 = arith.select %205, %206, %207 : vector<16x64xi1>, vector<16x64xf32>
    %209 = vector.extract_strided_slice %166 {offsets = [1, 0], sizes = [1, 64], strides = [1, 1]} : vector<4x64xf32> to vector<1x64xf32>
    %210 = vector.broadcast %209 : vector<1x64xf32> to vector<16x64xf32>
    %211 = arith.mulf %208, %210 : vector<16x64xf32>
    %212 = arith.addf %203, %211 : vector<16x64xf32>
    %c1_i32_83 = arith.constant 1 : i32
    %213 = vector.broadcast %c1_i32_83 : i32 to vector<16x64xi32>
    %214 = arith.cmpi sge, %191, %213 : vector<16x64xi32>
    %c1_i32_84 = arith.constant 1 : i32
    %215 = tpu.dynamic_rotate %187 by %c1_i32_84 dim 0 : vector<16x64xf32>, i32 -> vector<16x64xf32>
    %cst_85 = arith.constant 0.000000e+00 : f32
    %216 = vector.broadcast %cst_85 : f32 to vector<16x64xf32>
    %217 = arith.select %214, %215, %216 : vector<16x64xi1>, vector<16x64xf32>
    %218 = vector.extract_strided_slice %166 {offsets = [2, 0], sizes = [1, 64], strides = [1, 1]} : vector<4x64xf32> to vector<1x64xf32>
    %219 = vector.broadcast %218 : vector<1x64xf32> to vector<16x64xf32>
    %220 = arith.mulf %217, %219 : vector<16x64xf32>
    %221 = arith.addf %212, %220 : vector<16x64xf32>
    %222 = vector.extract_strided_slice %166 {offsets = [3, 0], sizes = [1, 64], strides = [1, 1]} : vector<4x64xf32> to vector<1x64xf32>
    %223 = vector.broadcast %222 : vector<1x64xf32> to vector<16x64xf32>
    %224 = arith.mulf %187, %223 : vector<16x64xf32>
    %225 = arith.addf %221, %224 : vector<16x64xf32>
    %226 = arith.negf %225 : vector<16x64xf32>
    %227 = math.exp %226 : vector<16x64xf32>
    %cst_86 = arith.constant 1.000000e+00 : f32
    %228 = vector.broadcast %cst_86 : f32 to vector<16x64xf32>
    %229 = arith.addf %228, %227 : vector<16x64xf32>
    %230 = arith.divf %228, %229 : vector<16x64xf32>
    %231 = arith.mulf %225, %230 : vector<16x64xf32>
    %232 = arith.truncf %231 : vector<16x64xf32> to vector<16x64xbf16>
    %cst_87 = arith.constant dense<0.000000e+00> : vector<16x96xf32>
    %233 = tpu.matmul %232, %168, %cst_87 {dimension_numbers = #tpu.dot_dimension_numbers<[1], [0], [0], [1], [0, 0, 1, 1], [], []>} : vector<16x64xbf16>, vector<64x96xbf16>, vector<16x96xf32> -> vector<16x96xf32>
    %234 = vector.extract_strided_slice %233 {offsets = [0, 0], sizes = [16, 64], strides = [1, 1]} : vector<16x96xf32> to vector<16x64xf32>
    %235 = vector.broadcast %169 : vector<1x64xf32> to vector<16x64xf32>
    %236 = arith.addf %234, %235 : vector<16x64xf32>
    %cst_88 = arith.constant 0.000000e+00 : f32
    %237 = vector.broadcast %cst_88 : f32 to vector<16x64xf32>
    %238 = arith.maximumf %236, %237 : vector<16x64xf32>
    %239 = math.absf %236 : vector<16x64xf32>
    %cst_89 = arith.constant 0.000000e+00 : f32
    %240 = vector.broadcast %cst_89 : f32 to vector<16x64xf32>
    %241 = arith.subf %240, %239 : vector<16x64xf32>
    %242 = math.exp %241 : vector<16x64xf32>
    %cst_90 = arith.constant 1.000000e+00 : f32
    %243 = vector.broadcast %cst_90 : f32 to vector<16x64xf32>
    %244 = arith.addf %243, %242 : vector<16x64xf32>
    %245 = math.log %244 : vector<16x64xf32>
    %246 = arith.addf %238, %245 : vector<16x64xf32>
    %247 = vector.extract_strided_slice %233 {offsets = [0, 64], sizes = [16, 16], strides = [1, 1]} : vector<16x96xf32> to vector<16x16xf32>
    %248 = vector.extract_strided_slice %233 {offsets = [0, 80], sizes = [16, 16], strides = [1, 1]} : vector<16x96xf32> to vector<16x16xf32>
    %249 = math.exp %170 : vector<16x64xf32>
    %cst_91 = arith.constant 0.000000e+00 : f32
    %250 = vector.broadcast %cst_91 : f32 to vector<16x64xf32>
    %251 = arith.subf %250, %249 : vector<16x64xf32>
    %252 = arith.mulf %246, %231 : vector<16x64xf32>
    %253 = vector.shape_cast %246 : vector<16x64xf32> to vector<16x1x64xf32>
    %254 = vector.shape_cast %251 : vector<16x64xf32> to vector<1x16x64xf32>
    %255 = vector.broadcast %253 : vector<16x1x64xf32> to vector<16x16x64xf32>
    %256 = vector.broadcast %254 : vector<1x16x64xf32> to vector<16x16x64xf32>
    %257 = arith.mulf %255, %256 : vector<16x16x64xf32>
    %258 = math.exp %257 : vector<16x16x64xf32>
    %259 = vector.shape_cast %248 : vector<16x16xf32> to vector<16x16x1xf32>
    %260 = vector.shape_cast %252 : vector<16x64xf32> to vector<16x1x64xf32>
    %261 = vector.broadcast %259 : vector<16x16x1xf32> to vector<16x16x64xf32>
    %262 = vector.broadcast %260 : vector<16x1x64xf32> to vector<16x16x64xf32>
    %263 = arith.mulf %261, %262 : vector<16x16x64xf32>
    %264 = vector.shape_cast %258 : vector<16x16x64xf32> to vector<2x8x16x64xf32>
    %265 = vector.shape_cast %263 : vector<16x16x64xf32> to vector<2x8x16x64xf32>
    %cst_92 = arith.constant 0.000000e+00 : f32
    %266 = vector.broadcast %cst_92 : f32 to vector<2x1x16x64xf32>
    %267 = vector.extract_strided_slice %264 {offsets = [0, 0, 0, 0], sizes = [2, 1, 16, 64], strides = [1, 1, 1, 1]} : vector<2x8x16x64xf32> to vector<2x1x16x64xf32>
    %268 = arith.mulf %267, %266 : vector<2x1x16x64xf32>
    %269 = vector.extract_strided_slice %265 {offsets = [0, 0, 0, 0], sizes = [2, 1, 16, 64], strides = [1, 1, 1, 1]} : vector<2x8x16x64xf32> to vector<2x1x16x64xf32>
    %270 = arith.addf %268, %269 : vector<2x1x16x64xf32>
    %c0_93 = arith.constant 0 : index
    %c0_94 = arith.constant 0 : index
    %c0_95 = arith.constant 0 : index
    %c0_96 = arith.constant 0 : index
    %271 = vector.load %arg5[%c0_93, %c0_94, %c0_95, %c0_96] : memref<2x8x16x64xf32, #tpu.memory_space<vmem>>, vector<2x1x16x64xf32>
    tpu.vector_store %arg5[%c0_93, %c0_94, %c0_95, %c0_96], %270 {strides = array<i32>} : memref<2x8x16x64xf32, #tpu.memory_space<vmem>>, vector<2x1x16x64xf32>,
    %272 = vector.extract_strided_slice %264 {offsets = [0, 1, 0, 0], sizes = [2, 1, 16, 64], strides = [1, 1, 1, 1]} : vector<2x8x16x64xf32> to vector<2x1x16x64xf32>
    %273 = arith.mulf %272, %270 : vector<2x1x16x64xf32>
    %274 = vector.extract_strided_slice %265 {offsets = [0, 1, 0, 0], sizes = [2, 1, 16, 64], strides = [1, 1, 1, 1]} : vector<2x8x16x64xf32> to vector<2x1x16x64xf32>
    %275 = arith.addf %273, %274 : vector<2x1x16x64xf32>
    %c0_97 = arith.constant 0 : index
    %c1_98 = arith.constant 1 : index
    %c0_99 = arith.constant 0 : index
    %c0_100 = arith.constant 0 : index
    %276 = vector.load %arg5[%c0_97, %c1_98, %c0_99, %c0_100] : memref<2x8x16x64xf32, #tpu.memory_space<vmem>>, vector<2x1x16x64xf32>
    tpu.vector_store %arg5[%c0_97, %c1_98, %c0_99, %c0_100], %275 {strides = array<i32>} : memref<2x8x16x64xf32, #tpu.memory_space<vmem>>, vector<2x1x16x64xf32>,
    %277 = vector.extract_strided_slice %264 {offsets = [0, 2, 0, 0], sizes = [2, 1, 16, 64], strides = [1, 1, 1, 1]} : vector<2x8x16x64xf32> to vector<2x1x16x64xf32>
    %278 = arith.mulf %277, %275 : vector<2x1x16x64xf32>
    %279 = vector.extract_strided_slice %265 {offsets = [0, 2, 0, 0], sizes = [2, 1, 16, 64], strides = [1, 1, 1, 1]} : vector<2x8x16x64xf32> to vector<2x1x16x64xf32>
    %280 = arith.addf %278, %279 : vector<2x1x16x64xf32>
    %c0_101 = arith.constant 0 : index
    %c2_102 = arith.constant 2 : index
    %c0_103 = arith.constant 0 : index
    %c0_104 = arith.constant 0 : index
    %281 = vector.load %arg5[%c0_101, %c2_102, %c0_103, %c0_104] : memref<2x8x16x64xf32, #tpu.memory_space<vmem>>, vector<2x1x16x64xf32>
    tpu.vector_store %arg5[%c0_101, %c2_102, %c0_103, %c0_104], %280 {strides = array<i32>} : memref<2x8x16x64xf32, #tpu.memory_space<vmem>>, vector<2x1x16x64xf32>,
    %282 = vector.extract_strided_slice %264 {offsets = [0, 3, 0, 0], sizes = [2, 1, 16, 64], strides = [1, 1, 1, 1]} : vector<2x8x16x64xf32> to vector<2x1x16x64xf32>
    %283 = arith.mulf %282, %280 : vector<2x1x16x64xf32>
    %284 = vector.extract_strided_slice %265 {offsets = [0, 3, 0, 0], sizes = [2, 1, 16, 64], strides = [1, 1, 1, 1]} : vector<2x8x16x64xf32> to vector<2x1x16x64xf32>
    %285 = arith.addf %283, %284 : vector<2x1x16x64xf32>
    %c0_105 = arith.constant 0 : index
    %c3_106 = arith.constant 3 : index
    %c0_107 = arith.constant 0 : index
    %c0_108 = arith.constant 0 : index
    %286 = vector.load %arg5[%c0_105, %c3_106, %c0_107, %c0_108] : memref<2x8x16x64xf32, #tpu.memory_space<vmem>>, vector<2x1x16x64xf32>
    tpu.vector_store %arg5[%c0_105, %c3_106, %c0_107, %c0_108], %285 {strides = array<i32>} : memref<2x8x16x64xf32, #tpu.memory_space<vmem>>, vector<2x1x16x64xf32>,
    %287 = vector.extract_strided_slice %264 {offsets = [0, 4, 0, 0], sizes = [2, 1, 16, 64], strides = [1, 1, 1, 1]} : vector<2x8x16x64xf32> to vector<2x1x16x64xf32>
    %288 = arith.mulf %287, %285 : vector<2x1x16x64xf32>
    %289 = vector.extract_strided_slice %265 {offsets = [0, 4, 0, 0], sizes = [2, 1, 16, 64], strides = [1, 1, 1, 1]} : vector<2x8x16x64xf32> to vector<2x1x16x64xf32>
    %290 = arith.addf %288, %289 : vector<2x1x16x64xf32>
    %c0_109 = arith.constant 0 : index
    %c4_110 = arith.constant 4 : index
    %c0_111 = arith.constant 0 : index
    %c0_112 = arith.constant 0 : index
    %291 = vector.load %arg5[%c0_109, %c4_110, %c0_111, %c0_112] : memref<2x8x16x64xf32, #tpu.memory_space<vmem>>, vector<2x1x16x64xf32>
    tpu.vector_store %arg5[%c0_109, %c4_110, %c0_111, %c0_112], %290 {strides = array<i32>} : memref<2x8x16x64xf32, #tpu.memory_space<vmem>>, vector<2x1x16x64xf32>,
    %292 = vector.extract_strided_slice %264 {offsets = [0, 5, 0, 0], sizes = [2, 1, 16, 64], strides = [1, 1, 1, 1]} : vector<2x8x16x64xf32> to vector<2x1x16x64xf32>
    %293 = arith.mulf %292, %290 : vector<2x1x16x64xf32>
    %294 = vector.extract_strided_slice %265 {offsets = [0, 5, 0, 0], sizes = [2, 1, 16, 64], strides = [1, 1, 1, 1]} : vector<2x8x16x64xf32> to vector<2x1x16x64xf32>
    %295 = arith.addf %293, %294 : vector<2x1x16x64xf32>
    %c0_113 = arith.constant 0 : index
    %c5_114 = arith.constant 5 : index
    %c0_115 = arith.constant 0 : index
    %c0_116 = arith.constant 0 : index
    %296 = vector.load %arg5[%c0_113, %c5_114, %c0_115, %c0_116] : memref<2x8x16x64xf32, #tpu.memory_space<vmem>>, vector<2x1x16x64xf32>
    tpu.vector_store %arg5[%c0_113, %c5_114, %c0_115, %c0_116], %295 {strides = array<i32>} : memref<2x8x16x64xf32, #tpu.memory_space<vmem>>, vector<2x1x16x64xf32>,
    %297 = vector.extract_strided_slice %264 {offsets = [0, 6, 0, 0], sizes = [2, 1, 16, 64], strides = [1, 1, 1, 1]} : vector<2x8x16x64xf32> to vector<2x1x16x64xf32>
    %298 = arith.mulf %297, %295 : vector<2x1x16x64xf32>
    %299 = vector.extract_strided_slice %265 {offsets = [0, 6, 0, 0], sizes = [2, 1, 16, 64], strides = [1, 1, 1, 1]} : vector<2x8x16x64xf32> to vector<2x1x16x64xf32>
    %300 = arith.addf %298, %299 : vector<2x1x16x64xf32>
    %c0_117 = arith.constant 0 : index
    %c6_118 = arith.constant 6 : index
    %c0_119 = arith.constant 0 : index
    %c0_120 = arith.constant 0 : index
    %301 = vector.load %arg5[%c0_117, %c6_118, %c0_119, %c0_120] : memref<2x8x16x64xf32, #tpu.memory_space<vmem>>, vector<2x1x16x64xf32>
    tpu.vector_store %arg5[%c0_117, %c6_118, %c0_119, %c0_120], %300 {strides = array<i32>} : memref<2x8x16x64xf32, #tpu.memory_space<vmem>>, vector<2x1x16x64xf32>,
    %302 = vector.extract_strided_slice %264 {offsets = [0, 7, 0, 0], sizes = [2, 1, 16, 64], strides = [1, 1, 1, 1]} : vector<2x8x16x64xf32> to vector<2x1x16x64xf32>
    %303 = arith.mulf %302, %300 : vector<2x1x16x64xf32>
    %304 = vector.extract_strided_slice %265 {offsets = [0, 7, 0, 0], sizes = [2, 1, 16, 64], strides = [1, 1, 1, 1]} : vector<2x8x16x64xf32> to vector<2x1x16x64xf32>
    %305 = arith.addf %303, %304 : vector<2x1x16x64xf32>
    %c0_121 = arith.constant 0 : index
    %c7_122 = arith.constant 7 : index
    %c0_123 = arith.constant 0 : index
    %c0_124 = arith.constant 0 : index
    %306 = vector.load %arg5[%c0_121, %c7_122, %c0_123, %c0_124] : memref<2x8x16x64xf32, #tpu.memory_space<vmem>>, vector<2x1x16x64xf32>
    tpu.vector_store %arg5[%c0_121, %c7_122, %c0_123, %c0_124], %305 {strides = array<i32>} : memref<2x8x16x64xf32, #tpu.memory_space<vmem>>, vector<2x1x16x64xf32>,
    %c0_125 = arith.constant 0 : index
    %c0_126 = arith.constant 0 : index
    %c0_127 = arith.constant 0 : index
    %c0_128 = arith.constant 0 : index
    %307 = vector.load %arg5[%c0_125, %c0_126, %c0_127, %c0_128] : memref<2x8x16x64xf32, #tpu.memory_space<vmem>>, vector<2x8x16x64xf32>
    %308 = vector.shape_cast %247 : vector<16x16xf32> to vector<2x8x16xf32>
    %309 = vector.shape_cast %308 : vector<2x8x16xf32> to vector<2x8x16x1xf32>
    %310 = vector.broadcast %309 : vector<2x8x16x1xf32> to vector<2x8x16x64xf32>
    %311 = arith.mulf %310, %307 : vector<2x8x16x64xf32>
    %cst_129 = arith.constant dense<0.000000e+00> : vector<2x8x64xf32>
    %312 = vector.multi_reduction <add>, %311, %cst_129 [2] : vector<2x8x16x64xf32> to vector<2x8x64xf32>
    %313 = vector.shape_cast %312 : vector<2x8x64xf32> to vector<16x64xf32>
    %314 = vector.broadcast %171 : vector<1x64xf32> to vector<16x64xf32>
    %315 = arith.mulf %314, %231 : vector<16x64xf32>
    %316 = arith.addf %313, %315 : vector<16x64xf32>
    %317 = arith.negf %188 : vector<16x64xf32>
    %318 = math.exp %317 : vector<16x64xf32>
    %cst_130 = arith.constant 1.000000e+00 : f32
    %319 = vector.broadcast %cst_130 : f32 to vector<16x64xf32>
    %320 = arith.addf %319, %318 : vector<16x64xf32>
    %321 = arith.divf %319, %320 : vector<16x64xf32>
    %322 = arith.mulf %188, %321 : vector<16x64xf32>
    %323 = arith.mulf %316, %322 : vector<16x64xf32>
    %324 = arith.truncf %323 : vector<16x64xf32> to vector<16x64xbf16>
    %cst_131 = arith.constant dense<0.000000e+00> : vector<16x32xf32>
    %325 = tpu.matmul %324, %172, %cst_131 {dimension_numbers = #tpu.dot_dimension_numbers<[1], [0], [0], [1], [0, 0, 1, 1], [], []>} : vector<16x64xbf16>, vector<64x32xbf16>, vector<16x32xf32> -> vector<16x32xf32>
    %326 = arith.addf %325, %163 : vector<16x32xf32>
    %c320 = arith.constant 320 : index
    %c0_132 = arith.constant 0 : index
    %327 = vector.load %arg2[%c320, %c0_132] : memref<384x128xbf16, #tpu.memory_space<vmem>>, vector<32x96xbf16>
    %c112 = arith.constant 112 : index
    %c0_133 = arith.constant 0 : index
    %328 = vector.load %arg3[%c112, %c0_133] : memref<128x128xf32, #tpu.memory_space<vmem>>, vector<1x96xf32>
    %c352 = arith.constant 352 : index
    %c0_134 = arith.constant 0 : index
    %329 = vector.load %arg2[%c352, %c0_134] : memref<384x128xbf16, #tpu.memory_space<vmem>>, vector<32x32xbf16>
    %c120 = arith.constant 120 : index
    %c0_135 = arith.constant 0 : index
    %330 = vector.load %arg3[%c120, %c0_135] : memref<128x128xf32, #tpu.memory_space<vmem>>, vector<1x32xf32>
    %331 = arith.truncf %326 : vector<16x32xf32> to vector<16x32xbf16>
    %cst_136 = arith.constant dense<0.000000e+00> : vector<16x96xf32>
    %332 = tpu.matmul %331, %327, %cst_136 {dimension_numbers = #tpu.dot_dimension_numbers<[1], [0], [0], [1], [0, 0, 1, 1], [], []>} : vector<16x32xbf16>, vector<32x96xbf16>, vector<16x96xf32> -> vector<16x96xf32>
    %333 = vector.broadcast %328 : vector<1x96xf32> to vector<16x96xf32>
    %334 = arith.addf %332, %333 : vector<16x96xf32>
    %335 = vector.extract_strided_slice %334 {offsets = [0, 0], sizes = [16, 32], strides = [1, 1]} : vector<16x96xf32> to vector<16x32xf32>
    %cst_137 = arith.constant 0.353553385 : f32
    %336 = vector.broadcast %cst_137 : f32 to vector<16x32xf32>
    %337 = arith.mulf %335, %336 : vector<16x32xf32>
    %338 = vector.extract_strided_slice %334 {offsets = [0, 32], sizes = [16, 32], strides = [1, 1]} : vector<16x96xf32> to vector<16x32xf32>
    %339 = vector.extract_strided_slice %334 {offsets = [0, 64], sizes = [16, 32], strides = [1, 1]} : vector<16x96xf32> to vector<16x32xf32>
    %340 = tpu.iota {dimensions = array<i32: 0>} : vector<16x16xi32>
    %341 = tpu.iota {dimensions = array<i32: 1>} : vector<16x16xi32>
    %c3_i32_138 = arith.constant 3 : i32
    %342 = vector.broadcast %c3_i32_138 : i32 to vector<16x16xi32>
    %343 = arith.shrsi %340, %342 : vector<16x16xi32>
    %c3_i32_139 = arith.constant 3 : i32
    %344 = vector.broadcast %c3_i32_139 : i32 to vector<16x16xi32>
    %345 = arith.shrsi %341, %344 : vector<16x16xi32>
    %346 = arith.cmpi eq, %343, %345 : vector<16x16xi32>
    %347 = vector.extract_strided_slice %337 {offsets = [0, 0], sizes = [16, 8], strides = [1, 1]} : vector<16x32xf32> to vector<16x8xf32>
    %348 = vector.extract_strided_slice %338 {offsets = [0, 0], sizes = [16, 8], strides = [1, 1]} : vector<16x32xf32> to vector<16x8xf32>
    %cst_140 = arith.constant dense<0.000000e+00> : vector<16x16xf32>
    %349 = tpu.matmul %347, %348, %cst_140 {dimension_numbers = #tpu.dot_dimension_numbers<[1], [1], [0], [0], [0, 0, 1, 0], [], []>} : vector<16x8xf32>, vector<16x8xf32>, vector<16x16xf32> -> vector<16x16xf32>
    %cst_141 = arith.constant -1.000000e+30 : f32
    %350 = vector.broadcast %cst_141 : f32 to vector<16x16xf32>
    %351 = arith.select %346, %349, %350 : vector<16x16xi1>, vector<16x16xf32>
    %cst_142 = arith.constant dense<0xFF800000> : vector<16xf32>
    %352 = vector.multi_reduction <maximumf>, %351, %cst_142 [1] : vector<16x16xf32> to vector<16xf32>
    %353 = vector.shape_cast %352 : vector<16xf32> to vector<16x1xf32>
    %354 = vector.broadcast %353 : vector<16x1xf32> to vector<16x16xf32>
    %355 = arith.subf %351, %354 : vector<16x16xf32>
    %356 = math.exp %355 : vector<16x16xf32>
    %cst_143 = arith.constant dense<0.000000e+00> : vector<16xf32>
    %357 = vector.multi_reduction <add>, %356, %cst_143 [1] : vector<16x16xf32> to vector<16xf32>
    %358 = vector.shape_cast %357 : vector<16xf32> to vector<16x1xf32>
    %359 = tpu.reciprocal %358 : vector<16x1xf32> -> vector<16x1xf32>
    %360 = vector.broadcast %359 : vector<16x1xf32> to vector<16x16xf32>
    %361 = arith.mulf %356, %360 : vector<16x16xf32>
    %362 = vector.extract_strided_slice %339 {offsets = [0, 0], sizes = [16, 8], strides = [1, 1]} : vector<16x32xf32> to vector<16x8xf32>
    %cst_144 = arith.constant dense<0.000000e+00> : vector<16x8xf32>
    %363 = tpu.matmul %361, %362, %cst_144 {dimension_numbers = #tpu.dot_dimension_numbers<[1], [0], [0], [1], [0, 0, 1, 1], [], []>} : vector<16x16xf32>, vector<16x8xf32>, vector<16x8xf32> -> vector<16x8xf32>
    %364 = vector.extract_strided_slice %337 {offsets = [0, 8], sizes = [16, 8], strides = [1, 1]} : vector<16x32xf32> to vector<16x8xf32>
    %365 = vector.extract_strided_slice %338 {offsets = [0, 8], sizes = [16, 8], strides = [1, 1]} : vector<16x32xf32> to vector<16x8xf32>
    %cst_145 = arith.constant dense<0.000000e+00> : vector<16x16xf32>
    %366 = tpu.matmul %364, %365, %cst_145 {dimension_numbers = #tpu.dot_dimension_numbers<[1], [1], [0], [0], [0, 0, 1, 0], [], []>} : vector<16x8xf32>, vector<16x8xf32>, vector<16x16xf32> -> vector<16x16xf32>
    %cst_146 = arith.constant -1.000000e+30 : f32
    %367 = vector.broadcast %cst_146 : f32 to vector<16x16xf32>
    %368 = arith.select %346, %366, %367 : vector<16x16xi1>, vector<16x16xf32>
    %cst_147 = arith.constant dense<0xFF800000> : vector<16xf32>
    %369 = vector.multi_reduction <maximumf>, %368, %cst_147 [1] : vector<16x16xf32> to vector<16xf32>
    %370 = vector.shape_cast %369 : vector<16xf32> to vector<16x1xf32>
    %371 = vector.broadcast %370 : vector<16x1xf32> to vector<16x16xf32>
    %372 = arith.subf %368, %371 : vector<16x16xf32>
    %373 = math.exp %372 : vector<16x16xf32>
    %cst_148 = arith.constant dense<0.000000e+00> : vector<16xf32>
    %374 = vector.multi_reduction <add>, %373, %cst_148 [1] : vector<16x16xf32> to vector<16xf32>
    %375 = vector.shape_cast %374 : vector<16xf32> to vector<16x1xf32>
    %376 = tpu.reciprocal %375 : vector<16x1xf32> -> vector<16x1xf32>
    %377 = vector.broadcast %376 : vector<16x1xf32> to vector<16x16xf32>
    %378 = arith.mulf %373, %377 : vector<16x16xf32>
    %379 = vector.extract_strided_slice %339 {offsets = [0, 8], sizes = [16, 8], strides = [1, 1]} : vector<16x32xf32> to vector<16x8xf32>
    %cst_149 = arith.constant dense<0.000000e+00> : vector<16x8xf32>
    %380 = tpu.matmul %378, %379, %cst_149 {dimension_numbers = #tpu.dot_dimension_numbers<[1], [0], [0], [1], [0, 0, 1, 1], [], []>} : vector<16x16xf32>, vector<16x8xf32>, vector<16x8xf32> -> vector<16x8xf32>
    %381 = vector.extract_strided_slice %337 {offsets = [0, 16], sizes = [16, 8], strides = [1, 1]} : vector<16x32xf32> to vector<16x8xf32>
    %382 = vector.extract_strided_slice %338 {offsets = [0, 16], sizes = [16, 8], strides = [1, 1]} : vector<16x32xf32> to vector<16x8xf32>
    %cst_150 = arith.constant dense<0.000000e+00> : vector<16x16xf32>
    %383 = tpu.matmul %381, %382, %cst_150 {dimension_numbers = #tpu.dot_dimension_numbers<[1], [1], [0], [0], [0, 0, 1, 0], [], []>} : vector<16x8xf32>, vector<16x8xf32>, vector<16x16xf32> -> vector<16x16xf32>
    %cst_151 = arith.constant -1.000000e+30 : f32
    %384 = vector.broadcast %cst_151 : f32 to vector<16x16xf32>
    %385 = arith.select %346, %383, %384 : vector<16x16xi1>, vector<16x16xf32>
    %cst_152 = arith.constant dense<0xFF800000> : vector<16xf32>
    %386 = vector.multi_reduction <maximumf>, %385, %cst_152 [1] : vector<16x16xf32> to vector<16xf32>
    %387 = vector.shape_cast %386 : vector<16xf32> to vector<16x1xf32>
    %388 = vector.broadcast %387 : vector<16x1xf32> to vector<16x16xf32>
    %389 = arith.subf %385, %388 : vector<16x16xf32>
    %390 = math.exp %389 : vector<16x16xf32>
    %cst_153 = arith.constant dense<0.000000e+00> : vector<16xf32>
    %391 = vector.multi_reduction <add>, %390, %cst_153 [1] : vector<16x16xf32> to vector<16xf32>
    %392 = vector.shape_cast %391 : vector<16xf32> to vector<16x1xf32>
    %393 = tpu.reciprocal %392 : vector<16x1xf32> -> vector<16x1xf32>
    %394 = vector.broadcast %393 : vector<16x1xf32> to vector<16x16xf32>
    %395 = arith.mulf %390, %394 : vector<16x16xf32>
    %396 = vector.extract_strided_slice %339 {offsets = [0, 16], sizes = [16, 8], strides = [1, 1]} : vector<16x32xf32> to vector<16x8xf32>
    %cst_154 = arith.constant dense<0.000000e+00> : vector<16x8xf32>
    %397 = tpu.matmul %395, %396, %cst_154 {dimension_numbers = #tpu.dot_dimension_numbers<[1], [0], [0], [1], [0, 0, 1, 1], [], []>} : vector<16x16xf32>, vector<16x8xf32>, vector<16x8xf32> -> vector<16x8xf32>
    %398 = vector.extract_strided_slice %337 {offsets = [0, 24], sizes = [16, 8], strides = [1, 1]} : vector<16x32xf32> to vector<16x8xf32>
    %399 = vector.extract_strided_slice %338 {offsets = [0, 24], sizes = [16, 8], strides = [1, 1]} : vector<16x32xf32> to vector<16x8xf32>
    %cst_155 = arith.constant dense<0.000000e+00> : vector<16x16xf32>
    %400 = tpu.matmul %398, %399, %cst_155 {dimension_numbers = #tpu.dot_dimension_numbers<[1], [1], [0], [0], [0, 0, 1, 0], [], []>} : vector<16x8xf32>, vector<16x8xf32>, vector<16x16xf32> -> vector<16x16xf32>
    %cst_156 = arith.constant -1.000000e+30 : f32
    %401 = vector.broadcast %cst_156 : f32 to vector<16x16xf32>
    %402 = arith.select %346, %400, %401 : vector<16x16xi1>, vector<16x16xf32>
    %cst_157 = arith.constant dense<0xFF800000> : vector<16xf32>
    %403 = vector.multi_reduction <maximumf>, %402, %cst_157 [1] : vector<16x16xf32> to vector<16xf32>
    %404 = vector.shape_cast %403 : vector<16xf32> to vector<16x1xf32>
    %405 = vector.broadcast %404 : vector<16x1xf32> to vector<16x16xf32>
    %406 = arith.subf %402, %405 : vector<16x16xf32>
    %407 = math.exp %406 : vector<16x16xf32>
    %cst_158 = arith.constant dense<0.000000e+00> : vector<16xf32>
    %408 = vector.multi_reduction <add>, %407, %cst_158 [1] : vector<16x16xf32> to vector<16xf32>
    %409 = vector.shape_cast %408 : vector<16xf32> to vector<16x1xf32>
    %410 = tpu.reciprocal %409 : vector<16x1xf32> -> vector<16x1xf32>
    %411 = vector.broadcast %410 : vector<16x1xf32> to vector<16x16xf32>
    %412 = arith.mulf %407, %411 : vector<16x16xf32>
    %413 = vector.extract_strided_slice %339 {offsets = [0, 24], sizes = [16, 8], strides = [1, 1]} : vector<16x32xf32> to vector<16x8xf32>
    %cst_159 = arith.constant dense<0.000000e+00> : vector<16x8xf32>
    %414 = tpu.matmul %412, %413, %cst_159 {dimension_numbers = #tpu.dot_dimension_numbers<[1], [0], [0], [1], [0, 0, 1, 1], [], []>} : vector<16x16xf32>, vector<16x8xf32>, vector<16x8xf32> -> vector<16x8xf32>
    %415 = tpu.concatenate %363, %380, %397, %414 in 1 : vector<16x8xf32>, vector<16x8xf32>, vector<16x8xf32>, vector<16x8xf32> -> vector<16x32xf32>
    %416 = arith.truncf %415 : vector<16x32xf32> to vector<16x32xbf16>
    %cst_160 = arith.constant dense<0.000000e+00> : vector<16x32xf32>
    %417 = tpu.matmul %416, %329, %cst_160 {dimension_numbers = #tpu.dot_dimension_numbers<[1], [0], [0], [1], [0, 0, 1, 1], [], []>} : vector<16x32xbf16>, vector<32x32xbf16>, vector<16x32xf32> -> vector<16x32xf32>
    %418 = vector.broadcast %330 : vector<1x32xf32> to vector<16x32xf32>
    %419 = arith.addf %417, %418 : vector<16x32xf32>
    %c0_161 = arith.constant 0 : index
    %c0_162 = arith.constant 0 : index
    %420 = vector.load %arg4[%c0_161, %c0_162] : memref<16x32xf32, #tpu.memory_space<vmem>>, vector<16x32xf32>
    tpu.vector_store %arg4[%c0_161, %c0_162], %419 {strides = array<i32>} : memref<16x32xf32, #tpu.memory_space<vmem>>, vector<16x32xf32>,
    return
  }
  func.func @transform_0(%arg0: i32) -> (i32, i32) {
    %c0_i32 = arith.constant 0 : i32
    %c0_i32_0 = arith.constant 0 : i32
    %c0_i32_1 = arith.constant 0 : i32
    return %c0_i32, %c0_i32_0 : i32, i32
  }
  func.func @transform_1(%arg0: i32) -> (i32, i32) {
    %c0_i32 = arith.constant 0 : i32
    %c0_i32_0 = arith.constant 0 : i32
    %c0_i32_1 = arith.constant 0 : i32
    return %c0_i32, %c0_i32_0 : i32, i32
  }
  func.func @transform_2(%arg0: i32) -> (i32, i32) {
    %c0_i32 = arith.constant 0 : i32
    %c0_i32_0 = arith.constant 0 : i32
    %c0_i32_1 = arith.constant 0 : i32
    return %c0_i32, %c0_i32_0 : i32, i32
  }
  func.func @transform_3(%arg0: i32) -> (i32, i32) {
    %c0_i32 = arith.constant 0 : i32
    %c0_i32_0 = arith.constant 0 : i32
    %c0_i32_1 = arith.constant 0 : i32
    return %c0_i32, %c0_i32_0 : i32, i32
  }
}

</mosaic_0001>

<bundles_post_ra>
// kernel: tpu_custom_call.1
= control target key start
LH: loop header
LB: loop body
LE: loop exit
PB: predicated region body
PF: predicated region fallthrough
CT: control target
= control target key end

     0   :  { %8 = vsyncpa [#allocation4], 0  ;;  %s6536_s0 = inlined_call_operand.hbm [shape: f32[16,32], index: 0, kind: input, shape index: {}]   ;;  %s6537_s1 = inlined_call_operand.hbm [shape: bf16[384,128], index: 1, kind: input, shape index: {}]   ;;  %s6538_s2 = inlined_call_operand.hbm [shape: f32[128,128], index: 2, kind: input, shape index: {}]   ;;  %s6539_s3 = inlined_call_operand.hbm [shape: f32[16,32], index: 3, kind: output, shape index: {}]  }
   0x1   :  { %9 = vsyncpa [#allocation7], 0 }
   0x2   :  { %10 = vsyncpa [#allocation5], 0  ;;  %s5102_s12 = smov [#allocation6]  }
   0x3   :  { %s28_s13 = sshll.u32 %s5102_s12, 4  ;;  %s29_s13 = int_to_ptr.vmem [resolvable:$true] %s28_s13 }
   0x4   :  { %s5024_s14 = scalar_lea.vmem %s29_s13, 3072  ;;  %p5029_p1 = scmp.lt.s32.totalorder %s29_s13, %s29_s13 }
   0x5   :  { %p5025_p0 = scmp.ne.s32.totalorder %s29_s13, %s5024_s14  ;;  %p5030_p2 = scmp.lt.s32.totalorder %s5024_s14, %s5024_s14 }
   0x7   :  { %p5031_p3 = por %p5030_p2, %p5029_p1 }
   0x9   :  { %p5032_p4 = pnand %p5031_p3, %p5025_p0 }
   0xb   :  { %5035 = shalt.err (!%p5032_p4)
}
   0xc   :  { %s5103_s15 = smov 64   ;;  %s5104_s16 = smov 4  }
   0xd   :  { %34 = dma.hbm_to_vmem [thread:$0]  %s6537_s1, 3072, %s29_s13, [#allocation7], %s5103_s15, %s5103_s15, %s5104_s16  }
   0xe   :  { %s5105_s19 = smov [#allocation3]  }
   0xf   :  { %s16_s20 = sshll.u32 %s5105_s19, 4  ;;  %s17_s20 = int_to_ptr.vmem [resolvable:$true] %s16_s20 }
  0x10   :  { %s5044_s21 = scalar_lea.vmem %s17_s20, 256  ;;  %p5049_p6 = scmp.lt.s32.totalorder %s17_s20, %s17_s20 }
  0x11   :  { %p5045_p5 = scmp.ne.s32.totalorder %s17_s20, %s5044_s21  ;;  %p5050_p7 = scmp.lt.s32.totalorder %s5044_s21, %s5044_s21 }
  0x13   :  { %p5051_p8 = por %p5050_p7, %p5049_p6 }
  0x15   :  { %p5052_p9 = pnand %p5051_p8, %p5045_p5 }
  0x17   :  { %5055 = shalt.err (!%p5052_p9)
}
  0x18   :  { %s5106_s22 = smov 128   ;;  %s5107_s23 = smov 8  }
  0x19   :  { %22 = dma.hbm_to_vmem [thread:$0]  %s6536_s0, 256, %s17_s20, [#allocation4], %s5106_s22, %s5106_s22, %s5107_s23  }
  0x1a   :  { %s5108_s1 = smov [#allocation8]  }
  0x1b   :  { %s40_s26 = sshll.u32 %s5108_s1, 4  ;;  %s41_s26 = int_to_ptr.vmem [resolvable:$true] %s40_s26 }
  0x1c   :  { %s5064_s27 = scalar_lea.vmem %s41_s26, 2048  ;;  %p5069_p11 = scmp.lt.s32.totalorder %s41_s26, %s41_s26 }
  0x1d   :  { %p5065_p10 = scmp.ne.s32.totalorder %s41_s26, %s5064_s27  ;;  %p5070_p12 = scmp.lt.s32.totalorder %s5064_s27, %s5064_s27 }
  0x1f   :  { %p5071_p13 = por %p5070_p12, %p5069_p11 }
  0x21   :  { %p5072_p0 = pnand %p5071_p13, %p5065_p10 }
  0x23   :  { %5075 = shalt.err (!%p5072_p0)
}
  0x24   :  { %46 = dma.hbm_to_vmem [thread:$0]  %s6538_s2, 2048, %s41_s26, [#allocation7], %s5106_s22, %s5106_s22, %s5107_s23  }
  0x25   :  { %5096 = dma.done.wait [#allocation4], 256  }
  0x26   :  { %5097 = vsyncadd [#allocation4], 4294967040 }
  0x27   :  { %5098 = dma.done.wait [#allocation7], 5120  }
  0x28   :  { %5099 = vsyncadd [#allocation7], 4294962176  ;;  %v57_v0 = vld [vmem:[#allocation3] sm:$0xff]  ;;  %vm88_vm0 = vcmask 261120   ;;  %v58_v1 = vld [vmem:[#allocation3 + $0x8] sm:$0xff]  ;;  %v6541_v7 = vmov 0.0   ;;  %v6540_v27 = vlaneseq }
  0x29   :  { %v86_v2 = vmul.f32 %v57_v0, %v57_v0  ;;  %v87_v3 = vmul.f32 %v58_v1, %v58_v1  ;;  %v4766_v6 = vld [vmem:[#allocation6 + $0x8] sm:$0xff]   ;;  %4592 = vmatprep.subr.bf16.mxu1 %v6541_v7  ;;  %vm5110_vm1 = vmmov 0   ;;  %v4767_v8 = vld [vmem:[#allocation6] sm:$0xff]   ;;  %4612 = vmatprep.subr.bf16.mxu0 %v6541_v7  ;;  %v4770_v25 = vld [vmem:[#allocation6 + $0x18] sm:$0xff]   ;;  %vm275_vm11 = vcmask 523264   ;;  %s5112_s0 = smov 88  }
  0x2a   :  { %4596 = vmatprep.mubr.msk.bf16.mxu1 %vm5110_vm1, %v6541_v7  ;;  %4593 = vmatpush3.bf16.msra.mxu1 %v4766_v6  ;;  %v4454_v18 = vld [vmem:[#allocation8] ss:$0 sm:$0xff]  ;;  %v4768_v23 = vld [vmem:[#allocation6 + $0x28] sm:$0xff]   ;;  %v4771_v26 = vld [vmem:[#allocation6 + $0x10] sm:$0xff]   ;;  %v5180_v28 = vshrl.u32 %v6540_v27, 7  ;;  %vm6565_vm12 = vcmask 1041409  }
  0x2b   :  { %v89_v4 = vsel %vm88_vm0, %v86_v2, 0.0  ;;  %v92_v5 = vsel %vm88_vm0, %v87_v3, 0.0  ;;  %4594 = vmatprep.subr.bf16.mxu1 %v6541_v7  ;;  %4620 = vmatprep.mubr.msk.bf16.mxu0 %vm5110_vm1, %v6541_v7  ;;  %v4769_v24 = vld [vmem:[#allocation6 + $0x20] sm:$0xff]   ;;  %v64_v31 = vld [vmem:[#allocation8 + $0x8] sm:$0xf]  ;;  %vm1671_vm13 = vcmask 1042434  }
  0x2c   :  { %90 = vadd.xlane.f32.xlu0 %v89_v4  ;;  %6568 = vst [vmem:[#allocation13_spill] sm:$0xff] %v5180_v28  ;;  %v5183_v29 = vadd.s32 8, %v5180_v28  ;;  %v5186_v30 = vsub.s32 3, %v5180_v28  ;;  %v5189_v32 = vand.u32 7, %v5180_v28  ;;  %v5192_v33 = vsub.s32 0, %v5180_v28  ;;  %s5113_s2 = smov 96  }
  0x2d   :  { %v5200_v36 = vsub.s32 1, %v5180_v28  ;;  %vm181_vm2 = vcmp.lt.s32.totalorder %v5180_v28, 3  ;;  %vm198_vm4 = vcmp.lt.s32.totalorder %v5180_v28, 2  ;;  %vm215_vm5 = vcmp.lt.s32.totalorder %v5180_v28, 1  ;;  %v4458_v56 = vld [vmem:[#allocation8 + $0x10] ss:$0 sm:$0xff] }
  0x2e   :  { %4595 = vmatpush3.bf16.msra.mxu1 %v4767_v8  ;;  %6569 = vst [vmem:[#allocation14_spill] sm:$0xff] %v5183_v29  ;;  %6570 = vst [vmem:[#allocation15_spill] sm:$0xff] %v5186_v30  ;;  %v5195_v34 = vand.u32 7, %v5183_v29  ;;  %v231_v37 = vrot.slane %v64_v31, %v5186_v30  ;;  %vm177_vm3 = vcmp.ge.s32.totalorder %v5189_v32, 3  ;;  %v189_v40 = vrot.slane %v64_v31, %v5192_v33  ;;  %s5114_s30 = smov 80   ;;  %s5115_s4 = smov 120  }
  0x2f   :  { %4600 = vmatprep.subr.bf16.mxu1 %v6541_v7  ;;  %6571 = vst [vmem:[#allocation16_spill] sm:$0xff] %v5189_v32  ;;  %6573 = vst [vmem:[#allocation18_spill] sm:$0xff] %v5200_v36  ;;  %vm194_vm7 = vcmp.ge.s32.totalorder %v5189_v32, 2  ;;  %v206_v42 = vrot.slane %v64_v31, %v5200_v36  ;;  %vm6566_vm9 = vcmp.ge.s32.totalorder %v5189_v32, 1  ;;  %v5217_v43 = vsub.s32 2, %v5180_v28  ;;  %s5116_s5 = smov 112  }
  0x30   :  { %93 = vadd.xlane.f32.xlu0 %v92_v5  ;;  %6572 = vst [vmem:[#allocation17_spill] sm:$0xff] %v5195_v34  ;;  %vm178_vm6 = vcmp.ge.s32.totalorder %v5195_v34, 3  ;;  %vm195_vm8 = vcmp.ge.s32.totalorder %v5195_v34, 2  ;;  %vm6564_vm10 = vcmp.ge.s32.totalorder %v5195_v34, 1  ;;  %vm1674_vm14 = vcmask 1043459   ;;  %s5117_s6 = smov 56  }
  0x31   :  { %6574 = vst [vmem:[#allocation19_spill] sm:$0xff] %v5217_v43  ;;  %vm1677_vm15 = vcmask 1044484   ;;  %s5118_s7 = smov 48   ;;  %s5119_s8 = smov 72  }
  0x32   :  { %s5120_s9 = smov 104   ;;  %s5121_s10 = smov 40  }
  0x33   :  { %s5122_s11 = smov 16   ;;  %s5123_s12 = smov 24  }
  0x34   :  { %s5124_s13 = smov [#allocation9]  }
  0x35   :  { %s4441_s14 = sshll.u32 %s5124_s13, 4  ;;  %s4442_s14 = int_to_ptr.vmem [resolvable:$true] %s4441_s14 }
  0x36   :  { %p5081_p2 = scmp.lt.s32.totalorder %s4442_s14, %s4442_s14 }
  0xb5   :  { %v91_v9 = vpop.xlane.xlu0 %90 }
  0xb6   :  { %v96_v10 = vmul.f32 0.03125, %v91_v9 }
  0xb8   :  { %v98_v11 = vadd.f32 1e-05, %v96_v10 }
  0xb9   :  { %v94_v12 = vpop.xlane.xlu0 %93 }
  0xba   :  { %4790 = vrsqrt.f32 %v98_v11  ;;  %v97_v13 = vmul.f32 0.03125, %v94_v12 }
  0xbc   :  { %v99_v14 = vadd.f32 1e-05, %v97_v13 }
  0xbe   :  { %4792 = vrsqrt.f32 %v99_v14 }
  0xc7   :  { %v4791_v15 = vpop.eup %4790 }
  0xc8   :  { %v102_v16 = vmul.f32 %v4791_v15, %v57_v0  ;;  %v223_v0 = vrot.slane %v64_v31, %v5217_v43 }
  0xca   :  { %v108_v20 = vmul.f32 %v4454_v18, %v102_v16 }
  0xcb   :  { %v4793_v17 = vpop.eup %4792 }
  0xcc   :  { %v103_v19 = vmul.f32 %v4793_v17, %v58_v1 }
  0xce   :  { %v109_v21 = vmul.f32 %v4454_v18, %v103_v19 }
  0xd0   :  { %v110_v22 = vpack.c.bf16 %v109_v21, %v108_v20 }
  0xd2   :  { %4597 = vmatmul.mubr.msk.bf16.vlgmr.msra.gmra.mxu1 %vm88_vm0, %v110_v22 }
  0xd3   :  { %4608 = vmatprep.mubr.msk.bf16.mxu1 %vm5110_vm1, %v6541_v7  ;;  %4601 = vmatpush3.bf16.msra.mxu1 %v4768_v23 }
  0xd4   :  { %4602 = vmatprep.subr.bf16.mxu1 %v6541_v7 }
  0xd7   :  { %4603 = vmatpush3.bf16.msra.mxu1 %v4769_v24 }
  0xd8   :  { %4604 = vmatprep.subr.bf16.mxu1 %v6541_v7 }
  0xdb   :  { %4605 = vmatpush3.bf16.msra.mxu1 %v4770_v25 }
  0xdc   :  { %4606 = vmatprep.subr.bf16.mxu1 %v6541_v7 }
  0xdf   :  { %4607 = vmatpush3.bf16.msra.mxu1 %v4771_v26 }
  0xe0   :  { %4624 = vmatprep.subr.bf16.mxu1 %v6541_v7 }
 0x192   :  { %v5197_v35 = vpop.f32.mrf.mxu1 }
 0x193   :  { %v4468_v38 = vmul.f32 -1.442695, %v5197_v35  ;;  %v179_v44 = vrot.slane %v5197_v35, 5  ;;  %v196_v45 = vrot.slane %v5197_v35, 6  ;;  %v213_v48 = vrot.slane %v5197_v35, 7 }
 0x194   :  { %v4598_v39 = vpop.f32.mrf.mxu1  ;;  %v232_v13 = vmul.f32 %v231_v37, %v5197_v35 }
 0x195   :  { %4794 = vpow2.f32 %v4468_v38 }
 0x196   :  { %v5212_v41 = vpop.f32.mrf.mxu1 }
 0x197   :  { %v180_v46 = vrot.slane %v5212_v41, 5  ;;  %v197_v47 = vrot.slane %v5212_v41, 6  ;;  %v214_v49 = vrot.slane %v5212_v41, 7  ;;  %v4469_v50 = vmul.f32 -1.442695, %v5212_v41 }
 0x198   :  { %v4599_v51 = vpop.f32.mrf.mxu1  ;;  %v233_v16 = vmul.f32 %v231_v37, %v5212_v41 }
 0x199   :  { %v182_v52 = vsel %vm181_vm2, %v179_v44, %v180_v46  ;;  %v183_v53 = vsel %vm181_vm2, %v180_v46, %v179_v44  ;;  %v199_v54 = vsel %vm198_vm4, %v196_v45, %v197_v47  ;;  %v200_v55 = vsel %vm198_vm4, %v197_v47, %v196_v45 }
 0x19a   :  { %v184_v57 = vsel %vm177_vm3, %v183_v53, 0.0  ;;  %v185_v58 = vsel %vm178_vm6, %v182_v52, 0.0  ;;  %v201_v59 = vsel %vm194_vm7, %v200_v55, 0.0  ;;  %v202_v60 = vsel %vm195_vm8, %v199_v54, 0.0 }
 0x19b   :  { %v190_v61 = vmul.f32 %v189_v40, %v184_v57  ;;  %v191_v62 = vmul.f32 %v189_v40, %v185_v58  ;;  %v207_v63 = vmul.f32 %v206_v42, %v201_v59  ;;  %v208_v1 = vmul.f32 %v206_v42, %v202_v60  ;;  %v4466_v57 = vld [vmem:[#allocation8 + $0x18] ss:$0 sm:$0xff] }
 0x19c   :  { %v216_v2 = vsel %vm215_vm5, %v213_v48, %v214_v49  ;;  %v217_v3 = vsel %vm215_vm5, %v214_v49, %v213_v48  ;;  %4796 = vpow2.f32 %v4469_v50  ;;  %v5287_v59 = vsub.s32 4, %v5180_v28 }
 0x19d   :  { %v192_v4 = vadd.f32 %v4458_v56, %v190_v61  ;;  %v193_v5 = vadd.f32 %v4458_v56, %v191_v62  ;;  %v218_v6 = vsel %vm6566_vm9, %v217_v3, 0.0  ;;  %v219_v8 = vsel %vm6564_vm10, %v216_v2, 0.0 }
 0x19e   :  { %v224_v11 = vmul.f32 %v223_v0, %v218_v6  ;;  %v225_v12 = vmul.f32 %v223_v0, %v219_v8  ;;  %6575 = vst [vmem:[#allocation20_spill] sm:$0xff] %v5287_v59  ;;  %v5300_v3 = vsub.s32 6, %v5180_v28  ;;  %v5304_v6 = vsub.s32 7, %v5180_v28 }
 0x19f   :  { %v209_v9 = vadd.f32 %v207_v63, %v192_v4  ;;  %v210_v10 = vadd.f32 %v208_v1, %v193_v5  ;;  %v5294_v63 = vsub.s32 5, %v5180_v28  ;;  %vm1680_vm10 = vcmask 1045509  }
 0x1a0   :  { %6577 = vst [vmem:[#allocation22_spill] sm:$0xff] %v5300_v3  ;;  %6578 = vst [vmem:[#allocation23_spill] sm:$0xff] %v5304_v6  ;;  %vm1686_vm9 = vcmask 1047559  }
 0x1a1   :  { %v226_v14 = vadd.f32 %v224_v11, %v209_v9  ;;  %v227_v15 = vadd.f32 %v225_v12, %v210_v10  ;;  %6576 = vst [vmem:[#allocation21_spill] sm:$0xff] %v5294_v63 }
 0x1a2   :  { %v4795_v17 = vpop.eup %4794 }
 0x1a3   :  { %v235_v18 = vadd.f32 %v233_v16, %v227_v15  ;;  %v234_v19 = vadd.f32 %v232_v13, %v226_v14  ;;  %v1531_v20 = vadd.f32 1.0, %v4795_v17  ;;  %v75_v16 = vld [vmem:[#allocation8 + $0x20] sm:$0xff]  ;;  %v76_v17 = vld [vmem:[#allocation8 + $0x28] sm:$0xff] }
 0x1a5   :  { %v4460_v21 = vmul.f32 -1.442695, %v235_v18  ;;  %v4459_v22 = vmul.f32 -1.442695, %v234_v19  ;;  %4798 = vrcp.f32 %v1531_v20  ;;  %v346_v20 = vmul.f32 1.442695, %v76_v17 }
 0x1a7   :  { %4800 = vpow2.f32 %v4460_v21 }
 0x1a8   :  { %4802 = vpow2.f32 %v4459_v22 }
 0x1a9   :  { %v4797_v23 = vpop.eup %4796 }
 0x1aa   :  { %v1532_v24 = vadd.f32 1.0, %v4797_v23  ;;  %v5111_v23 = vmov 1966171168  }
 0x1ac   :  { %4804 = vrcp.f32 %v1532_v24  ;;  %v356_v24 = vunpack.c.l.s4 %v5111_v23 }
 0x1b2   :  { %v4799_v25 = vpop.eup %4798 }
 0x1b3   :  { %v5255_v31 = vmul.f32 %v4799_v25, %v5197_v35 }
 0x1b4   :  { %v4801_v26 = vpop.eup %4800 }
 0x1b5   :  { %v4803_v38 = vpop.eup %4802  ;;  %v243_v39 = vadd.f32 1.0, %v4801_v26  ;;  %1555 = vrot.lane.b32.xlu1 %v5255_v31, %s5103_s15  ;;  %v1543_v37 = vrot.slane %v5255_v31, 3  ;;  %v1541_v42 = vrot.slane %v5255_v31, 1  ;;  %v1542_v46 = vrot.slane %v5255_v31, 2 }
 0x1b6   :  { %v242_v40 = vadd.f32 1.0, %v4803_v38  ;;  %v357_v38 = vunpack.c.0.s8 %v356_v24 }
 0x1b7   :  { %4806 = vrcp.f32 %v243_v39  ;;  %1561 = vrot.lane.b32.xlu0 %v1543_v37, %s5103_s15 }
 0x1b8   :  { %4808 = vrcp.f32 %v242_v40 }
 0x1b9   :  { %v4805_v44 = vpop.eup %4804  ;;  %1557 = vrot.lane.b32.xlu1 %v1541_v42, %s5103_s15  ;;  %v5329_v42 = vsub.s32 %v357_v38, %v5180_v28 }
 0x1ba   :  { %v5263_v45 = vmul.f32 %v4805_v44, %v5212_v41 }
 0x1bc   :  { %v1548_v35 = vrot.slane %v5263_v45, 1  ;;  %v1549_v47 = vrot.slane %v5263_v45, 2 }
 0x1bd   :  { %1559 = vrot.lane.b32.xlu1 %v1542_v46, %s5103_s15 }
 0x1be   :  { %1573 = vrot.lane.b32.xlu0 %v1548_v35, %s5103_s15 }
 0x1c2   :  { %1575 = vrot.lane.b32.xlu0 %v1549_v47, %s5103_s15 }
 0x1c4   :  { %v4807_v48 = vpop.eup %4806 }
 0x1c5   :  { %v4809_v49 = vpop.eup %4808  ;;  %v5272_v50 = vmul.f32 %v4807_v48, %v235_v18  ;;  %v344_v18 = vmul.f32 1.442695, %v75_v16 }
 0x1c6   :  { %v5274_v41 = vmul.f32 %v4809_v49, %v234_v19 }
 0x1c8   :  { %v250_v51 = vpack.c.bf16 %v5272_v50, %v5274_v41 }
 0x1ca   :  { %4609 = vmatmul.mubr.msk.bf16.vlgmr.msra.gmra.mxu1 %vm275_vm11, %v250_v51 }
 0x1cb   :  { %4628 = vmatprep.mubr.msk.bf16.mxu1 %vm5110_vm1, %v6541_v7 }
 0x28a   :  { %v313_v52 = vpop.f32.mrf.mxu1 }
 0x28b   :  { %v655_v53 = vrot.slane %v313_v52, %v5217_v43  ;;  %v631_v54 = vrot.slane %v313_v52, %v5192_v33  ;;  %v667_v58 = vrot.slane %v313_v52, %v5186_v30  ;;  %v679_v62 = vrot.slane %v313_v52, %v5287_v59 }
 0x28c   :  { %v4610_v55 = vpop.f32.mrf.mxu1  ;;  %v643_v1 = vrot.slane %v313_v52, %v5200_v36  ;;  %v691_v2 = vrot.slane %v313_v52, %v5294_v63  ;;  %v703_v5 = vrot.slane %v313_v52, %v5300_v3  ;;  %v5307_v9 = vrot.slane %v313_v52, %v5304_v6 }
 0x28d   :  { %662 = vbcast.lane.b32.xlu0 %v655_v53, 344  ;;  %634 = vbcast.lane.b32.xlu1 %v631_v54, 336  ;;  %v5309_v10 = vadd.f32 %v4466_v57, %v313_v52 }
 0x28e   :  { %v5283_v56 = vpop.f32.mrf.mxu1 }
 0x28f   :  { %v5290_v60 = vadd.f32 %v4466_v57, %v5283_v56  ;;  %v328_v11 = vand.u32 2147483647, %v5309_v10  ;;  %v5317_v25 = vrot.slane %v5283_v56, %v5192_v33  ;;  %v5323_v37 = vrot.slane %v5283_v56, %v5217_v43 }
 0x290   :  { %v4611_v61 = vpop.f32.mrf.mxu1  ;;  %v5333_v44 = vrot.slane %v5283_v56, %v5186_v30  ;;  %v5341_v51 = vrot.slane %v5283_v56, %v5287_v59 }
 0x291   :  { %674 = vbcast.lane.b32.xlu0 %v667_v58, 344  ;;  %638 = vbcast.lane.b32.xlu1 %v631_v54, 344  ;;  %v329_v0 = vand.u32 2147483647, %v5290_v60  ;;  %v330_v12 = vsub.f32 0.0, %v328_v11  ;;  %v327_v39 = vmax.f32 %v5290_v60, 0.0 }
 0x292   :  { %v326_v11 = vmax.f32 %v5309_v10, 0.0 }
 0x293   :  { %v331_v4 = vsub.f32 0.0, %v329_v0  ;;  %v332_v13 = vmul.f32 1.442695, %v330_v12 }
 0x295   :  { %686 = vbcast.lane.b32.xlu0 %v679_v62, 344  ;;  %646 = vbcast.lane.b32.xlu1 %v643_v1, 336  ;;  %v334_v8 = vmul.f32 1.442695, %v331_v4 }
 0x297   :  { %4810 = vpow2.f32 %v334_v8 }
 0x298   :  { %4812 = vpow2.f32 %v332_v13 }
 0x299   :  { %698 = vbcast.lane.b32.xlu0 %v691_v2, 344  ;;  %650 = vbcast.lane.b32.xlu1 %v643_v1, 344 }
 0x29d   :  { %710 = vbcast.lane.b32.xlu0 %v703_v5, 344  ;;  %658 = vbcast.lane.b32.xlu1 %v655_v53, 336 }
 0x2a1   :  { %722 = vbcast.lane.b32.xlu0 %v5307_v9, 344  ;;  %670 = vbcast.lane.b32.xlu1 %v667_v58, 336 }
 0x2a4   :  { %v4811_v14 = vpop.eup %4810 }
 0x2a5   :  { %1181 = vbcast.lane.b32.xlu0 %v643_v1, 328  ;;  %682 = vbcast.lane.b32.xlu1 %v679_v62, 336  ;;  %v337_v15 = vadd.f32 1.0, %v4811_v14  ;;  %v4813_v19 = vpop.eup %4812  ;;  %v5381_v14 = vrot.slane %v5283_v56, %v5200_v36 }
 0x2a6   :  { %v336_v21 = vadd.f32 1.0, %v4813_v19 }
 0x2a7   :  { %4814 = vlog2.f32 %v337_v15  ;;  %v5385_v15 = vrot.slane %v5283_v56, %v5300_v3 }
 0x2a8   :  { %4816 = vpow2.f32 %v344_v18 }
 0x2a9   :  { %1189 = vbcast.lane.b32.xlu0 %v655_v53, 328  ;;  %694 = vbcast.lane.b32.xlu1 %v691_v2, 336  ;;  %4818 = vpow2.f32 %v346_v20 }
 0x2aa   :  { %4820 = vlog2.f32 %v336_v21  ;;  %v5399_v21 = vrot.slane %v5283_v56, %v5304_v6 }
 0x2ad   :  { %1173 = vbcast.lane.b32.xlu0 %v631_v54, 328  ;;  %706 = vbcast.lane.b32.xlu1 %v703_v5, 336 }
 0x2b1   :  { %1197 = vbcast.lane.b32.xlu0 %v667_v58, 328  ;;  %718 = vbcast.lane.b32.xlu1 %v5307_v9, 336 }
 0x2b4   :  { %v4815_v22 = vpop.eup %4814 }
 0x2b5   :  { %1205 = vbcast.lane.b32.xlu0 %v679_v62, 328  ;;  %1177 = vbcast.lane.b32.xlu1 %v643_v1, 320  ;;  %v341_v26 = vmul.f32 0.6931472, %v4815_v22  ;;  %v4817_v46 = vpop.eup %4816  ;;  %v5359_v1 = vrot.slane %v5283_v56, %v5294_v63 }
 0x2b6   :  { %v4819_v47 = vpop.eup %4818  ;;  %v5348_v57 = vsub.f32 0.0, %v4817_v46 }
 0x2b7   :  { %v5325_v40 = vadd.f32 %v341_v26, %v327_v39  ;;  %v4821_v55 = vpop.eup %4820 }
 0x2b8   :  { %v339_v4 = vmul.f32 0.6931472, %v4821_v55 }
 0x2b9   :  { %1213 = vbcast.lane.b32.xlu0 %v691_v2, 328  ;;  %1185 = vbcast.lane.b32.xlu1 %v655_v53, 320  ;;  %v410_v35 = vrot.slane %v5325_v40, %v5329_v42  ;;  %v403_v60 = vcombine.high %v5325_v40, %v5325_v40 }
 0x2ba   :  { %v342_v16 = vadd.f32 %v339_v4, %v326_v11 }
 0x2bb   :  { %v418_v48 = vcombine.high %v410_v35, %v410_v35  ;;  %v426_v49 = vrot.slane %v410_v35, %v5329_v42  ;;  %v417_v13 = vrot.slane %v403_v60, %v5329_v42 }
 0x2bc   :  { %v361_v24 = vrot.slane %v342_v16, %v5329_v42 }
 0x2bd   :  { %1221 = vbcast.lane.b32.xlu0 %v703_v5, 328  ;;  %1169 = vbcast.lane.b32.xlu1 %v631_v54, 320  ;;  %v440_v52 = vrot.slane %v418_v48, %v5329_v42  ;;  %v448_v53 = vcombine.high %v426_v49, %v426_v49  ;;  %v5345_v54 = vrot.slane %v426_v49, %v5192_v33 }
 0x2be   :  { %v433_v17 = vrot.slane %v417_v13, %v5329_v42  ;;  %v419_v19 = vcombine.high %v417_v13, %v417_v13 }
 0x2bf   :  { %v450_v61 = vcombine.high %v440_v52, %v440_v52  ;;  %v495_v0 = vrot.slane %v448_v53, %v5192_v33 }
 0x2c0   :  { %v503_v20 = vrot.slane %v433_v17, %v5192_v33  ;;  %v447_v22 = vrot.slane %v419_v19, %v5329_v42  ;;  %v449_v23 = vcombine.high %v433_v17, %v433_v17  ;;  %v5448_v17 = vpop.permute.xlu1 %1555  ;;  %v5450_v19 = vpop.permute.xlu0 %1561 }
 0x2c1   :  { %1229 = vbcast.lane.b32.xlu0 %v5307_v9, 328  ;;  %1193 = vbcast.lane.b32.xlu1 %v667_v58, 320  ;;  %v5350_v58 = vsub.f32 0.0, %v4819_v47  ;;  %v5367_v8 = vmul.f32 %v495_v0, %v5348_v57 }
 0x2c2   :  { %v451_v39 = vcombine.high %v447_v22, %v447_v22  ;;  %v507_v35 = vrot.slane %v447_v22, %v5192_v33  ;;  %v511_v46 = vrot.slane %v449_v23, %v5192_v33  ;;  %v5421_v49 = vmul.f32 %v503_v20, %v5348_v57 }
 0x2c3   :  { %v5404_v26 = vmul.f32 %v503_v20, %v5350_v58  ;;  %v354_v23 = vcombine.high %v342_v16, %v342_v16 }
 0x2c4   :  { %v515_v56 = vrot.slane %v451_v39, %v5192_v33  ;;  %v5415_v47 = vmul.f32 %v507_v35, %v5350_v58  ;;  %v5418_v48 = vmul.f32 %v511_v46, %v5350_v58  ;;  %v5425_v53 = vmul.f32 %v507_v35, %v5348_v57 }
 0x2c5   :  { %730 = vbcast.lane.b32.xlu0 %v5317_v25, 336  ;;  %1201 = vbcast.lane.b32.xlu1 %v679_v62, 320  ;;  %v491_v62 = vrot.slane %v440_v52, %v5192_v33  ;;  %v377_v52 = vrot.slane %v361_v24, %v5329_v42  ;;  %v5428_v55 = vmul.f32 %v511_v46, %v5348_v57  ;;  %v5459_v46 = vpop.permute.xlu1 %1557 }
 0x2c6   :  { %v5432_v60 = vmul.f32 %v515_v56, %v5350_v58 }
 0x2c7   :  { %v5376_v12 = vmul.f32 %v491_v62, %v5348_v57  ;;  %v5389_v10 = vmul.f32 %v491_v62, %v5350_v58  ;;  %v455_v62 = vrot.slane %v377_v52, %v5192_v33  ;;  %v399_v39 = vcombine.high %v377_v52, %v377_v52 }
 0x2c9   :  { %758 = vbcast.lane.b32.xlu0 %v5323_v37, 344  ;;  %1209 = vbcast.lane.b32.xlu1 %v691_v2, 320  ;;  %v5363_v2 = vmul.f32 %v5345_v54, %v5350_v58  ;;  %v532_v4 = vmul.f32 %v455_v62, %v5348_v57  ;;  %v533_v13 = vmul.f32 %v455_v62, %v5350_v58 }
 0x2ca   :  { %v368_v62 = vrot.slane %v354_v23, %v5329_v42 }
 0x2cb   :  { %v564_v11 = vmul.f32 1.442695, %v532_v4  ;;  %v566_v22 = vmul.f32 1.442695, %v533_v13 }
 0x2cc   :  { %v370_v13 = vcombine.high %v368_v62, %v368_v62  ;;  %v384_v7 = vrot.slane %v368_v62, %v5329_v42 }
 0x2cd   :  { %770 = vbcast.lane.b32.xlu0 %v5333_v44, 344  ;;  %1217 = vbcast.lane.b32.xlu1 %v703_v5, 320  ;;  %v499_v5 = vrot.slane %v450_v61, %v5192_v33  ;;  %v5436_v61 = vmul.f32 %v515_v56, %v5348_v57  ;;  %4822 = vpow2.f32 %v564_v11  ;;  %v5461_v56 = vpop.permute.xlu0 %1573 }
 0x2ce   :  { %4824 = vpow2.f32 %v566_v22  ;;  %v398_v6 = vrot.slane %v370_v13, %v5329_v42  ;;  %v471_v63 = vrot.slane %v384_v7, %v5192_v33  ;;  %v400_v34 = vcombine.high %v384_v7, %v384_v7 }
 0x2cf   :  { %v5392_v18 = vmul.f32 %v499_v5, %v5350_v58  ;;  %v5407_v38 = vmul.f32 %v499_v5, %v5348_v57 }
 0x2d1   :  { %782 = vbcast.lane.b32.xlu0 %v5341_v51, 344  ;;  %1225 = vbcast.lane.b32.xlu1 %v5307_v9, 320  ;;  %v5370_v9 = vmul.f32 %v495_v0, %v5350_v58  ;;  %v369_v0 = vcombine.high %v361_v24, %v361_v24  ;;  %v5456_v24 = vmul.f32 %v342_v16, %v5274_v41 }
 0x2d2   :  { %v463_v16 = vrot.slane %v399_v39, %v5192_v33  ;;  %v5480_v39 = vpop.permute.xlu0 %1575 }
 0x2d3   :  { %v391_v5 = vrot.slane %v369_v0, %v5329_v42  ;;  %v829_v0 = vrot.slane %v5456_v24, %v5329_v42 }
 0x2d4   :  { %v537_v27 = vmul.f32 %v463_v16, %v5350_v58 }
 0x2d5   :  { %794 = vbcast.lane.b32.xlu0 %v5359_v1, 344  ;;  %734 = vbcast.lane.b32.xlu1 %v5317_v25, 344  ;;  %v459_v20 = vrot.slane %v391_v5, %v5192_v33  ;;  %v401_v4 = vcombine.high %v391_v5, %v391_v5  ;;  %v5473_v22 = vrot.slane %v829_v0, %v5329_v42  ;;  %v5478_v5 = vpop.permute.xlu1 %1559 }
 0x2d6   :  { %v574_v3 = vmul.f32 1.442695, %v537_v27  ;;  %v475_v27 = vrot.slane %v398_v6, %v5192_v33 }
 0x2d7   :  { %v534_v35 = vmul.f32 %v459_v20, %v5348_v57  ;;  %v535_v11 = vmul.f32 %v459_v20, %v5350_v58  ;;  %v467_v23 = vrot.slane %v401_v4, %v5192_v33  ;;  %v923_v4 = vrot.slane %v5473_v22, %v5192_v33 }
 0x2d9   :  { %806 = vbcast.lane.b32.xlu0 %v5385_v15, 344  ;;  %742 = vbcast.lane.b32.xlu1 %v5381_v14, 336  ;;  %v568_v52 = vmul.f32 1.442695, %v534_v35  ;;  %v570_v20 = vmul.f32 1.442695, %v535_v11  ;;  %v536_v35 = vmul.f32 %v463_v16, %v5348_v57  ;;  %v539_v62 = vmul.f32 %v467_v23, %v5350_v58 }
 0x2da   :  { %v4823_v29 = vpop.eup %4822  ;;  %v1550_v16 = vrot.slane %v5263_v45, 3 }
 0x2db   :  { %4826 = vpow2.f32 %v568_v52  ;;  %v572_v59 = vmul.f32 1.442695, %v536_v35  ;;  %v1032_v43 = vmul.f32 0.0, %v4823_v29  ;;  %v4825_v32 = vpop.eup %4824  ;;  %v578_v30 = vmul.f32 1.442695, %v539_v62 }
 0x2dc   :  { %4828 = vpow2.f32 %v570_v20  ;;  %v541_v20 = vmul.f32 %v471_v63, %v5350_v58  ;;  %v1551_v29 = vrot.slane %v5263_v45, 4  ;;  %v402_v62 = vcombine.high %v398_v6, %v398_v6 }
 0x2dd   :  { %818 = vbcast.lane.b32.xlu0 %v5399_v21, 344  ;;  %746 = vbcast.lane.b32.xlu1 %v5381_v14, 344  ;;  %4830 = vpow2.f32 %v574_v3  ;;  %v1553_v6 = vrot.slane %v5263_v45, 6 }
 0x2de   :  { %4832 = vpow2.f32 %v572_v59  ;;  %v543_v59 = vmul.f32 %v475_v27, %v5350_v58 }
 0x2df   :  { %4834 = vpow2.f32 %v578_v30 }
 0x2e1   :  { %1245 = vbcast.lane.b32.xlu0 %v5381_v14, 328  ;;  %754 = vbcast.lane.b32.xlu1 %v5323_v37, 336 }
 0x2e5   :  { %1253 = vbcast.lane.b32.xlu0 %v5323_v37, 328  ;;  %766 = vbcast.lane.b32.xlu1 %v5333_v44, 336 }
 0x2e9   :  { %1237 = vbcast.lane.b32.xlu0 %v5317_v25, 328  ;;  %778 = vbcast.lane.b32.xlu1 %v5341_v51, 336 }
 0x2ed   :  { %1261 = vbcast.lane.b32.xlu0 %v5333_v44, 328  ;;  %790 = vbcast.lane.b32.xlu1 %v5359_v1, 336 }
 0x2f1   :  { %1269 = vbcast.lane.b32.xlu0 %v5341_v51, 328  ;;  %802 = vbcast.lane.b32.xlu1 %v5385_v15, 336 }
 0x2f5   :  { %1277 = vbcast.lane.b32.xlu0 %v5359_v1, 328  ;;  %814 = vbcast.lane.b32.xlu1 %v5399_v21, 336 }
 0x2f9   :  { %1285 = vbcast.lane.b32.xlu0 %v5385_v15, 328  ;;  %1241 = vbcast.lane.b32.xlu1 %v5381_v14, 320  ;;  %v837_v14 = vcombine.high %v829_v0, %v829_v0  ;;  %v538_v0 = vmul.f32 %v467_v23, %v5348_v57 }
 0x2fb   :  { %v576_v23 = vmul.f32 1.442695, %v538_v0 }
 0x2fd   :  { %1293 = vbcast.lane.b32.xlu0 %v5399_v21, 328  ;;  %1249 = vbcast.lane.b32.xlu1 %v5323_v37, 320  ;;  %v5496_v37 = vrot.slane %v837_v14, %v5329_v42  ;;  %v540_v14 = vmul.f32 %v471_v63, %v5348_v57  ;;  %v582_v63 = vmul.f32 1.442695, %v541_v20  ;;  %4836 = vpow2.f32 %v576_v23 }
 0x2fe   :  { %v586_v20 = vmul.f32 1.442695, %v543_v59  ;;  %v1554_v59 = vrot.slane %v5263_v45, 7 }
 0x2ff   :  { %v5490_v52 = vpop.permute.xlu0 %662  ;;  %v635_v11 = vpop.permute.xlu1 %634  ;;  %v927_v3 = vrot.slane %v5496_v37, %v5192_v33  ;;  %4838 = vpow2.f32 %v582_v63 }
 0x300   :  { %v1000_v13 = vmul.f32 %v923_v4, %v635_v11  ;;  %v1552_v11 = vrot.slane %v5263_v45, 5 }
 0x301   :  { %1577 = vrot.lane.b32.xlu0 %v1550_v16, %s5103_s15  ;;  %1233 = vbcast.lane.b32.xlu1 %v5317_v25, 320  ;;  %v1033_v16 = vmul.f32 0.0, %v4825_v32  ;;  %v479_v25 = vrot.slane %v400_v34, %v5192_v33  ;;  %v542_v32 = vmul.f32 %v475_v27, %v5348_v57  ;;  %v867_v34 = vcombine.high %v5473_v22, %v5473_v22 }
 0x302   :  { %v1036_v28 = vadd.f32 %v1032_v43, %v1000_v13 }
 0x303   :  { %v5501_v35 = vpop.permute.xlu0 %674  ;;  %v639_v7 = vpop.permute.xlu1 %638  ;;  %v545_v27 = vmul.f32 %v479_v25, %v5350_v58  ;;  %v584_v22 = vmul.f32 1.442695, %v542_v32 }
 0x304   :  { %1040 = vst.msk [vmem:[#allocation2] sm:$0xff] %vm275_vm11, %v1036_v28  ;;  %v1001_v43 = vmul.f32 %v923_v4, %v639_v7  ;;  %v580_v4 = vmul.f32 1.442695, %v540_v14  ;;  %v822_v7 = vcombine.high %v5456_v24, %v5456_v24  ;;  %v483_v24 = vrot.slane %v402_v62, %v5192_v33 }
 0x305   :  { %1579 = vrot.lane.b32.xlu0 %v1551_v29, %s5103_s15  ;;  %1257 = vbcast.lane.b32.xlu1 %v5333_v44, 320  ;;  %v4827_v29 = vpop.eup %4826  ;;  %v869_v62 = vcombine.high %v5496_v37, %v5496_v37 }
 0x306   :  { %v1037_v0 = vadd.f32 %v1033_v16, %v1001_v43  ;;  %v1044_v44 = vmul.f32 %v4827_v29, %v1036_v28  ;;  %4840 = vpow2.f32 %v580_v4  ;;  %v4829_v28 = vpop.eup %4828  ;;  %v931_v16 = vrot.slane %v867_v34, %v5192_v33 }
 0x307   :  { %v5513_v13 = vpop.permute.xlu0 %686  ;;  %v647_v36 = vpop.permute.xlu1 %646  ;;  %4842 = vpow2.f32 %v586_v20  ;;  %v547_v4 = vmul.f32 %v483_v24, %v5350_v58 }
 0x308   :  { %1041 = vst.msk [vmem:[#allocation2 + $0x8] sm:$0xff] %vm275_vm11, %v1037_v0  ;;  %v1002_v30 = vmul.f32 %v927_v3, %v647_v36  ;;  %v544_v36 = vmul.f32 %v479_v25, %v5348_v57  ;;  %v1045_v63 = vmul.f32 %v4829_v28, %v1037_v0  ;;  %v590_v25 = vmul.f32 1.442695, %v545_v27  ;;  %v4831_v32 = vpop.eup %4830 }
 0x309   :  { %1581 = vrot.lane.b32.xlu0 %v1552_v11, %s5103_s15  ;;  %1265 = vbcast.lane.b32.xlu1 %v5341_v51, 320  ;;  %v836_v11 = vrot.slane %v822_v7, %v5329_v42  ;;  %4844 = vpow2.f32 %v584_v22  ;;  %v546_v0 = vmul.f32 %v483_v24, %v5348_v57  ;;  %v4833_v34 = vpop.eup %4832  ;;  %v1005_v37 = vmul.f32 %v931_v16, %v5490_v52 }
 0x30a   :  { %v1048_v23 = vadd.f32 %v1044_v44, %v1002_v30  ;;  %v935_v27 = vrot.slane %v869_v62, %v5192_v33  ;;  %4846 = vpow2.f32 %v590_v25  ;;  %v594_v24 = vmul.f32 1.442695, %v547_v4  ;;  %v4835_v22 = vpop.eup %4834 }
 0x30b   :  { %v5526_v14 = vpop.permute.xlu0 %698  ;;  %v651_v43 = vpop.permute.xlu1 %650  ;;  %v5542_v30 = vrot.slane %v836_v11, %v5329_v42  ;;  %v838_v20 = vcombine.high %v836_v11, %v836_v11  ;;  %v592_v52 = vmul.f32 1.442695, %v546_v0 }
 0x30c   :  { %1053 = vst.msk [vmem:[#allocation2 + $0x10] sm:$0xff] %vm275_vm11, %v1048_v23  ;;  %v1003_v51 = vmul.f32 %v927_v3, %v651_v43  ;;  %v588_v3 = vmul.f32 1.442695, %v544_v36  ;;  %v1057_v58 = vmul.f32 %v4833_v34, %v1048_v23  ;;  %v1007_v23 = vmul.f32 %v935_v27, %v5501_v35 }
 0x30d   :  { %1583 = vrot.lane.b32.xlu0 %v1553_v6, %s5103_s15  ;;  %1273 = vbcast.lane.b32.xlu1 %v5359_v1, 320  ;;  %v866_v25 = vrot.slane %v838_v20, %v5329_v42 }
 0x30e   :  { %v1049_v29 = vadd.f32 %v1045_v63, %v1003_v51  ;;  %4848 = vpow2.f32 %v588_v3  ;;  %v4837_v51 = vpop.eup %4836 }
 0x30f   :  { %v5538_v7 = vpop.permute.xlu0 %710  ;;  %v659_v44 = vpop.permute.xlu1 %658  ;;  %4850 = vpow2.f32 %v594_v24 }
 0x310   :  { %1054 = vst.msk [vmem:[#allocation2 + $0x18] sm:$0xff] %vm275_vm11, %v1049_v29  ;;  %v1058_v1 = vmul.f32 %v4831_v32, %v1049_v29  ;;  %v1004_v6 = vmul.f32 %v931_v16, %v659_v44  ;;  %v4839_v62 = vpop.eup %4838  ;;  %4852 = vpow2.f32 %v592_v52 }
 0x311   :  { %1585 = vrot.lane.b32.xlu0 %v1554_v59, %s5103_s15  ;;  %1281 = vbcast.lane.b32.xlu1 %v5385_v15, 320  ;;  %v939_v15 = vrot.slane %v5542_v30, %v5192_v33 }
 0x312   :  { %v1062_v36 = vadd.f32 %v1058_v1, %v1005_v37  ;;  %v1061_v28 = vadd.f32 %v1057_v58, %v1004_v6  ;;  %v943_v1 = vrot.slane %v866_v25, %v5192_v33  ;;  %v868_v6 = vcombine.high %v5542_v30, %v5542_v30 }
 0x313   :  { %v5549_v43 = vpop.permute.xlu0 %722  ;;  %v671_v63 = vpop.permute.xlu1 %670  ;;  %v1009_v0 = vmul.f32 %v939_v15, %v5513_v13 }
 0x314   :  { %1067 = vst.msk [vmem:[#allocation2 + $0x28] sm:$0xff] %vm275_vm11, %v1062_v36  ;;  %v1071_v16 = vmul.f32 %v4835_v22, %v1062_v36  ;;  %1066 = vst.msk [vmem:[#allocation2 + $0x20] sm:$0xff] %vm275_vm11, %v1061_v28  ;;  %v1006_v11 = vmul.f32 %v935_v27, %v671_v63  ;;  %v1070_v59 = vmul.f32 %v4837_v51, %v1061_v28  ;;  %v4841_v35 = vpop.eup %4840  ;;  %v1544_v22 = vrot.slane %v5255_v31, 4 }
 0x315   :  { %1289 = vbcast.lane.b32.xlu1 %v5399_v21, 320  ;;  %v4843_v21 = vpop.eup %4842  ;;  %v1011_v36 = vmul.f32 %v943_v1, %v5526_v14  ;;  %v947_v51 = vrot.slane %v868_v6, %v5192_v33  ;;  %v1545_v14 = vrot.slane %v5255_v31, 5  ;;  %v6579_v6 = vmov 0.0  }
 0x316   :  { %v1075_v4 = vadd.f32 %v1071_v16, %v1007_v23  ;;  %v1074_v32 = vadd.f32 %v1070_v59, %v1006_v11  ;;  %v4845_v13 = vpop.eup %4844  ;;  %v870_v23 = vcombine.high %v866_v25, %v866_v25  ;;  %v4772_v25 = vld [vmem:[#allocation6 + $0x48] sm:$0xff]  }
 0x317   :  { %v5558_v29 = vpop.permute.xlu0 %1181  ;;  %v683_v3 = vpop.permute.xlu1 %682  ;;  %4613 = vmatpush3.bf16.msra.mxu0 %v4772_v25 }
 0x318   :  { %1080 = vst.msk [vmem:[#allocation2 + $0x38] sm:$0xff] %vm275_vm11, %v1075_v4  ;;  %v1084_v34 = vmul.f32 %v4839_v62, %v1075_v4  ;;  %1079 = vst.msk [vmem:[#allocation2 + $0x30] sm:$0xff] %vm275_vm11, %v1074_v32  ;;  %v1008_v44 = vmul.f32 %v939_v15, %v683_v3  ;;  %v1083_v37 = vmul.f32 %v4841_v35, %v1074_v32  ;;  %v4847_v30 = vpop.eup %4846  ;;  %4614 = vmatprep.subr.bf16.mxu0 %v6579_v6 }
 0x319   :  { %1571 = vrot.lane.b32.xlu1 %v5263_v45, %s5103_s15  ;;  %v548_v62 = vmul.f32 %v5345_v54, %v5348_v57  ;;  %v1013_v4 = vmul.f32 %v947_v51, %v5538_v7  ;;  %v1546_v7 = vrot.slane %v5255_v31, 6 }
 0x31a   :  { %v1088_v58 = vadd.f32 %v1084_v34, %v1009_v0  ;;  %v1087_v27 = vadd.f32 %v1083_v37, %v1008_v44  ;;  %v951_v44 = vrot.slane %v870_v23, %v5192_v33  ;;  %v600_v23 = vmul.f32 1.442695, %v5376_v12 }
 0x31b   :  { %v5568_v20 = vpop.permute.xlu0 %1189  ;;  %v695_v24 = vpop.permute.xlu1 %694 }
 0x31c   :  { %1093 = vst.msk [vmem:[#allocation2 + $0x48] sm:$0xff] %vm275_vm11, %v1088_v58  ;;  %v1097_v28 = vmul.f32 %v4843_v21, %v1088_v58  ;;  %1092 = vst.msk [vmem:[#allocation2 + $0x40] sm:$0xff] %vm275_vm11, %v1087_v27  ;;  %v1010_v45 = vmul.f32 %v943_v1, %v695_v24  ;;  %v1096_v52 = vmul.f32 %v4845_v13, %v1087_v27  ;;  %v4849_v59 = vpop.eup %4848  ;;  %v596_v1 = vmul.f32 1.442695, %v548_v62 }
 0x31d   :  { %1563 = vrot.lane.b32.xlu1 %v1544_v22, %s5103_s15  ;;  %v4851_v0 = vpop.eup %4850  ;;  %v1015_v58 = vmul.f32 %v951_v44, %v5549_v43  ;;  %v4773_v22 = vld [vmem:[#allocation6 + $0x40] sm:$0xff]  }
 0x31e   :  { %v1101_v63 = vadd.f32 %v1097_v28, %v1011_v36  ;;  %v1100_v16 = vadd.f32 %v1096_v52, %v1010_v45  ;;  %v4853_v54 = vpop.eup %4852  ;;  %4615 = vmatpush3.bf16.msra.mxu0 %v4773_v22  ;;  %v4774_v52 = vld [vmem:[#allocation6 + $0x38] sm:$0xff]   ;;  %4854 = vpow2.f32 %v596_v1  ;;  %v1137_v22 = vld [vmem:[#allocation2 + $0x10] sm:$0xff] }
 0x31f   :  { %v5576_v11 = vpop.permute.xlu0 %1173  ;;  %v707_v15 = vpop.permute.xlu1 %706  ;;  %4616 = vmatprep.subr.bf16.mxu0 %v6579_v6  ;;  %4856 = vpow2.f32 %v600_v23 }
 0x320   :  { %1106 = vst.msk [vmem:[#allocation2 + $0x58] sm:$0xff] %vm275_vm11, %v1101_v63  ;;  %v1110_v32 = vmul.f32 %v4847_v30, %v1101_v63  ;;  %1105 = vst.msk [vmem:[#allocation2 + $0x50] sm:$0xff] %vm275_vm11, %v1100_v16  ;;  %v1012_v35 = vmul.f32 %v947_v51, %v707_v15  ;;  %v1109_v3 = vmul.f32 %v4849_v59, %v1100_v16  ;;  %v1547_v51 = vrot.slane %v5255_v31, 7  ;;  %v4775_v16 = vld [vmem:[#allocation6 + $0x30] sm:$0xff]  }
 0x321   :  { %1565 = vrot.lane.b32.xlu1 %v1545_v14, %s5103_s15  ;;  %v5605_v63 = vmul.f32 %v5325_v40, %v5272_v50 }
 0x322   :  { %v1114_v34 = vadd.f32 %v1110_v32, %v1013_v4  ;;  %v1113_v37 = vadd.f32 %v1109_v3, %v1012_v35  ;;  %4617 = vmatpush3.bf16.msra.mxu0 %v4774_v52  ;;  %v598_v4 = vmul.f32 1.442695, %v5363_v2 }
 0x323   :  { %v5586_v21 = vpop.permute.xlu0 %1197  ;;  %v719_v57 = vpop.permute.xlu1 %718  ;;  %4618 = vmatprep.subr.bf16.mxu0 %v6579_v6  ;;  %v878_v15 = vrot.slane %v5605_v63, %v5329_v42 }
 0x324   :  { %1119 = vst.msk [vmem:[#allocation2 + $0x68] sm:$0xff] %vm275_vm11, %v1114_v34  ;;  %v1123_v27 = vmul.f32 %v4851_v0, %v1114_v34  ;;  %1118 = vst.msk [vmem:[#allocation2 + $0x60] sm:$0xff] %vm275_vm11, %v1113_v37  ;;  %v1014_v13 = vmul.f32 %v951_v44, %v719_v57  ;;  %v1122_v24 = vmul.f32 %v4853_v54, %v1113_v37  ;;  %4858 = vpow2.f32 %v598_v4 }
 0x325   :  { %1567 = vrot.lane.b32.xlu1 %v1546_v7, %s5103_s15  ;;  %v5619_v12 = vrot.slane %v878_v15, %v5329_v42  ;;  %v602_v54 = vmul.f32 1.442695, %v5389_v10  ;;  %v606_v10 = vmul.f32 1.442695, %v5370_v9  ;;  %v608_v4 = vmul.f32 1.442695, %v5407_v38 }
 0x326   :  { %v1127_v36 = vadd.f32 %v1123_v27, %v1015_v58  ;;  %v1126_v28 = vadd.f32 %v1122_v24, %v1014_v13  ;;  %4619 = vmatpush3.bf16.msra.mxu0 %v4775_v16  ;;  %v604_v58 = vmul.f32 1.442695, %v5367_v8  ;;  %v886_v13 = vcombine.high %v878_v15, %v878_v15  ;;  %v1138_v24 = vld [vmem:[#allocation2 + $0x18] sm:$0xff]  ;;  %v1139_v9 = vld [vmem:[#allocation2 + $0x20] sm:$0xff] }
 0x327   :  { %v5594_v45 = vpop.permute.xlu0 %1205  ;;  %v1178_v30 = vpop.permute.xlu1 %1177  ;;  %4632 = vmatprep.subr.bf16.mxu0 %v6579_v6  ;;  %v955_v3 = vrot.slane %v5619_v12, %v5192_v33  ;;  %4860 = vpow2.f32 %v602_v54  ;;  %v1298_v16 = vmul.f32 %v5558_v29, %v1138_v24  ;;  %v614_v54 = vmul.f32 1.442695, %v5404_v26 }
 0x328   :  { %1132 = vst.msk [vmem:[#allocation2 + $0x78] sm:$0xff] %vm275_vm11, %v1127_v36  ;;  %1131 = vst.msk [vmem:[#allocation2 + $0x70] sm:$0xff] %vm275_vm11, %v1126_v28  ;;  %4862 = vpow2.f32 %v604_v58  ;;  %v1297_v28 = vmul.f32 %v1178_v30, %v1137_v22  ;;  %v908_v8 = vrot.slane %v886_v13, %v5329_v42  ;;  %v612_v24 = vmul.f32 1.442695, %v5421_v49 }
 0x329   :  { %1569 = vrot.lane.b32.xlu1 %v1547_v51, %s5103_s15  ;;  %v610_v51 = vmul.f32 1.442695, %v5392_v18  ;;  %4864 = vpow2.f32 %v606_v10  ;;  %v1337_v18 = vsel %vm275_vm11, %v1298_v16, 0.0  ;;  %v871_v10 = vcombine.high %v5605_v63, %v5605_v63 }
 0x32a   :  { %v959_v29 = vrot.slane %v908_v8, %v5192_v33 }
 0x32b   :  { %v5601_v43 = vpop.permute.xlu0 %1213  ;;  %v1186_v31 = vpop.permute.xlu1 %1185  ;;  %4866 = vpow2.f32 %v610_v51  ;;  %v618_v51 = vmul.f32 1.442695, %v5415_v47 }
 0x32c   :  { %v4855_v32 = vpop.eup %4854  ;;  %v1299_v30 = vmul.f32 %v1186_v31, %v1139_v9  ;;  %4868 = vpow2.f32 %v608_v4  ;;  %v1135_v9 = vld [vmem:[#allocation2] sm:$0xff] }
 0x32d   :  { %v1034_v34 = vmul.f32 0.0, %v4855_v32  ;;  %v4857_v57 = vpop.eup %4856  ;;  %v1140_v32 = vld [vmem:[#allocation2 + $0x28] sm:$0xff]  ;;  %4870 = vpow2.f32 %v614_v54  ;;  %v620_v54 = vmul.f32 1.442695, %v5428_v55 }
 0x32e   :  { %v1300_v38 = vmul.f32 %v5568_v20, %v1140_v32  ;;  %v916_v20 = vcombine.high %v5619_v12, %v5619_v12  ;;  %4872 = vpow2.f32 %v612_v24 }
 0x32f   :  { %v5609_v59 = vpop.permute.xlu0 %1221  ;;  %v5613_v14 = vpop.permute.xlu1 %1169  ;;  %4874 = vpow2.f32 %v618_v51  ;;  %v4467_v51 = vld [vmem:[#allocation8 + $0x30] ss:$0 sm:$0xff] }
 0x330   :  { %v1346_v49 = vsel %vm275_vm11, %v1300_v38, 0.0  ;;  %v1295_v12 = vmul.f32 %v5613_v14, %v1135_v9 }
 0x331   :  { %v4859_v23 = vpop.eup %4858 }
 0x333   :  { %v5616_v40 = vpop.permute.xlu0 %1229  ;;  %v5621_v62 = vpop.permute.xlu1 %1193 }
 0x334   :  { %v4861_v22 = vpop.eup %4860 }
 0x335   :  { %v4863_v63 = vpop.eup %4862 }
 0x337   :  { %v731_v35 = vpop.permute.xlu0 %730  ;;  %v5626_v25 = vpop.permute.xlu1 %1201 }
 0x338   :  { %v1016_v0 = vmul.f32 %v955_v3, %v731_v35  ;;  %v1336_v35 = vsel %vm275_vm11, %v1297_v28, 0.0 }
 0x33a   :  { %v1038_v44 = vadd.f32 %v1034_v34, %v1016_v0 }
 0x33b   :  { %v5628_v37 = vpop.permute.xlu0 %758  ;;  %v5631_v7 = vpop.permute.xlu1 %1209 }
 0x33c   :  { %1042 = vst.msk [vmem:[#allocation2 + $0x80] sm:$0xff] %vm275_vm11, %v1038_v44  ;;  %v1046_v2 = vmul.f32 %v4857_v57, %v1038_v44  ;;  %v1035_v44 = vmul.f32 0.0, %v4859_v23  ;;  %v1338_v57 = vadd.f32 %v1337_v18, %v1336_v35  ;;  %v616_v23 = vmul.f32 1.442695, %v5425_v53 }
 0x33d   :  { %v963_v18 = vrot.slane %v916_v20, %v5192_v33  ;;  %v624_v20 = vmul.f32 1.442695, %v5436_v61 }
 0x33e   :  { %v1339_v16 = vrot.slane %v1338_v57, 4  ;;  %4876 = vpow2.f32 %v616_v23 }
 0x33f   :  { %v5634_v1 = vpop.permute.xlu0 %770  ;;  %v5637_v27 = vpop.permute.xlu1 %1217 }
 0x343   :  { %v5639_v36 = vpop.permute.xlu0 %782  ;;  %v5642_v52 = vpop.permute.xlu1 %1225 }
 0x347   :  { %v5648_v15 = vpop.permute.xlu0 %794  ;;  %v735_v0 = vpop.permute.xlu1 %734 }
 0x348   :  { %v1017_v34 = vmul.f32 %v955_v3, %v735_v0  ;;  %v1345_v3 = vsel %vm275_vm11, %v1299_v30, 0.0  ;;  %v918_v0 = vcombine.high %v908_v8, %v908_v8  ;;  %v1340_v8 = vadd.f32 %v1339_v16, %v1338_v57  ;;  %v1141_v16 = vld [vmem:[#allocation2 + $0x30] sm:$0xff] }
 0x349   :  { %v1347_v35 = vadd.f32 %v1346_v49, %v1345_v3  ;;  %v1327_v3 = vsel %vm275_vm11, %v1295_v12, 0.0 }
 0x34a   :  { %v1039_v58 = vadd.f32 %v1035_v44, %v1017_v34  ;;  %v622_v34 = vmul.f32 1.442695, %v5418_v48  ;;  %v1136_v44 = vld [vmem:[#allocation2 + $0x8] sm:$0xff]  ;;  %v4865_v48 = vpop.eup %4864  ;;  %v967_v14 = vrot.slane %v918_v0, %v5192_v33  ;;  %v1341_v49 = vrot.slane %v1340_v8, 2 }
 0x34b   :  { %v5655_v13 = vpop.permute.xlu0 %806  ;;  %v743_v31 = vpop.permute.xlu1 %742  ;;  %v1296_v38 = vmul.f32 %v5576_v11, %v1136_v44  ;;  %v1348_v24 = vrot.slane %v1347_v35, 4  ;;  %v1301_v0 = vmul.f32 %v5621_v62, %v1141_v16  ;;  %v5693_v44 = vmul.f32 %v4467_v51, %v5272_v50 }
 0x34c   :  { %1043 = vst.msk [vmem:[#allocation2 + $0x88] sm:$0xff] %vm275_vm11, %v1039_v58  ;;  %v1018_v28 = vmul.f32 %v959_v29, %v743_v31  ;;  %v1047_v26 = vmul.f32 %v4861_v22, %v1039_v58  ;;  %4878 = vpow2.f32 %v622_v34  ;;  %v4867_v57 = vpop.eup %4866  ;;  %v1023_v34 = vmul.f32 %v967_v14, %v5634_v1 }
 0x34d   :  { %4880 = vpow2.f32 %v620_v54  ;;  %v1328_v23 = vsel %vm275_vm11, %v1296_v38, 0.0  ;;  %v1342_v54 = vadd.f32 %v1341_v49, %v1340_v8  ;;  %v5704_v50 = vmul.f32 %v4467_v51, %v5274_v41 }
 0x34e   :  { %v1050_v4 = vadd.f32 %v1046_v2, %v1018_v28  ;;  %v885_v2 = vrot.slane %v871_v10, %v5329_v42  ;;  %v1021_v10 = vmul.f32 %v963_v18, %v5628_v37  ;;  %v1329_v9 = vadd.f32 %v1328_v23, %v1327_v3 }
 0x34f   :  { %v5667_v32 = vpop.permute.xlu0 %818  ;;  %v747_v30 = vpop.permute.xlu1 %746 }
 0x350   :  { %1055 = vst.msk [vmem:[#allocation2 + $0x90] sm:$0xff] %vm275_vm11, %v1050_v4  ;;  %v1019_v47 = vmul.f32 %v959_v29, %v747_v30  ;;  %v1059_v53 = vmul.f32 %v4863_v63, %v1050_v4  ;;  %v626_v29 = vmul.f32 1.442695, %v5432_v60  ;;  %v5684_v28 = vrot.slane %v885_v2, %v5329_v42  ;;  %v4869_v60 = vpop.eup %4868 }
 0x351   :  { %v1349_v63 = vadd.f32 %v1348_v24, %v1347_v35  ;;  %v4871_v1 = vpop.eup %4870 }
 0x352   :  { %v1051_v58 = vadd.f32 %v1047_v26, %v1019_v47  ;;  %v887_v26 = vcombine.high %v885_v2, %v885_v2  ;;  %4882 = vpow2.f32 %v626_v29  ;;  %v971_v35 = vrot.slane %v5684_v28, %v5192_v33 }
 0x353   :  { %v755_v22 = vpop.permute.xlu1 %754  ;;  %v5678_v31 = vpop.permute.xlu0 %1245  ;;  %4884 = vpow2.f32 %v624_v20  ;;  %v1350_v24 = vrot.slane %v1349_v63, 2  ;;  %v1354_v29 = vsel %vm275_vm11, %v1301_v0, 0.0  ;;  %v917_v41 = vcombine.high %v5684_v28, %v5684_v28 }
 0x354   :  { %1056 = vst.msk [vmem:[#allocation2 + $0x98] sm:$0xff] %vm275_vm11, %v1051_v58  ;;  %v1060_v55 = vmul.f32 %v4865_v48, %v1051_v58  ;;  %v1020_v11 = vmul.f32 %v963_v18, %v755_v22  ;;  %v1142_v18 = vld [vmem:[#allocation2 + $0x38] sm:$0xff]  ;;  %v5698_v62 = vrot.slane %v887_v26, %v5329_v42  ;;  %v4873_v48 = vpop.eup %4872  ;;  %v1025_v3 = vmul.f32 %v971_v35, %v5639_v36 }
 0x355   :  { %v1302_v2 = vmul.f32 %v5586_v21, %v1142_v18  ;;  %v4875_v26 = vpop.eup %4874  ;;  %v1343_v20 = vrot.slane %v1342_v54, 1  ;;  %v1351_v16 = vadd.f32 %v1350_v24, %v1349_v63  ;;  %v1479_v63 = vrot.slane %v5704_v50, 1 }
 0x356   :  { %v1064_v4 = vadd.f32 %v1060_v55, %v1021_v10  ;;  %v1063_v37 = vadd.f32 %v1059_v53, %v1020_v11  ;;  %v975_v55 = vrot.slane %v5698_v62, %v5192_v33  ;;  %v1486_v11 = vrot.slane %v5693_v44, 1  ;;  %v4877_v49 = vpop.eup %4876 }
 0x357   :  { %v767_v30 = vpop.permute.xlu1 %766  ;;  %v5700_v53 = vpop.permute.xlu0 %1253  ;;  %v1355_v36 = vsel %vm275_vm11, %v1302_v2, 0.0  ;;  %v1352_v24 = vrot.slane %v1351_v16, 1 }
 0x358   :  { %1069 = vst.msk [vmem:[#allocation2 + $0xa8] sm:$0xff] %vm275_vm11, %v1064_v4  ;;  %v1073_v12 = vmul.f32 %v4867_v57, %v1064_v4  ;;  %1068 = vst.msk [vmem:[#allocation2 + $0xa0] sm:$0xff] %vm275_vm11, %v1063_v37  ;;  %v1022_v61 = vmul.f32 %v967_v14, %v767_v30  ;;  %v1072_v47 = vmul.f32 %v4869_v60, %v1063_v37  ;;  %v1330_v14 = vrot.slane %v1329_v9, 4  ;;  %v1143_v60 = vld [vmem:[#allocation2 + $0x40] sm:$0xff] }
 0x359   :  { %v1487_v57 = vrot.slane %v5693_v44, 2  ;;  %v1356_v37 = vadd.f32 %v1355_v36, %v1354_v29  ;;  %v1303_v0 = vmul.f32 %v5626_v25, %v1143_v60  ;;  %v919_v25 = vcombine.high %v5698_v62, %v5698_v62 }
 0x35a   :  { %v1077_v38 = vadd.f32 %v1073_v12, %v1023_v34  ;;  %v1076_v58 = vadd.f32 %v1072_v47, %v1022_v61  ;;  %v1331_v4 = vadd.f32 %v1330_v14, %v1329_v9  ;;  %v4879_v34 = vpop.eup %4878  ;;  %v1027_v12 = vmul.f32 %v975_v55, %v5648_v15 }
 0x35b   :  { %v779_v22 = vpop.permute.xlu1 %778  ;;  %v5718_v30 = vpop.permute.xlu0 %1237  ;;  %v979_v9 = vrot.slane %v917_v41, %v5192_v33  ;;  %v1357_v29 = vrot.slane %v1356_v37, 4  ;;  %v983_v41 = vrot.slane %v919_v25, %v5192_v33  ;;  %v1489_v36 = vrot.slane %v5693_v44, 4  ;;  %v1145_v25 = vld [vmem:[#allocation2 + $0x50] sm:$0xff] }
 0x35c   :  { %1082 = vst.msk [vmem:[#allocation2 + $0xb8] sm:$0xff] %vm275_vm11, %v1077_v38  ;;  %v1086_v10 = vmul.f32 %v4871_v1, %v1077_v38  ;;  %1081 = vst.msk [vmem:[#allocation2 + $0xb0] sm:$0xff] %vm275_vm11, %v1076_v58  ;;  %v1024_v21 = vmul.f32 %v971_v35, %v779_v22  ;;  %v1085_v8 = vmul.f32 %v4873_v48, %v1076_v58  ;;  %v1144_v35 = vld [vmem:[#allocation2 + $0x48] sm:$0xff]  ;;  %v1488_v1 = vrot.slane %v5693_v44, 3  ;;  %v4881_v2 = vpop.eup %4880 }
 0x35d   :  { %v1304_v15 = vmul.f32 %v5594_v45, %v1144_v35  ;;  %v1344_v38 = vadd.f32 %v1343_v20, %v1342_v54  ;;  %v1332_v14 = vrot.slane %v1331_v4, 2  ;;  %v1363_v22 = vsel %vm275_vm11, %v1303_v0, 0.0 }
 0x35e   :  { %v1090_v51 = vadd.f32 %v1086_v10, %v1025_v3  ;;  %v1089_v23 = vadd.f32 %v1085_v8, %v1024_v21  ;;  %v1029_v21 = vmul.f32 %v979_v9, %v5655_v13  ;;  %v1480_v45 = vrot.slane %v5704_v50, 2 }
 0x35f   :  { %v791_v28 = vpop.permute.xlu1 %790  ;;  %v4883_v10 = vpop.eup %4882  ;;  %v1481_v54 = vrot.slane %v5704_v50, 3  ;;  %v1364_v13 = vsel %vm275_vm11, %v1304_v15, 0.0  ;;  %v1510_v60 = vadd.f32 %v1479_v63, %v1344_v38  ;;  %v1333_v0 = vadd.f32 %v1332_v14, %v1331_v4 }
 0x360   :  { %1095 = vst.msk [vmem:[#allocation2 + $0xc8] sm:$0xff] %vm275_vm11, %v1090_v51  ;;  %v1099_v61 = vmul.f32 %v4875_v26, %v1090_v51  ;;  %1094 = vst.msk [vmem:[#allocation2 + $0xc0] sm:$0xff] %vm275_vm11, %v1089_v23  ;;  %v1026_v47 = vmul.f32 %v975_v55, %v791_v28  ;;  %v1098_v18 = vmul.f32 %v4877_v49, %v1089_v23  ;;  %v5736_v26 = vpop.permute.xlu0 %1261  ;;  %v4885_v20 = vpop.eup %4884  ;;  %v1490_v63 = vrot.slane %v5693_v44, 5 }
 0x361   :  { %v1353_v49 = vadd.f32 %v1352_v24, %v1351_v16  ;;  %v1358_v28 = vadd.f32 %v1357_v29, %v1356_v37  ;;  %v1492_v16 = vrot.slane %v5693_v44, 7  ;;  %v1482_v4 = vrot.slane %v5704_v50, 4  ;;  %v1146_v37 = vld [vmem:[#allocation2 + $0x58] sm:$0xff]  ;;  %v1156_v29 = vld [vmem:[#allocation2 + $0xa8] sm:$0xff] }
 0x362   :  { %v1103_v58 = vadd.f32 %v1099_v61, %v1027_v12  ;;  %v1102_v48 = vadd.f32 %v1098_v18, %v1026_v47  ;;  %v1154_v12 = vld [vmem:[#allocation2 + $0x98] sm:$0xff]  ;;  %v1031_v47 = vmul.f32 %v983_v41, %v5667_v32  ;;  %v1305_v15 = vmul.f32 %v5631_v7, %v1145_v25  ;;  %v1147_v25 = vld [vmem:[#allocation2 + $0x60] sm:$0xff] }
 0x363   :  { %v803_v3 = vpop.permute.xlu1 %802  ;;  %v1314_v38 = vmul.f32 %v5678_v31, %v1154_v12  ;;  %v1306_v24 = vmul.f32 %v5601_v43, %v1146_v37  ;;  %v1334_v14 = vrot.slane %v1333_v0, 1  ;;  %v1359_v7 = vrot.slane %v1358_v28, 2 }
 0x364   :  { %1108 = vst.msk [vmem:[#allocation2 + $0xd8] sm:$0xff] %vm275_vm11, %v1103_v58  ;;  %v1112_v62 = vmul.f32 %v4879_v34, %v1103_v58  ;;  %1107 = vst.msk [vmem:[#allocation2 + $0xd0] sm:$0xff] %vm275_vm11, %v1102_v48  ;;  %v1028_v8 = vmul.f32 %v979_v9, %v803_v3  ;;  %v1111_v55 = vmul.f32 %v4881_v2, %v1102_v48  ;;  %v1491_v2 = vrot.slane %v5693_v44, 6 }
 0x365   :  { %v1365_v34 = vadd.f32 %v1364_v13, %v1363_v22  ;;  %v1604_v48 = vmul.f32 %v5459_v46, %v1510_v60  ;;  %v5751_v22 = vpop.permute.xlu0 %1269  ;;  %v1485_v13 = vrot.slane %v5704_v50, 7  ;;  %v1372_v60 = vsel %vm275_vm11, %v1305_v15, 0.0 }
 0x366   :  { %v1116_v51 = vadd.f32 %v1112_v62, %v1029_v21  ;;  %v1115_v23 = vadd.f32 %v1111_v55, %v1028_v8  ;;  %v1483_v21 = vrot.slane %v5704_v50, 5  ;;  %v1511_v62 = vadd.f32 %v1480_v45, %v1353_v49  ;;  %v1148_v8 = vld [vmem:[#allocation2 + $0x68] sm:$0xff]  ;;  %v1150_v55 = vld [vmem:[#allocation2 + $0x78] sm:$0xff] }
 0x367   :  { %v815_v61 = vpop.permute.xlu1 %814  ;;  %v1308_v43 = vmul.f32 %v5609_v59, %v1148_v8  ;;  %v1310_v31 = vmul.f32 %v5616_v40, %v1150_v55  ;;  %v1409_v45 = vsel %vm275_vm11, %v1314_v38, 0.0  ;;  %v1620_v49 = vpack.c.bf16 %v1604_v48, %v1604_v48  ;;  %v1152_v38 = vld [vmem:[#allocation2 + $0x88] sm:$0xff] }
 0x368   :  { %1121 = vst.msk [vmem:[#allocation2 + $0xe8] sm:$0xff] %vm275_vm11, %v1116_v51  ;;  %v1125_v18 = vmul.f32 %v4883_v10, %v1116_v51  ;;  %1120 = vst.msk [vmem:[#allocation2 + $0xe0] sm:$0xff] %vm275_vm11, %v1115_v23  ;;  %v1030_v35 = vmul.f32 %v983_v41, %v815_v61  ;;  %v1124_v9 = vmul.f32 %v4885_v20, %v1115_v23  ;;  %v1153_v10 = vld [vmem:[#allocation2 + $0x90] sm:$0xff]  ;;  %v1366_v41 = vrot.slane %v1365_v34, 4 }
 0x369   :  { %v1484_v20 = vrot.slane %v5704_v50, 6  ;;  %v1316_v51 = vmul.f32 %v5700_v53, %v1156_v29  ;;  %v1373_v12 = vsel %vm275_vm11, %v1306_v24, 0.0  ;;  %v1335_v61 = vadd.f32 %v1334_v14, %v1333_v0  ;;  %v1158_v29 = vld [vmem:[#allocation2 + $0xb8] sm:$0xff] }
 0x36a   :  { %v1129_v32 = vadd.f32 %v1125_v18, %v1031_v47  ;;  %v1128_v58 = vadd.f32 %v1124_v9, %v1030_v35  ;;  %v1155_v18 = vld [vmem:[#allocation2 + $0xa0] sm:$0xff]  ;;  %v1605_v40 = vmul.f32 %v5478_v5, %v1511_v62  ;;  %v1360_v35 = vadd.f32 %v1359_v7, %v1358_v28 }
 0x36b   :  { %v1242_v3 = vpop.permute.xlu1 %1241  ;;  %v1367_v9 = vadd.f32 %v1366_v41, %v1365_v34  ;;  %v1382_v15 = vsel %vm275_vm11, %v1308_v43, 0.0  ;;  %v1307_v53 = vmul.f32 %v5637_v27, %v1147_v25  ;;  %v1391_v0 = vsel %vm275_vm11, %v1310_v31, 0.0  ;;  %v1151_v62 = vld [vmem:[#allocation2 + $0x80] sm:$0xff]  ;;  %v1149_v41 = vld [vmem:[#allocation2 + $0x70] sm:$0xff] }
 0x36c   :  { %1134 = vst.msk [vmem:[#allocation2 + $0xf8] sm:$0xff] %vm275_vm11, %v1129_v32  ;;  %1133 = vst.msk [vmem:[#allocation2 + $0xf0] sm:$0xff] %vm275_vm11, %v1128_v58  ;;  %v1313_v46 = vmul.f32 %v1242_v3, %v1153_v10  ;;  %v1374_v32 = vadd.f32 %v1373_v12, %v1372_v60  ;;  %v5768_v58 = vpop.permute.xlu0 %1277  ;;  %v1418_v24 = vsel %vm275_vm11, %v1316_v51, 0.0  ;;  %v1312_v14 = vmul.f32 %v5718_v30, %v1152_v38 }
 0x36d   :  { %v5774_v28 = vunpack.c.l.b16 %v1620_v49  ;;  %v1509_v34 = vadd.f32 %v5704_v50, %v1335_v61  ;;  %v1621_v8 = vpack.c.bf16 %v1605_v40, %v1605_v40  ;;  %v1361_v55 = vrot.slane %v1360_v35, 1 }
 0x36e   :  { %v1408_v23 = vsel %vm275_vm11, %v1313_v46, 0.0  ;;  %v1368_v7 = vrot.slane %v1367_v9, 2  ;;  %v1375_v43 = vrot.slane %v1374_v32, 4  ;;  %v1381_v31 = vsel %vm275_vm11, %v1307_v53, 0.0 }
 0x36f   :  { %v1410_v47 = vadd.f32 %v1409_v45, %v1408_v23  ;;  %v1250_v59 = vpop.permute.xlu1 %1249  ;;  %v1309_v30 = vmul.f32 %v5642_v52, %v1149_v41  ;;  %v1400_v45 = vsel %vm275_vm11, %v1312_v14, 0.0  ;;  %v1318_v51 = vmul.f32 %v5736_v26, %v1158_v29 }
 0x370   :  { %v1315_v37 = vmul.f32 %v1250_v59, %v1155_v18  ;;  %v1667_v12 = vrot.slane %v5774_v28, 7  ;;  %v1603_v61 = vmul.f32 %v5448_v17, %v1509_v34  ;;  %v1286_v59 = vpop.permute.xlu0 %1285  ;;  %v5784_v53 = vunpack.c.l.b16 %v1621_v8 }
 0x371   :  { %v1411_v48 = vrot.slane %v1410_v47, 4  ;;  %v1362_v52 = vadd.f32 %v1361_v55, %v1360_v35  ;;  %v1383_v38 = vadd.f32 %v1382_v15, %v1381_v31  ;;  %v1390_v26 = vsel %vm275_vm11, %v1309_v30, 0.0  ;;  %v1159_v15 = vld [vmem:[#allocation2 + $0xc0] sm:$0xff] }
 0x372   :  { %v1417_v5 = vsel %vm275_vm11, %v1315_v37, 0.0  ;;  %v1157_v37 = vld [vmem:[#allocation2 + $0xb0] sm:$0xff]  ;;  %v1427_v29 = vsel %vm275_vm11, %v1318_v51, 0.0 }
 0x373   :  { %v1412_v3 = vadd.f32 %v1411_v48, %v1410_v47  ;;  %v1419_v10 = vadd.f32 %v1418_v24, %v1417_v5  ;;  %v1234_v27 = vpop.permute.xlu1 %1233  ;;  %v1160_v47 = vld [vmem:[#allocation2 + $0xc8] sm:$0xff]  ;;  %v1376_v24 = vadd.f32 %v1375_v43, %v1374_v32  ;;  %v1369_v5 = vadd.f32 %v1368_v7, %v1367_v9 }
 0x374   :  { %v1311_v46 = vmul.f32 %v1234_v27, %v1151_v62  ;;  %v1320_v17 = vmul.f32 %v5751_v22, %v1160_v47  ;;  %v1619_v27 = vpack.c.bf16 %v1603_v61, %v1603_v61  ;;  %v1162_v62 = vld [vmem:[#allocation2 + $0xd8] sm:$0xff]  ;;  %v5792_v32 = vadd.f32 %v1481_v54, %v1362_v52  ;;  %v1294_v31 = vpop.permute.xlu0 %1293 }
 0x375   :  { %v1420_v60 = vrot.slane %v1419_v10, 4  ;;  %v1413_v23 = vrot.slane %v1412_v3, 2  ;;  %v1384_v55 = vrot.slane %v1383_v38, 4  ;;  %v1392_v9 = vadd.f32 %v1391_v0, %v1390_v26 }
 0x376   :  { %v1399_v49 = vsel %vm275_vm11, %v1311_v46, 0.0  ;;  %v1377_v43 = vrot.slane %v1376_v24, 2  ;;  %v1370_v30 = vrot.slane %v1369_v5, 1 }
 0x377   :  { %v1421_v18 = vadd.f32 %v1420_v60, %v1419_v10  ;;  %v1401_v40 = vadd.f32 %v1400_v45, %v1399_v49  ;;  %v1258_v25 = vpop.permute.xlu1 %1257  ;;  %v1414_v34 = vadd.f32 %v1413_v23, %v1412_v3  ;;  %v1436_v60 = vsel %vm275_vm11, %v1320_v17, 0.0  ;;  %v1164_v23 = vld [vmem:[#allocation2 + $0xe8] sm:$0xff] }
 0x378   :  { %v1317_v48 = vmul.f32 %v1258_v25, %v1157_v37  ;;  %v1322_v45 = vmul.f32 %v5768_v58, %v1162_v62  ;;  %v1161_v25 = vld [vmem:[#allocation2 + $0xd0] sm:$0xff]  ;;  %v5797_v37 = vunpack.c.l.b16 %v1619_v27  ;;  %v1385_v52 = vadd.f32 %v1384_v55, %v1383_v38  ;;  %v1163_v38 = vld [vmem:[#allocation2 + $0xe0] sm:$0xff] }
 0x379   :  { %v1402_v14 = vrot.slane %v1401_v40, 4  ;;  %v1422_v41 = vrot.slane %v1421_v18, 2  ;;  %v1415_v51 = vrot.slane %v1414_v34, 1 }
 0x37a   :  { %v1426_v10 = vsel %vm275_vm11, %v1317_v48, 0.0  ;;  %v1393_v48 = vrot.slane %v1392_v9, 4  ;;  %v1445_v58 = vsel %vm275_vm11, %v1322_v45, 0.0  ;;  %v1386_v55 = vrot.slane %v1385_v52, 2 }
 0x37b   :  { %v1403_v8 = vadd.f32 %v1402_v14, %v1401_v40  ;;  %v1428_v46 = vadd.f32 %v1427_v29, %v1426_v10  ;;  %v1266_v35 = vpop.permute.xlu1 %1265  ;;  %v1423_v61 = vadd.f32 %v1422_v41, %v1421_v18  ;;  %v1324_v14 = vmul.f32 %v1286_v59, %v1164_v23 }
 0x37c   :  { %v1319_v7 = vmul.f32 %v1266_v35, %v1159_v15  ;;  %v1371_v10 = vadd.f32 %v1370_v30, %v1369_v5  ;;  %v1416_v62 = vadd.f32 %v1415_v51, %v1414_v34  ;;  %v1578_v15 = vpop.permute.xlu0 %1577 }
 0x37d   :  { %v1404_v22 = vrot.slane %v1403_v8, 2  ;;  %v1429_v3 = vrot.slane %v1428_v46, 4  ;;  %v1424_v41 = vrot.slane %v1423_v61, 1  ;;  %v1454_v5 = vsel %vm275_vm11, %v1324_v14, 0.0 }
 0x37e   :  { %v1435_v49 = vsel %vm275_vm11, %v1319_v7, 0.0  ;;  %v1518_v51 = vadd.f32 %v1486_v11, %v1416_v62 }
 0x37f   :  { %v1430_v47 = vadd.f32 %v1429_v3, %v1428_v46  ;;  %v1437_v54 = vadd.f32 %v1436_v60, %v1435_v49  ;;  %v1274_v40 = vpop.permute.xlu1 %1273  ;;  %v1405_v0 = vadd.f32 %v1404_v22, %v1403_v8  ;;  %v1166_v46 = vld [vmem:[#allocation2 + $0xf8] sm:$0xff]  ;;  %v1394_v3 = vadd.f32 %v1393_v48, %v1392_v9  ;;  %v1165_v9 = vld [vmem:[#allocation2 + $0xf0] sm:$0xff] }
 0x380   :  { %v1321_v26 = vmul.f32 %v1274_v40, %v1161_v25  ;;  %v1378_v60 = vadd.f32 %v1377_v43, %v1376_v24  ;;  %v1326_v23 = vmul.f32 %v1294_v31, %v1166_v46 }
 0x381   :  { %v1431_v29 = vrot.slane %v1430_v47, 2  ;;  %v1438_v17 = vrot.slane %v1437_v54, 4  ;;  %v1406_v18 = vrot.slane %v1405_v0, 1  ;;  %v1395_v48 = vrot.slane %v1394_v3, 2 }
 0x382   :  { %v1444_v35 = vsel %vm275_vm11, %v1321_v26, 0.0  ;;  %v1379_v14 = vrot.slane %v1378_v60, 1  ;;  %v1463_v11 = vsel %vm275_vm11, %v1326_v23, 0.0 }
 0x383   :  { %v1432_v7 = vadd.f32 %v1431_v29, %v1430_v47  ;;  %v1439_v8 = vadd.f32 %v1438_v17, %v1437_v54  ;;  %v1446_v27 = vadd.f32 %v1445_v58, %v1444_v35  ;;  %v1282_v22 = vpop.permute.xlu1 %1281  ;;  %v1407_v47 = vadd.f32 %v1406_v18, %v1405_v0  ;;  %v1580_v17 = vpop.permute.xlu0 %1579 }
 0x384   :  { %v1323_v59 = vmul.f32 %v1282_v22, %v1163_v38  ;;  %v1425_v54 = vadd.f32 %v1424_v41, %v1423_v61  ;;  %v1387_v38 = vadd.f32 %v1386_v55, %v1385_v52  ;;  %v1612_v0 = vmul.f32 %v5461_v56, %v1518_v51 }
 0x385   :  { %v1433_v30 = vrot.slane %v1432_v7, 1  ;;  %v1440_v45 = vrot.slane %v1439_v8, 2  ;;  %v1447_v34 = vrot.slane %v1446_v27, 4  ;;  %v1517_v61 = vadd.f32 %v5693_v44, %v1407_v47 }
 0x386   :  { %v1453_v49 = vsel %vm275_vm11, %v1323_v59, 0.0  ;;  %v1519_v62 = vadd.f32 %v1487_v57, %v1425_v54  ;;  %v1396_v55 = vadd.f32 %v1395_v48, %v1394_v3  ;;  %v1606_v59 = vmul.f32 %v5450_v19, %v5792_v32 }
 0x387   :  { %v1441_v40 = vadd.f32 %v1440_v45, %v1439_v8  ;;  %v1448_v25 = vadd.f32 %v1447_v34, %v1446_v27  ;;  %v1455_v26 = vadd.f32 %v1454_v5, %v1453_v49  ;;  %v1290_v29 = vpop.permute.xlu1 %1289  ;;  %v1434_v24 = vadd.f32 %v1433_v30, %v1432_v7 }
 0x388   :  { %v1325_v43 = vmul.f32 %v1290_v29, %v1165_v9  ;;  %v1513_v57 = vadd.f32 %v1482_v4, %v1371_v10  ;;  %v1380_v34 = vadd.f32 %v1379_v14, %v1378_v60  ;;  %v1388_v51 = vrot.slane %v1387_v38, 1 }
 0x389   :  { %v1442_v58 = vrot.slane %v1441_v40, 1  ;;  %v1449_v35 = vrot.slane %v1448_v25, 2  ;;  %v1456_v22 = vrot.slane %v1455_v26, 4  ;;  %v1520_v8 = vadd.f32 %v1488_v1, %v1434_v24  ;;  %v1582_v1 = vpop.permute.xlu0 %1581 }
 0x38a   :  { %v1462_v31 = vsel %vm275_vm11, %v1325_v43, 0.0  ;;  %v1613_v23 = vmul.f32 %v5480_v39, %v1519_v62  ;;  %v1628_v3 = vpack.c.bf16 %v1612_v0, %v1612_v0  ;;  %v1622_v10 = vpack.c.bf16 %v1606_v59, %v1606_v59 }
 0x38b   :  { %v1443_v18 = vadd.f32 %v1442_v58, %v1441_v40  ;;  %v1450_v41 = vadd.f32 %v1449_v35, %v1448_v25  ;;  %v1457_v46 = vadd.f32 %v1456_v22, %v1455_v26  ;;  %v1572_v7 = vpop.permute.xlu1 %1571  ;;  %v1464_v27 = vadd.f32 %v1463_v11, %v1462_v31 }
 0x38c   :  { %v1611_v52 = vmul.f32 %v1572_v7, %v1517_v61  ;;  %v1614_v40 = vmul.f32 %v1578_v15, %v1520_v8  ;;  %v1514_v39 = vadd.f32 %v1483_v21, %v1380_v34  ;;  %v1389_v9 = vadd.f32 %v1388_v51, %v1387_v38 }
 0x38d   :  { %v1521_v5 = vadd.f32 %v1489_v36, %v1443_v18  ;;  %v1451_v56 = vrot.slane %v1450_v41, 1  ;;  %v1458_v30 = vrot.slane %v1457_v46, 2  ;;  %v1465_v45 = vrot.slane %v1464_v27, 4 }
 0x38e   :  { %v1627_v32 = vpack.c.bf16 %v1611_v52, %v1611_v52  ;;  %v1397_v36 = vrot.slane %v1396_v55, 1  ;;  %v1629_v43 = vpack.c.bf16 %v1613_v23, %v1613_v23  ;;  %v1660_v15 = vunpack.c.l.b16 %v1628_v3 }
 0x38f   :  { %v1452_v49 = vadd.f32 %v1451_v56, %v1450_v41  ;;  %v1459_v47 = vadd.f32 %v1458_v30, %v1457_v46  ;;  %v1564_v54 = vpop.permute.xlu1 %1563  ;;  %v1466_v19 = vadd.f32 %v1465_v45, %v1464_v27  ;;  %v1615_v25 = vmul.f32 %v1580_v17, %v1521_v5 }
 0x390   :  { %v1607_v4 = vmul.f32 %v1564_v54, %v1513_v57  ;;  %v1630_v58 = vpack.c.bf16 %v1614_v40, %v1614_v40  ;;  %v1398_v22 = vadd.f32 %v1397_v36, %v1396_v55  ;;  %v1659_v61 = vunpack.c.l.b16 %v1627_v32 }
 0x391   :  { %v1522_v26 = vadd.f32 %v1490_v63, %v1452_v49  ;;  %v1460_v29 = vrot.slane %v1459_v47, 1  ;;  %v1467_v60 = vrot.slane %v1466_v19, 2  ;;  %v1631_v11 = vpack.c.bf16 %v1615_v25, %v1615_v25  ;;  %v1584_v63 = vpop.permute.xlu0 %1583 }
 0x392   :  { %v1623_v0 = vpack.c.bf16 %v1607_v4, %v1607_v4  ;;  %v1515_v18 = vadd.f32 %v1484_v20, %v1389_v9  ;;  %v1661_v46 = vunpack.c.l.b16 %v1629_v43  ;;  %v1688_v7 = vrot.slane %v1660_v15, 7 }
 0x393   :  { %v1616_v48 = vmul.f32 %v1582_v1, %v1522_v26  ;;  %v1461_v24 = vadd.f32 %v1460_v29, %v1459_v47  ;;  %v1566_v14 = vpop.permute.xlu1 %1565  ;;  %v1468_v35 = vadd.f32 %v1467_v60, %v1466_v19  ;;  %v1654_v8 = vunpack.c.l.b16 %v1622_v10 }
 0x394   :  { %v1608_v17 = vmul.f32 %v1566_v14, %v1514_v39  ;;  %v1662_v52 = vunpack.c.l.b16 %v1630_v58  ;;  %v1663_v5 = vunpack.c.l.b16 %v1631_v11  ;;  %v1689_v30 = vsel %vm6565_vm12, %v1688_v7, %v1659_v61 }
 0x395   :  { %v1523_v31 = vadd.f32 %v1491_v2, %v1461_v24  ;;  %v1632_v21 = vpack.c.bf16 %v1616_v48, %v1616_v48  ;;  %v1469_v38 = vrot.slane %v1468_v35, 1  ;;  %v1516_v2 = vadd.f32 %v1485_v13, %v1398_v22  ;;  %v1586_v23 = vpop.permute.xlu0 %1585 }
 0x396   :  { %v1624_v62 = vpack.c.bf16 %v1608_v17, %v1608_v17  ;;  %v1655_v45 = vunpack.c.l.b16 %v1623_v0  ;;  %v1690_v1 = vrot.slane %v1661_v46, 6  ;;  %v1669_v49 = vsel %vm6565_vm12, %v1667_v12, %v5797_v37 }
 0x397   :  { %v1617_v41 = vmul.f32 %v1584_v63, %v1523_v31  ;;  %v1568_v27 = vpop.permute.xlu1 %1567  ;;  %v1470_v55 = vadd.f32 %v1469_v38, %v1468_v35  ;;  %v1664_v57 = vunpack.c.l.b16 %v1632_v21  ;;  %v1673_v50 = vrot.slane %v1654_v8, 5  ;;  %v5014_v31 = vld [vmem:[#allocation3] sm:$0xff] }
 0x398   :  { %v1609_v59 = vmul.f32 %v1568_v27, %v1515_v18  ;;  %v1656_v34 = vunpack.c.l.b16 %v1624_v62  ;;  %v1692_v3 = vrot.slane %v1662_v52, 5  ;;  %v1670_v32 = vrot.slane %v5784_v53, 6  ;;  %v5015_v62 = vld [vmem:[#allocation3 + $0x8] sm:$0xff]  ;;  %v4777_v52 = vld [vmem:[#allocation6 + $0x50] sm:$0xff]  }
 0x399   :  { %v1633_v56 = vpack.c.bf16 %v1617_v41, %v1617_v41  ;;  %v1524_v20 = vadd.f32 %v1492_v16, %v1470_v55  ;;  %v1694_v44 = vrot.slane %v1663_v5, 4  ;;  %v1691_v16 = vsel %vm1671_vm13, %v1690_v1, %v1689_v30  ;;  %v4776_v27 = vld [vmem:[#allocation6 + $0x58] sm:$0xff]  }
 0x39a   :  { %v1625_v51 = vpack.c.bf16 %v1609_v59, %v1609_v59  ;;  %v1676_v36 = vrot.slane %v1655_v45, 4  ;;  %v1696_v25 = vrot.slane %v1664_v57, 3  ;;  %v1679_v26 = vrot.slane %v1656_v34, 3  ;;  %4625 = vmatpush3.bf16.msra.mxu1 %v4776_v27  ;;  %v4475_v34 = vld [vmem:[#allocation8 + $0x38] ss:$0 sm:$0xff] }
 0x39b   :  { %v1570_v13 = vpop.permute.xlu1 %1569  ;;  %v1665_v47 = vunpack.c.l.b16 %v1633_v56  ;;  %v1618_v19 = vmul.f32 %v1586_v23, %v1524_v20  ;;  %v1672_v28 = vsel %vm1671_vm13, %v1670_v32, %v1669_v49  ;;  %vm1683_vm12 = vcmask 1046534   ;;  %4626 = vmatprep.subr.bf16.mxu1 %v6579_v6  ;;  %v1776_v32 = vld [vmem:[#allocation8 + $0x40] sm:$0xf] }
 0x39c   :  { %v1657_v54 = vunpack.c.l.b16 %v1625_v51  ;;  %v1610_v40 = vmul.f32 %v1570_v13, %v1516_v2  ;;  %v1693_v10 = vsel %vm1674_vm14, %v1692_v3, %v1691_v16  ;;  %v1675_v60 = vsel %vm1674_vm14, %v1673_v50, %v1672_v28  ;;  %v4778_v50 = vld [vmem:[#allocation6 + $0x78] sm:$0xff]   ;;  %v4779_v13 = vld [vmem:[#allocation6 + $0x70] sm:$0xff]   ;;  %v4781_v3 = vld [vmem:[#allocation6 + $0x60] sm:$0xff]  }
 0x39d   :  { %v1634_v4 = vpack.c.bf16 %v1618_v19, %v1618_v19  ;;  %v1698_v37 = vrot.slane %v1665_v47, 2  ;;  %v1678_v53 = vsel %vm1677_vm15, %v1676_v36, %v1675_v60  ;;  %v1695_v48 = vsel %vm1677_vm15, %v1694_v44, %v1693_v10  ;;  %v4780_v47 = vld [vmem:[#allocation6 + $0x68] sm:$0xff]   ;;  %v6580_v36 = vld [vmem:[#allocation18_spill] sm:$0xff] }
 0x39e   :  { %v1626_v29 = vpack.c.bf16 %v1610_v40, %v1610_v40  ;;  %v1682_v12 = vrot.slane %v1657_v54, 2  ;;  %v1681_v24 = vsel %vm1680_vm10, %v1679_v26, %v1678_v53  ;;  %v1697_v15 = vsel %vm1680_vm10, %v1696_v25, %v1695_v48  ;;  %4627 = vmatpush3.bf16.msra.mxu1 %v4777_v52 }
 0x39f   :  { %v1666_v9 = vunpack.c.l.b16 %v1634_v4  ;;  %v1699_v35 = vsel %vm1683_vm12, %v1698_v37, %v1697_v15  ;;  %4644 = vmatprep.subr.bf16.mxu1 %v6579_v6  ;;  %v1891_v16 = vrot.slane %v1776_v32, %v5192_v33  ;;  %v1905_v25 = vrot.slane %v1776_v32, %v6580_v36  ;;  %v6581_v37 = vld [vmem:[#allocation15_spill] sm:$0xff] }
 0x3a0   :  { %v1658_v39 = vunpack.c.l.b16 %v1626_v29  ;;  %v1684_v58 = vsel %vm1683_vm12, %v1682_v12, %v1681_v24  ;;  %v1927_v10 = vrot.slane %v1776_v32, %v6581_v37 }
 0x3a1   :  { %v1700_v14 = vrot.slane %v1666_v9, 1 }
 0x3a2   :  { %v1685_v43 = vrot.slane %v1658_v39, 1 }
 0x3a3   :  { %v1701_v22 = vsel %vm1686_vm9, %v1700_v14, %v1699_v35  ;;  %v4479_v14 = vld [vmem:[#allocation8 + $0x48] ss:$0 sm:$0xff] }
 0x3a4   :  { %v1687_v17 = vsel %vm1686_vm9, %v1685_v43, %v1684_v58  ;;  %v6583_v58 = vld [vmem:[#allocation16_spill] sm:$0xff] }
 0x3a5   :  { %v1702_v11 = vpack.c.b16 %v1701_v22, %v1687_v17  ;;  %v6584_v17 = vld [vmem:[#allocation17_spill] sm:$0xff] }
 0x3a7   :  { %4621 = vmatmul.mubr.msk.bf16.vlgmr.msra.gmra.mxu0 %vm275_vm11, %v1702_v11 }
 0x3a8   :  { %4640 = vmatprep.mubr.msk.bf16.mxu0 %vm5110_vm1, %v6579_v6  ;;  %4633 = vmatpush3.bf16.msra.mxu0 %v4778_v50 }
 0x3a9   :  { %4634 = vmatprep.subr.bf16.mxu0 %v6579_v6 }
 0x3ac   :  { %4635 = vmatpush3.bf16.msra.mxu0 %v4779_v13 }
 0x3ad   :  { %4636 = vmatprep.subr.bf16.mxu0 %v6579_v6 }
 0x3b0   :  { %4637 = vmatpush3.bf16.msra.mxu0 %v4780_v47 }
 0x3b1   :  { %4638 = vmatprep.subr.bf16.mxu0 %v6579_v6 }
 0x3b4   :  { %4639 = vmatpush3.bf16.msra.mxu0 %v4781_v3 }
 0x3b5   :  { %4656 = vmatprep.subr.bf16.mxu0 %v6579_v6 }
 0x467   :  { %v1764_v63 = vpop.f32.mrf.mxu0 }
 0x468   :  { %v5853_v61 = vadd.f32 %v5014_v31, %v1764_v63 }
 0x469   :  { %v4622_v0 = vpop.f32.mrf.mxu0 }
 0x46a   :  { %v1798_v21 = vmul.f32 %v5853_v61, %v5853_v61 }
 0x46b   :  { %v1767_v38 = vpop.f32.mrf.mxu0 }
 0x46c   :  { %v5857_v18 = vadd.f32 %v5015_v62, %v1767_v38  ;;  %v1800_v41 = vsel %vm88_vm0, %v1798_v21, 0.0  ;;  %v6585_v38 = vld [vmem:[#allocation19_spill] sm:$0xff] }
 0x46d   :  { %1801 = vadd.xlane.f32.xlu1 %v1800_v41  ;;  %v4623_v46 = vpop.f32.mrf.mxu0  ;;  %v1919_v62 = vrot.slane %v1776_v32, %v6585_v38 }
 0x46e   :  { %v1799_v7 = vmul.f32 %v5857_v18, %v5857_v18 }
 0x470   :  { %v1803_v8 = vsel %vm88_vm0, %v1799_v7, 0.0 }
 0x471   :  { %1804 = vadd.xlane.f32.xlu0 %v1803_v8 }
 0x4f6   :  { %v1802_v55 = vpop.xlane.xlu1 %1801 }
 0x4f7   :  { %v1806_v59 = vmul.f32 0.03125, %v1802_v55 }
 0x4f9   :  { %v1808_v2 = vadd.f32 1e-05, %v1806_v59 }
 0x4fa   :  { %v1805_v5 = vpop.xlane.xlu0 %1804 }
 0x4fb   :  { %4886 = vrsqrt.f32 %v1808_v2  ;;  %v1807_v56 = vmul.f32 0.03125, %v1805_v5 }
 0x4fd   :  { %v1809_v30 = vadd.f32 1e-05, %v1807_v56 }
 0x4ff   :  { %4888 = vrsqrt.f32 %v1809_v30 }
 0x508   :  { %v4887_v45 = vpop.eup %4886 }
 0x509   :  { %v1812_v57 = vmul.f32 %v4887_v45, %v5853_v61 }
 0x50b   :  { %v1818_v23 = vmul.f32 %v4475_v34, %v1812_v57 }
 0x50c   :  { %v4889_v20 = vpop.eup %4888 }
 0x50d   :  { %v1813_v51 = vmul.f32 %v4889_v20, %v5857_v18 }
 0x50f   :  { %v1819_v1 = vmul.f32 %v4475_v34, %v1813_v51 }
 0x511   :  { %v1820_v49 = vpack.c.bf16 %v1819_v1, %v1818_v23 }
 0x513   :  { %4629 = vmatmul.mubr.msk.bf16.vlgmr.msra.gmra.mxu1 %vm88_vm0, %v1820_v49 }
 0x514   :  { %4652 = vmatprep.mubr.msk.bf16.mxu1 %vm5110_vm1, %v6579_v6 }
 0x5d3   :  { %v1870_v54 = vpop.f32.mrf.mxu1 }
 0x5d4   :  { %v4489_v40 = vmul.f32 -1.442695, %v1870_v54  ;;  %v1882_v26 = vrot.slane %v1870_v54, 5  ;;  %v1896_v29 = vrot.slane %v1870_v54, 6  ;;  %v1910_v12 = vrot.slane %v1870_v54, 7 }
 0x5d5   :  { %v4630_v19 = vpop.f32.mrf.mxu1  ;;  %v1928_v30 = vmul.f32 %v1927_v10, %v1870_v54 }
 0x5d6   :  { %4890 = vpow2.f32 %v4489_v40 }
 0x5d7   :  { %v5874_v44 = vpop.f32.mrf.mxu1 }
 0x5d8   :  { %v1883_v4 = vrot.slane %v5874_v44, 5  ;;  %v1897_v28 = vrot.slane %v5874_v44, 6  ;;  %v1911_v60 = vrot.slane %v5874_v44, 7  ;;  %v4490_v39 = vmul.f32 -1.442695, %v5874_v44 }
 0x5d9   :  { %v4631_v9 = vpop.f32.mrf.mxu1  ;;  %v1929_v20 = vmul.f32 %v1927_v10, %v5874_v44 }
 0x5da   :  { %v1884_v48 = vsel %vm181_vm2, %v1882_v26, %v1883_v4  ;;  %v1885_v24 = vsel %vm181_vm2, %v1883_v4, %v1882_v26  ;;  %v1898_v43 = vsel %vm198_vm4, %v1896_v29, %v1897_v28  ;;  %v1899_v15 = vsel %vm198_vm4, %v1897_v28, %v1896_v29 }
 0x5db   :  { %v1886_v35 = vsel %vm177_vm3, %v1885_v24, 0.0  ;;  %v1887_v22 = vsel %vm178_vm6, %v1884_v48, 0.0  ;;  %v1900_v11 = vsel %vm194_vm7, %v1899_v15, 0.0  ;;  %v1901_v63 = vsel %vm195_vm8, %v1898_v43, 0.0 }
 0x5dc   :  { %v1892_v31 = vmul.f32 %v1891_v16, %v1886_v35  ;;  %v1893_v0 = vmul.f32 %v1891_v16, %v1887_v22  ;;  %v1906_v21 = vmul.f32 %v1905_v25, %v1900_v11  ;;  %v1907_v41 = vmul.f32 %v1905_v25, %v1901_v63 }
 0x5dd   :  { %v1912_v46 = vsel %vm215_vm5, %v1910_v12, %v1911_v60  ;;  %v1913_v7 = vsel %vm215_vm5, %v1911_v60, %v1910_v12  ;;  %4892 = vpow2.f32 %v4490_v39  ;;  %vm6586_vm2 = vcmp.ge.s32.totalorder %v6583_v58, 1 }
 0x5de   :  { %v1894_v8 = vadd.f32 %v4479_v14, %v1892_v31  ;;  %v1895_v27 = vadd.f32 %v4479_v14, %v1893_v0  ;;  %v1914_v52 = vsel %vm6586_vm2, %v1913_v7, 0.0  ;;  %vm6587_vm3 = vcmp.ge.s32.totalorder %v6584_v17, 1  ;;  %v4487_v14 = vld [vmem:[#allocation8 + $0x50] ss:$0 sm:$0xff] }
 0x5df   :  { %v1915_v55 = vsel %vm6587_vm3, %v1912_v46, 0.0  ;;  %v1920_v5 = vmul.f32 %v1919_v62, %v1914_v52  ;;  %v6589_v7 = vld [vmem:[#allocation21_spill] sm:$0xff]  ;;  %v6590_v52 = vld [vmem:[#allocation22_spill] sm:$0xff]  ;;  %vm6592_vm4 = vcmask 1041409   ;;  %vm3538_vm6 = vcmask 64512  }
 0x5e0   :  { %v1908_v59 = vadd.f32 %v1906_v21, %v1894_v8  ;;  %v1909_v2 = vadd.f32 %v1907_v41, %v1895_v27  ;;  %v1921_v56 = vmul.f32 %v1919_v62, %v1915_v55  ;;  %v6588_v62 = vld [vmem:[#allocation20_spill] sm:$0xff]  ;;  %vm6593_vm5 = vmmov %vm6592_vm4  ;;  %vm3626_vm8 = vcmask 130048  }
 0x5e2   :  { %v1922_v45 = vadd.f32 %v1920_v5, %v1908_v59  ;;  %v1923_v57 = vadd.f32 %v1921_v56, %v1909_v2  ;;  %v6591_v2 = vld [vmem:[#allocation23_spill] sm:$0xff] }
 0x5e3   :  { %v4891_v34 = vpop.eup %4890 }
 0x5e4   :  { %v1931_v51 = vadd.f32 %v1929_v20, %v1923_v57  ;;  %v1930_v23 = vadd.f32 %v1928_v30, %v1922_v45  ;;  %v3219_v1 = vadd.f32 1.0, %v4891_v34  ;;  %v1788_v57 = vld [vmem:[#allocation8 + $0x60] sm:$0xff]  ;;  %v1787_v20 = vld [vmem:[#allocation8 + $0x58] sm:$0xff] }
 0x5e5   :  { %v2041_v34 = vmul.f32 1.442695, %v1788_v57 }
 0x5e6   :  { %v4481_v49 = vmul.f32 -1.442695, %v1931_v51  ;;  %v4480_v50 = vmul.f32 -1.442695, %v1930_v23  ;;  %4894 = vrcp.f32 %v3219_v1 }
 0x5e8   :  { %4896 = vpow2.f32 %v4481_v49 }
 0x5e9   :  { %4898 = vpow2.f32 %v4480_v50 }
 0x5ea   :  { %v4893_v13 = vpop.eup %4892 }
 0x5eb   :  { %v3220_v47 = vadd.f32 1.0, %v4893_v13 }
 0x5ed   :  { %4900 = vrcp.f32 %v3220_v47 }
 0x5f3   :  { %v4895_v3 = vpop.eup %4894 }
 0x5f4   :  { %v5909_v19 = vmul.f32 %v4895_v3, %v1870_v54 }
 0x5f5   :  { %v4897_v40 = vpop.eup %4896 }
 0x5f6   :  { %v4899_v32 = vpop.eup %4898  ;;  %v1939_v16 = vadd.f32 1.0, %v4897_v40  ;;  %3243 = vrot.lane.b32.xlu1 %v5909_v19, %s5103_s15  ;;  %v3231_v25 = vrot.slane %v5909_v19, 3  ;;  %v3229_v29 = vrot.slane %v5909_v19, 1  ;;  %v3230_v12 = vrot.slane %v5909_v19, 2 }
 0x5f7   :  { %v1938_v26 = vadd.f32 1.0, %v4899_v32 }
 0x5f8   :  { %4902 = vrcp.f32 %v1939_v16  ;;  %3249 = vrot.lane.b32.xlu0 %v3231_v25, %s5103_s15 }
 0x5f9   :  { %4904 = vrcp.f32 %v1938_v26 }
 0x5fa   :  { %v4901_v4 = vpop.eup %4900  ;;  %3245 = vrot.lane.b32.xlu1 %v3229_v29, %s5103_s15 }
 0x5fb   :  { %v5917_v28 = vmul.f32 %v4901_v4, %v5874_v44 }
 0x5fd   :  { %v3236_v54 = vrot.slane %v5917_v28, 1  ;;  %v3237_v10 = vrot.slane %v5917_v28, 2 }
 0x5fe   :  { %3247 = vrot.lane.b32.xlu1 %v3230_v12, %s5103_s15 }
 0x5ff   :  { %3261 = vrot.lane.b32.xlu0 %v3236_v54, %s5103_s15 }
 0x603   :  { %3263 = vrot.lane.b32.xlu0 %v3237_v10, %s5103_s15 }
 0x605   :  { %v4903_v60 = vpop.eup %4902 }
 0x606   :  { %v4905_v39 = vpop.eup %4904  ;;  %v5926_v9 = vmul.f32 %v4903_v60, %v1931_v51  ;;  %v2039_v51 = vmul.f32 1.442695, %v1787_v20 }
 0x607   :  { %v5928_v44 = vmul.f32 %v4905_v39, %v1930_v23 }
 0x609   :  { %v1946_v48 = vpack.c.bf16 %v5926_v9, %v5928_v44 }
 0x60b   :  { %4641 = vmatmul.mubr.msk.bf16.vlgmr.msra.gmra.mxu0 %vm275_vm11, %v1946_v48 }
 0x60c   :  { %4660 = vmatprep.mubr.msk.bf16.mxu0 %vm5110_vm1, %v6579_v6 }
 0x6cb   :  { %v2008_v24 = vpop.f32.mrf.mxu0 }
 0x6cc   :  { %v2326_v43 = vrot.slane %v2008_v24, %v5192_v33  ;;  %v2338_v17 = vrot.slane %v2008_v24, %v6580_v36  ;;  %v2350_v63 = vrot.slane %v2008_v24, %v6585_v38  ;;  %v2362_v0 = vrot.slane %v2008_v24, %v6581_v37 }
 0x6cd   :  { %v4642_v15 = vpop.f32.mrf.mxu0  ;;  %v2374_v41 = vrot.slane %v2008_v24, %v6588_v62  ;;  %v5943_v46 = vadd.f32 %v4487_v14, %v2008_v24  ;;  %v2386_v8 = vrot.slane %v2008_v24, %v6589_v7  ;;  %v2398_v55 = vrot.slane %v2008_v24, %v6590_v52 }
 0x6ce   :  { %2333 = vbcast.lane.b32.xlu1 %v2326_v43, 344  ;;  %2329 = vbcast.lane.b32.xlu0 %v2326_v43, 336  ;;  %v2410_v5 = vrot.slane %v2008_v24, %v6591_v2 }
 0x6cf   :  { %v5936_v58 = vpop.f32.mrf.mxu0  ;;  %v2023_v27 = vand.u32 2147483647, %v5943_v46 }
 0x6d0   :  { %v2020_v35 = vadd.f32 %v4487_v14, %v5936_v58  ;;  %v5955_v16 = vrot.slane %v5936_v58, %v5192_v33  ;;  %v5967_v54 = vrot.slane %v5936_v58, %v6580_v36  ;;  %v5981_v36 = vrot.slane %v5936_v58, %v6585_v38 }
 0x6d1   :  { %v4643_v22 = vpop.f32.mrf.mxu0  ;;  %v2025_v59 = vsub.f32 0.0, %v2023_v27 }
 0x6d2   :  { %v2024_v11 = vand.u32 2147483647, %v2020_v35  ;;  %2341 = vbcast.lane.b32.xlu1 %v2338_v17, 336  ;;  %2345 = vbcast.lane.b32.xlu0 %v2338_v17, 344  ;;  %v2022_v13 = vmax.f32 %v2020_v35, 0.0 }
 0x6d3   :  { %v2027_v30 = vmul.f32 1.442695, %v2025_v59 }
 0x6d4   :  { %v2026_v31 = vsub.f32 0.0, %v2024_v11 }
 0x6d6   :  { %2353 = vbcast.lane.b32.xlu1 %v2350_v63, 336  ;;  %2357 = vbcast.lane.b32.xlu0 %v2350_v63, 344  ;;  %v2029_v21 = vmul.f32 1.442695, %v2026_v31 }
 0x6d8   :  { %4906 = vpow2.f32 %v2029_v21 }
 0x6d9   :  { %4908 = vpow2.f32 %v2027_v30 }
 0x6da   :  { %2365 = vbcast.lane.b32.xlu1 %v2362_v0, 336  ;;  %2369 = vbcast.lane.b32.xlu0 %v2362_v0, 344 }
 0x6de   :  { %2377 = vbcast.lane.b32.xlu1 %v2374_v41, 336  ;;  %2381 = vbcast.lane.b32.xlu0 %v2374_v41, 344 }
 0x6e2   :  { %2389 = vbcast.lane.b32.xlu1 %v2386_v8, 336  ;;  %2393 = vbcast.lane.b32.xlu0 %v2386_v8, 344 }
 0x6e5   :  { %v4907_v56 = vpop.eup %4906 }
 0x6e6   :  { %2401 = vbcast.lane.b32.xlu1 %v2398_v55, 336  ;;  %2405 = vbcast.lane.b32.xlu0 %v2398_v55, 344  ;;  %v2032_v45 = vadd.f32 1.0, %v4907_v56  ;;  %v4909_v23 = vpop.eup %4908 }
 0x6e7   :  { %v2031_v49 = vadd.f32 1.0, %v4909_v23 }
 0x6e8   :  { %4910 = vlog2.f32 %v2032_v45 }
 0x6e9   :  { %4912 = vpow2.f32 %v2041_v34 }
 0x6ea   :  { %2413 = vbcast.lane.b32.xlu1 %v2410_v5, 336  ;;  %2417 = vbcast.lane.b32.xlu0 %v2410_v5, 344  ;;  %4914 = vpow2.f32 %v2039_v51  ;;  %v6034_v51 = vrot.slane %v5936_v58, %v6589_v7 }
 0x6eb   :  { %4916 = vlog2.f32 %v2031_v49 }
 0x6ee   :  { %2865 = vbcast.lane.b32.xlu1 %v2338_v17, 320  ;;  %2869 = vbcast.lane.b32.xlu0 %v2338_v17, 328 }
 0x6f2   :  { %2873 = vbcast.lane.b32.xlu1 %v2350_v63, 320  ;;  %2877 = vbcast.lane.b32.xlu0 %v2350_v63, 328  ;;  %v2021_v63 = vmax.f32 %v5943_v46, 0.0 }
 0x6f5   :  { %v4911_v1 = vpop.eup %4910 }
 0x6f6   :  { %2857 = vbcast.lane.b32.xlu1 %v2326_v43, 320  ;;  %2861 = vbcast.lane.b32.xlu0 %v2326_v43, 328  ;;  %v2036_v50 = vmul.f32 0.6931472, %v4911_v1  ;;  %v4913_v40 = vpop.eup %4912 }
 0x6f7   :  { %v4915_v32 = vpop.eup %4914  ;;  %v5960_v26 = vsub.f32 0.0, %v4913_v40 }
 0x6f8   :  { %v5949_v47 = vadd.f32 %v2036_v50, %v2022_v13  ;;  %v5962_v29 = vsub.f32 0.0, %v4915_v32  ;;  %v4917_v60 = vpop.eup %4916  ;;  %v6055_v32 = vrot.slane %v5936_v58, %v6590_v52 }
 0x6f9   :  { %v2034_v14 = vmul.f32 0.6931472, %v4917_v60  ;;  %v6069_v60 = vrot.slane %v5936_v58, %v6591_v2 }
 0x6fa   :  { %2881 = vbcast.lane.b32.xlu1 %v2362_v0, 320  ;;  %2885 = vbcast.lane.b32.xlu0 %v2362_v0, 328  ;;  %v2105_v3 = vrot.slane %v5949_v47, %v5329_v42  ;;  %v2098_v15 = vcombine.high %v5949_v47, %v5949_v47 }
 0x6fc   :  { %v2121_v25 = vrot.slane %v2105_v3, %v5329_v42  ;;  %v2113_v12 = vcombine.high %v2105_v3, %v2105_v3  ;;  %v2112_v21 = vrot.slane %v2098_v15, %v5329_v42 }
 0x6fe   :  { %2889 = vbcast.lane.b32.xlu1 %v2374_v41, 320  ;;  %2893 = vbcast.lane.b32.xlu0 %v2374_v41, 328  ;;  %v2182_v4 = vrot.slane %v2121_v25, %v5192_v33  ;;  %v2143_v10 = vcombine.high %v2121_v25, %v2121_v25  ;;  %v2135_v24 = vrot.slane %v2113_v12, %v5329_v42 }
 0x6ff   :  { %v2037_v41 = vadd.f32 %v2034_v14, %v2021_v63  ;;  %v2114_v59 = vcombine.high %v2112_v21, %v2112_v21 }
 0x700   :  { %v5970_v39 = vmul.f32 %v2182_v4, %v5960_v26  ;;  %v5973_v48 = vmul.f32 %v2182_v4, %v5962_v29  ;;  %v2190_v43 = vrot.slane %v2143_v10, %v5192_v33  ;;  %v2186_v35 = vrot.slane %v2135_v24, %v5192_v33 }
 0x701   :  { %v2145_v11 = vcombine.high %v2135_v24, %v2135_v24  ;;  %v2056_v56 = vrot.slane %v2037_v41, %v5329_v42  ;;  %v2142_v30 = vrot.slane %v2114_v59, %v5329_v42  ;;  %v2049_v15 = vcombine.high %v2037_v41, %v2037_v41  ;;  %v6084_v59 = vpop.permute.xlu0 %3249 }
 0x702   :  { %2897 = vbcast.lane.b32.xlu1 %v2386_v8, 320  ;;  %2901 = vbcast.lane.b32.xlu0 %v2386_v8, 328  ;;  %v5987_v17 = vmul.f32 %v2190_v43, %v5960_v26  ;;  %v5990_v22 = vmul.f32 %v2190_v43, %v5962_v29  ;;  %v5995_v38 = vmul.f32 %v2186_v35, %v5960_v26 }
 0x703   :  { %v5998_v31 = vmul.f32 %v2186_v35, %v5962_v29  ;;  %v2194_v0 = vrot.slane %v2145_v11, %v5192_v33  ;;  %v6005_v8 = vrot.slane %v5936_v58, %v6581_v37  ;;  %v6020_v37 = vrot.slane %v5936_v58, %v6588_v62 }
 0x704   :  { %v2202_v34 = vrot.slane %v2142_v30, %v5192_v33  ;;  %v2072_v23 = vrot.slane %v2056_v56, %v5329_v42  ;;  %v2146_v50 = vcombine.high %v2142_v30, %v2142_v30  ;;  %v2064_v40 = vcombine.high %v2056_v56, %v2056_v56 }
 0x705   :  { %v6008_v46 = vmul.f32 %v2194_v0, %v5960_v26  ;;  %v6011_v27 = vmul.f32 %v2194_v0, %v5962_v29  ;;  %v2063_v58 = vrot.slane %v2049_v15, %v5329_v42 }
 0x706   :  { %2905 = vbcast.lane.b32.xlu1 %v2398_v55, 320  ;;  %2909 = vbcast.lane.b32.xlu0 %v2398_v55, 328  ;;  %v2128_v55 = vrot.slane %v2112_v21, %v5329_v42  ;;  %v6039_v1 = vmul.f32 %v2202_v34, %v5960_v26  ;;  %v6042_v49 = vmul.f32 %v2202_v34, %v5962_v29 }
 0x707   :  { %v2210_v7 = vrot.slane %v2146_v50, %v5192_v33  ;;  %v2150_v25 = vrot.slane %v2072_v23, %v5192_v33  ;;  %v2086_v10 = vrot.slane %v2064_v40, %v5329_v42  ;;  %v2094_v14 = vcombine.high %v2072_v23, %v2072_v23  ;;  %v6097_v40 = vpop.permute.xlu0 %3261 }
 0x708   :  { %v2144_v45 = vcombine.high %v2128_v55, %v2128_v55  ;;  %v2079_v30 = vrot.slane %v2063_v58, %v5329_v42 }
 0x709   :  { %v6059_v4 = vmul.f32 %v2210_v7, %v5960_v26  ;;  %v6062_v12 = vmul.f32 %v2210_v7, %v5962_v29  ;;  %v2228_v52 = vmul.f32 %v2150_v25, %v5960_v26  ;;  %v2227_v24 = vmul.f32 %v2150_v25, %v5962_v29 }
 0x70a   :  { %2913 = vbcast.lane.b32.xlu1 %v2410_v5, 320  ;;  %2917 = vbcast.lane.b32.xlu0 %v2410_v5, 328  ;;  %v2198_v5 = vrot.slane %v2128_v55, %v5192_v33  ;;  %v2206_v62 = vrot.slane %v2144_v45, %v5192_v33  ;;  %v2154_v43 = vrot.slane %v2086_v10, %v5192_v33  ;;  %v6082_v55 = vpop.permute.xlu1 %3243 }
 0x70b   :  { %v2261_v35 = vmul.f32 1.442695, %v2228_v52  ;;  %v2259_v11 = vmul.f32 1.442695, %v2227_v24  ;;  %v2158_v0 = vrot.slane %v2094_v14, %v5192_v33  ;;  %v2096_v21 = vcombine.high %v2086_v10, %v2086_v10 }
 0x70c   :  { %v6024_v57 = vmul.f32 %v2198_v5, %v5960_v26  ;;  %v6027_v20 = vmul.f32 %v2198_v5, %v5962_v29  ;;  %v6045_v13 = vmul.f32 %v2206_v62, %v5960_v26  ;;  %v6048_v3 = vmul.f32 %v2206_v62, %v5962_v29 }
 0x70d   :  { %v2229_v63 = vmul.f32 %v2154_v43, %v5962_v29  ;;  %v2230_v2 = vmul.f32 %v2154_v43, %v5960_v26  ;;  %4918 = vpow2.f32 %v2261_v35  ;;  %v6087_v5 = vmul.f32 %v2037_v41, %v5928_v44 }
 0x70e   :  { %2425 = vbcast.lane.b32.xlu1 %v5955_v16, 336  ;;  %2429 = vbcast.lane.b32.xlu0 %v5955_v16, 344  ;;  %4920 = vpow2.f32 %v2259_v11  ;;  %v2231_v45 = vmul.f32 %v2158_v0, %v5962_v29  ;;  %v2162_v34 = vrot.slane %v2096_v21, %v5192_v33  ;;  %v2065_v62 = vcombine.high %v2063_v58, %v2063_v58  ;;  %v6095_v50 = vpop.permute.xlu1 %3245  ;;  %v6114_v58 = vpop.permute.xlu0 %3263 }
 0x70f   :  { %v2263_v56 = vmul.f32 1.442695, %v2229_v63  ;;  %v2232_v23 = vmul.f32 %v2158_v0, %v5960_v26  ;;  %v2524_v41 = vrot.slane %v6087_v5, %v5329_v42  ;;  %v2095_v14 = vcombine.high %v2079_v30, %v2079_v30 }
 0x710   :  { %v2267_v7 = vmul.f32 1.442695, %v2231_v45  ;;  %v2233_v25 = vmul.f32 %v2162_v34, %v5962_v29  ;;  %v2093_v10 = vrot.slane %v2065_v62, %v5329_v42  ;;  %v2234_v24 = vmul.f32 %v2162_v34, %v5960_v26 }
 0x711   :  { %4922 = vpow2.f32 %v2263_v56  ;;  %v2269_v52 = vmul.f32 1.442695, %v2232_v23  ;;  %v2532_v43 = vcombine.high %v2524_v41, %v2524_v41  ;;  %v2540_v35 = vrot.slane %v2524_v41, %v5329_v42 }
 0x712   :  { %2437 = vbcast.lane.b32.xlu1 %v5967_v54, 336  ;;  %2441 = vbcast.lane.b32.xlu0 %v5967_v54, 344  ;;  %v2170_v11 = vrot.slane %v2093_v10, %v5192_v33  ;;  %v6112_v63 = vpop.permute.xlu1 %3247  ;;  %v2097_v62 = vcombine.high %v2093_v10, %v2093_v10 }
 0x713   :  { %v2618_v45 = vrot.slane %v2540_v35, %v5192_v33 }
 0x714   :  { %v2237_v34 = vmul.f32 %v2170_v11, %v5962_v29 }
 0x716   :  { %2449 = vbcast.lane.b32.xlu1 %v5981_v36, 336  ;;  %2453 = vbcast.lane.b32.xlu0 %v5981_v36, 344 }
 0x71a   :  { %2461 = vbcast.lane.b32.xlu1 %v6005_v8, 336  ;;  %2465 = vbcast.lane.b32.xlu0 %v6005_v8, 344  ;;  %v4919_v21 = vpop.eup %4918 }
 0x71b   :  { %v4921_v56 = vpop.eup %4920 }
 0x71e   :  { %2473 = vbcast.lane.b32.xlu1 %v6020_v37, 336  ;;  %2477 = vbcast.lane.b32.xlu0 %v6020_v37, 344 }
 0x722   :  { %2485 = vbcast.lane.b32.xlu1 %v6034_v51, 336  ;;  %2489 = vbcast.lane.b32.xlu0 %v6034_v51, 344 }
 0x726   :  { %2497 = vbcast.lane.b32.xlu1 %v6055_v32, 336  ;;  %2501 = vbcast.lane.b32.xlu0 %v6055_v32, 344 }
 0x72a   :  { %2509 = vbcast.lane.b32.xlu1 %v6069_v60, 336  ;;  %2513 = vbcast.lane.b32.xlu0 %v6069_v60, 344 }
 0x72e   :  { %2929 = vbcast.lane.b32.xlu1 %v5967_v54, 320  ;;  %2933 = vbcast.lane.b32.xlu0 %v5967_v54, 328  ;;  %v2265_v54 = vmul.f32 1.442695, %v2230_v2  ;;  %v2273_v2 = vmul.f32 1.442695, %v2234_v24 }
 0x72f   :  { %v2728_v24 = vmul.f32 0.0, %v4919_v21 }
 0x730   :  { %4924 = vpow2.f32 %v2265_v54  ;;  %v2174_v54 = vrot.slane %v2095_v14, %v5192_v33  ;;  %v2562_v14 = vcombine.high %v2540_v35, %v2540_v35 }
 0x731   :  { %4926 = vpow2.f32 %v2267_v7 }
 0x732   :  { %2937 = vbcast.lane.b32.xlu1 %v5981_v36, 320  ;;  %2941 = vbcast.lane.b32.xlu0 %v5981_v36, 328  ;;  %v2166_v36 = vrot.slane %v2079_v30, %v5192_v33  ;;  %4928 = vpow2.f32 %v2269_v52  ;;  %v2239_v10 = vmul.f32 %v2174_v54, %v5962_v29 }
 0x734   :  { %v2235_v15 = vmul.f32 %v2166_v36, %v5962_v29  ;;  %v2236_v0 = vmul.f32 %v2166_v36, %v5960_v26  ;;  %v2517_v36 = vcombine.high %v6087_v5, %v6087_v5  ;;  %v2279_v5 = vmul.f32 1.442695, %v2237_v34 }
 0x736   :  { %2921 = vbcast.lane.b32.xlu1 %v5955_v16, 320  ;;  %2925 = vbcast.lane.b32.xlu0 %v5955_v16, 328  ;;  %v2271_v16 = vmul.f32 1.442695, %v2233_v25  ;;  %v2275_v30 = vmul.f32 1.442695, %v2235_v15  ;;  %v2238_v25 = vmul.f32 %v2170_v11, %v5960_v26  ;;  %v2178_v11 = vrot.slane %v2097_v62, %v5192_v33 }
 0x737   :  { %v2277_v7 = vmul.f32 1.442695, %v2236_v0  ;;  %v2727_v15 = vmul.f32 0.0, %v4921_v56  ;;  %v2531_v62 = vrot.slane %v2517_v36, %v5329_v42 }
 0x738   :  { %4930 = vpow2.f32 %v2271_v16  ;;  %v4923_v16 = vpop.eup %4922  ;;  %v2281_v56 = vmul.f32 1.442695, %v2238_v25  ;;  %v2241_v25 = vmul.f32 %v2178_v11, %v5962_v29 }
 0x739   :  { %4932 = vpow2.f32 %v2273_v2 }
 0x73a   :  { %2945 = vbcast.lane.b32.xlu1 %v6005_v8, 320  ;;  %2949 = vbcast.lane.b32.xlu0 %v6005_v8, 328  ;;  %v6119_v8 = vrot.slane %v2532_v43, %v5329_v42  ;;  %4934 = vpow2.f32 %v2275_v30 }
 0x73b   :  { %4936 = vpow2.f32 %v2277_v7 }
 0x73c   :  { %v2564_v34 = vcombine.high %v6119_v8, %v6119_v8  ;;  %4938 = vpow2.f32 %v2279_v5 }
 0x73d   :  { %v4925_v0 = vpop.eup %4924  ;;  %4940 = vpow2.f32 %v2281_v56 }
 0x73e   :  { %2953 = vbcast.lane.b32.xlu1 %v6020_v37, 320  ;;  %2957 = vbcast.lane.b32.xlu0 %v6020_v37, 328  ;;  %v2622_v37 = vrot.slane %v6119_v8, %v5192_v33  ;;  %v2630_v29 = vrot.slane %v2564_v34, %v5192_v33 }
 0x740   :  { %v2334_v23 = vpop.permute.xlu1 %2333  ;;  %v2330_v41 = vpop.permute.xlu0 %2329 }
 0x741   :  { %v2696_v52 = vmul.f32 %v2618_v45, %v2334_v23  ;;  %v2695_v43 = vmul.f32 %v2618_v45, %v2330_v41  ;;  %v2240_v45 = vmul.f32 %v2174_v54, %v5960_v26  ;;  %v2283_v54 = vmul.f32 1.442695, %v2239_v10 }
 0x742   :  { %2961 = vbcast.lane.b32.xlu1 %v6034_v51, 320  ;;  %2965 = vbcast.lane.b32.xlu0 %v6034_v51, 328  ;;  %v2626_v51 = vrot.slane %v2562_v14, %v5192_v33  ;;  %v6150_v10 = vrot.slane %v2531_v62, %v5329_v42 }
 0x743   :  { %v2732_v2 = vadd.f32 %v2728_v24, %v2696_v52  ;;  %v2731_v53 = vadd.f32 %v2727_v15, %v2695_v43  ;;  %v2285_v15 = vmul.f32 1.442695, %v2240_v45  ;;  %4942 = vpow2.f32 %v2283_v54 }
 0x744   :  { %v2342_v21 = vpop.permute.xlu1 %2341  ;;  %v2346_v23 = vpop.permute.xlu0 %2345 }
 0x745   :  { %2736 = vst.msk [vmem:[#allocation2 + $0x8] sm:$0xff] %vm275_vm11, %v2732_v2  ;;  %2735 = vst.msk [vmem:[#allocation2] sm:$0xff] %vm275_vm11, %v2731_v53  ;;  %v2697_v35 = vmul.f32 %v2622_v37, %v2342_v21  ;;  %v2739_v30 = vmul.f32 %v4923_v16, %v2731_v53  ;;  %v2740_v41 = vmul.f32 %v4925_v0, %v2732_v2  ;;  %v4927_v53 = vpop.eup %4926  ;;  %4944 = vpow2.f32 %v2285_v15 }
 0x746   :  { %v2698_v52 = vmul.f32 %v2622_v37, %v2346_v23  ;;  %2969 = vbcast.lane.b32.xlu1 %v6055_v32, 320  ;;  %2973 = vbcast.lane.b32.xlu0 %v6055_v32, 328  ;;  %v2242_v37 = vmul.f32 %v2178_v11, %v5960_v26  ;;  %v4929_v14 = vpop.eup %4928  ;;  %v2533_v26 = vcombine.high %v2531_v62, %v2531_v62  ;;  %v2287_v11 = vmul.f32 1.442695, %v2241_v25 }
 0x747   :  { %v2743_v7 = vadd.f32 %v2739_v30, %v2697_v35  ;;  %v4931_v0 = vpop.eup %4930 }
 0x748   :  { %v2744_v24 = vadd.f32 %v2740_v41, %v2698_v52  ;;  %v2354_v43 = vpop.permute.xlu1 %2353  ;;  %v2358_v36 = vpop.permute.xlu0 %2357  ;;  %v2289_v45 = vmul.f32 1.442695, %v2242_v37  ;;  %v3238_v52 = vrot.slane %v5917_v28, 3  ;;  %v2561_v54 = vrot.slane %v2533_v26, %v5329_v42 }
 0x749   :  { %2747 = vst.msk [vmem:[#allocation2 + $0x10] sm:$0xff] %vm275_vm11, %v2743_v7  ;;  %v2699_v8 = vmul.f32 %v2626_v51, %v2354_v43  ;;  %v2751_v16 = vmul.f32 %v4927_v53, %v2743_v7  ;;  %v2700_v32 = vmul.f32 %v2626_v51, %v2358_v36  ;;  %v4933_v35 = vpop.eup %4932  ;;  %v2634_v7 = vrot.slane %v6150_v10, %v5192_v33 }
 0x74a   :  { %2748 = vst.msk [vmem:[#allocation2 + $0x18] sm:$0xff] %vm275_vm11, %v2744_v24  ;;  %v2752_v2 = vmul.f32 %v4929_v14, %v2744_v24  ;;  %2977 = vbcast.lane.b32.xlu1 %v6069_v60, 320  ;;  %2981 = vbcast.lane.b32.xlu0 %v6069_v60, 328  ;;  %v4935_v34 = vpop.eup %4934  ;;  %4946 = vpow2.f32 %v2287_v11  ;;  %v3232_v24 = vrot.slane %v5909_v19, 4 }
 0x74b   :  { %v2755_v5 = vadd.f32 %v2751_v16, %v2699_v8  ;;  %4948 = vpow2.f32 %v2289_v45  ;;  %v4937_v43 = vpop.eup %4936  ;;  %v3239_v8 = vrot.slane %v5917_v28, 4 }
 0x74c   :  { %v2756_v21 = vadd.f32 %v2752_v2, %v2700_v32  ;;  %v2366_v56 = vpop.permute.xlu1 %2365  ;;  %v2370_v41 = vpop.permute.xlu0 %2369  ;;  %v2638_v2 = vrot.slane %v2561_v54, %v5192_v33 }
 0x74d   :  { %2759 = vst.msk [vmem:[#allocation2 + $0x20] sm:$0xff] %vm275_vm11, %v2755_v5  ;;  %v2701_v30 = vmul.f32 %v2630_v29, %v2366_v56  ;;  %v2763_v23 = vmul.f32 %v4931_v0, %v2755_v5  ;;  %v2702_v51 = vmul.f32 %v2630_v29, %v2370_v41  ;;  %v2563_v29 = vcombine.high %v6150_v10, %v6150_v10  ;;  %v4939_v5 = vpop.eup %4938  ;;  %v4782_v10 = vld [vmem:[#allocation6 + $0x98] sm:$0xff]  }
 0x74e   :  { %2760 = vst.msk [vmem:[#allocation2 + $0x28] sm:$0xff] %vm275_vm11, %v2756_v21  ;;  %v2764_v60 = vmul.f32 %v4933_v35, %v2756_v21  ;;  %3259 = vrot.lane.b32.xlu1 %v5917_v28, %s5103_s15  ;;  %3265 = vrot.lane.b32.xlu0 %v3238_v52, %s5103_s15  ;;  %v3233_v0 = vrot.slane %v5909_v19, 5  ;;  %v4941_v21 = vpop.eup %4940 }
 0x74f   :  { %v2767_v62 = vadd.f32 %v2763_v23, %v2701_v30  ;;  %v3240_v30 = vrot.slane %v5917_v28, 5  ;;  %4645 = vmatpush3.bf16.msra.mxu1 %v4782_v10 }
 0x750   :  { %v2768_v25 = vadd.f32 %v2764_v60, %v2702_v51  ;;  %v2378_v53 = vpop.permute.xlu1 %2377  ;;  %v2382_v14 = vpop.permute.xlu0 %2381  ;;  %v2642_v51 = vrot.slane %v2563_v29, %v5192_v33  ;;  %v2565_v60 = vcombine.high %v2561_v54, %v2561_v54  ;;  %4646 = vmatprep.subr.bf16.mxu1 %v6579_v6  ;;  %v2825_v10 = vld [vmem:[#allocation2 + $0x10] sm:$0xff] }
 0x751   :  { %2771 = vst.msk [vmem:[#allocation2 + $0x30] sm:$0xff] %vm275_vm11, %v2767_v62  ;;  %v2703_v15 = vmul.f32 %v2634_v7, %v2378_v53  ;;  %v2775_v37 = vmul.f32 %v4935_v34, %v2767_v62  ;;  %v2704_v16 = vmul.f32 %v2634_v7, %v2382_v14  ;;  %v4943_v34 = vpop.eup %4942 }
 0x752   :  { %2772 = vst.msk [vmem:[#allocation2 + $0x38] sm:$0xff] %vm275_vm11, %v2768_v25  ;;  %v2776_v36 = vmul.f32 %v4937_v43, %v2768_v25  ;;  %3251 = vrot.lane.b32.xlu1 %v3232_v24, %s5103_s15  ;;  %3267 = vrot.lane.b32.xlu0 %v3239_v8, %s5103_s15  ;;  %v3234_v25 = vrot.slane %v5909_v19, 6  ;;  %v4945_v53 = vpop.eup %4944 }
 0x753   :  { %v2779_v32 = vadd.f32 %v2775_v37, %v2703_v15  ;;  %v3241_v37 = vrot.slane %v5917_v28, 6 }
 0x754   :  { %v2780_v26 = vadd.f32 %v2776_v36, %v2704_v16  ;;  %v2390_v11 = vpop.permute.xlu1 %2389  ;;  %v2394_v35 = vpop.permute.xlu0 %2393  ;;  %v2646_v16 = vrot.slane %v2565_v60, %v5192_v33  ;;  %v4783_v36 = vld [vmem:[#allocation6 + $0x90] sm:$0xff]   ;;  %v2826_v60 = vld [vmem:[#allocation2 + $0x18] sm:$0xff] }
 0x755   :  { %2783 = vst.msk [vmem:[#allocation2 + $0x40] sm:$0xff] %vm275_vm11, %v2779_v32  ;;  %v2705_v56 = vmul.f32 %v2638_v2, %v2390_v11  ;;  %v2787_v45 = vmul.f32 %v4939_v5, %v2779_v32  ;;  %v2706_v23 = vmul.f32 %v2638_v2, %v2394_v35  ;;  %v3235_v5 = vrot.slane %v5909_v19, 7  ;;  %4647 = vmatpush3.bf16.msra.mxu1 %v4783_v36 }
 0x756   :  { %2784 = vst.msk [vmem:[#allocation2 + $0x48] sm:$0xff] %vm275_vm11, %v2780_v26  ;;  %v2788_v41 = vmul.f32 %v4941_v21, %v2780_v26  ;;  %3253 = vrot.lane.b32.xlu1 %v3233_v0, %s5103_s15  ;;  %3269 = vrot.lane.b32.xlu0 %v3240_v30, %s5103_s15 }
 0x757   :  { %v2791_v52 = vadd.f32 %v2787_v45, %v2705_v56  ;;  %v4947_v32 = vpop.eup %4946  ;;  %v3242_v56 = vrot.slane %v5917_v28, 7  ;;  %v4784_v45 = vld [vmem:[#allocation6 + $0x88] sm:$0xff]   ;;  %4648 = vmatprep.subr.bf16.mxu1 %v6579_v6 }
 0x758   :  { %v2792_v62 = vadd.f32 %v2788_v41, %v2706_v23  ;;  %v2402_v7 = vpop.permute.xlu1 %2401  ;;  %v2406_v15 = vpop.permute.xlu0 %2405 }
 0x759   :  { %2795 = vst.msk [vmem:[#allocation2 + $0x50] sm:$0xff] %vm275_vm11, %v2791_v52  ;;  %v2707_v24 = vmul.f32 %v2642_v51, %v2402_v7  ;;  %v2799_v43 = vmul.f32 %v4943_v34, %v2791_v52  ;;  %v2708_v14 = vmul.f32 %v2642_v51, %v2406_v15  ;;  %v4949_v26 = vpop.eup %4948  ;;  %v6195_v52 = vmul.f32 %v5949_v47, %v5926_v9  ;;  %v4785_v34 = vld [vmem:[#allocation6 + $0x80] sm:$0xff]  }
 0x75a   :  { %2796 = vst.msk [vmem:[#allocation2 + $0x58] sm:$0xff] %vm275_vm11, %v2792_v62  ;;  %v2800_v54 = vmul.f32 %v4945_v53, %v2792_v62  ;;  %3255 = vrot.lane.b32.xlu1 %v3234_v25, %s5103_s15  ;;  %3271 = vrot.lane.b32.xlu0 %v3241_v37, %s5103_s15  ;;  %v6201_v25 = vld [vmem:[#allocation8 + $0x68] ss:$0 sm:$0xff] }
 0x75b   :  { %v2803_v8 = vadd.f32 %v2799_v43, %v2707_v24  ;;  %4649 = vmatpush3.bf16.msra.mxu1 %v4784_v45  ;;  %v2827_v24 = vld [vmem:[#allocation2 + $0x20] sm:$0xff]  ;;  %v2573_v43 = vrot.slane %v6195_v52, %v5329_v42  ;;  %v2824_v45 = vld [vmem:[#allocation2 + $0x8] sm:$0xff] }
 0x75c   :  { %v2804_v2 = vadd.f32 %v2800_v54, %v2708_v14  ;;  %v2414_v29 = vpop.permute.xlu1 %2413  ;;  %v2418_v21 = vpop.permute.xlu0 %2417  ;;  %4650 = vmatprep.subr.bf16.mxu1 %v6579_v6  ;;  %v2828_v54 = vld [vmem:[#allocation2 + $0x28] sm:$0xff] }
 0x75d   :  { %2807 = vst.msk [vmem:[#allocation2 + $0x60] sm:$0xff] %vm275_vm11, %v2803_v8  ;;  %v2709_v11 = vmul.f32 %v2646_v16, %v2414_v29  ;;  %v2811_v0 = vmul.f32 %v4947_v32, %v2803_v8  ;;  %v2710_v35 = vmul.f32 %v2646_v16, %v2418_v21  ;;  %v6208_v16 = vmul.f32 %v6201_v25, %v5928_v44 }
 0x75e   :  { %2808 = vst.msk [vmem:[#allocation2 + $0x68] sm:$0xff] %vm275_vm11, %v2804_v2  ;;  %v2812_v30 = vmul.f32 %v4949_v26, %v2804_v2  ;;  %3257 = vrot.lane.b32.xlu1 %v3235_v5, %s5103_s15  ;;  %3273 = vrot.lane.b32.xlu0 %v3242_v56, %s5103_s15  ;;  %v2823_v5 = vld [vmem:[#allocation2] sm:$0xff]  ;;  %v2581_v26 = vcombine.high %v2573_v43, %v2573_v43 }
 0x75f   :  { %v2815_v23 = vadd.f32 %v2811_v0, %v2709_v11  ;;  %4651 = vmatpush3.bf16.msra.mxu1 %v4785_v34  ;;  %v3167_v44 = vrot.slane %v6208_v16, 1  ;;  %v2829_v34 = vld [vmem:[#allocation2 + $0x30] sm:$0xff] }
 0x760   :  { %v2816_v19 = vadd.f32 %v2812_v30, %v2710_v35  ;;  %v2866_v41 = vpop.permute.xlu1 %2865  ;;  %v2870_v51 = vpop.permute.xlu0 %2869  ;;  %v2293_v30 = vmul.f32 1.442695, %v5970_v39 }
 0x761   :  { %2819 = vst.msk [vmem:[#allocation2 + $0x70] sm:$0xff] %vm275_vm11, %v2815_v23  ;;  %v2985_v28 = vmul.f32 %v2866_v41, %v2825_v10  ;;  %v2986_v62 = vmul.f32 %v2870_v51, %v2826_v60  ;;  %v6214_v23 = vrot.slane %v2573_v43, %v5329_v42 }
 0x762   :  { %2820 = vst.msk [vmem:[#allocation2 + $0x78] sm:$0xff] %vm275_vm11, %v2816_v19  ;;  %4950 = vpow2.f32 %v2293_v30  ;;  %v2832_v30 = vld [vmem:[#allocation2 + $0x48] sm:$0xff] }
 0x763   :  { %v3024_v7 = vsel %vm275_vm11, %v2985_v28, 0.0  ;;  %v3025_v53 = vsel %vm275_vm11, %v2986_v62, 0.0  ;;  %v3168_v28 = vrot.slane %v6208_v16, 2  ;;  %v2291_v62 = vmul.f32 1.442695, %v5973_v48 }
 0x764   :  { %v2874_v47 = vpop.permute.xlu1 %2873  ;;  %v3026_v15 = vadd.f32 %v3025_v53, %v3024_v7  ;;  %v2878_v14 = vpop.permute.xlu0 %2877  ;;  %v6222_v7 = vrot.slane %v2581_v26, %v5329_v42  ;;  %v2611_v26 = vcombine.high %v6214_v23, %v6214_v23 }
 0x765   :  { %v2987_v37 = vmul.f32 %v2874_v47, %v2827_v24  ;;  %v2988_v8 = vmul.f32 %v2878_v14, %v2828_v54  ;;  %v6227_v54 = vrot.slane %v6214_v23, %v5192_v33  ;;  %4952 = vpow2.f32 %v2291_v62 }
 0x766   :  { %v3027_v36 = vrot.slane %v3026_v15, 4  ;;  %v2317_v23 = vmul.f32 1.442695, %v6045_v13 }
 0x767   :  { %v3033_v32 = vsel %vm275_vm11, %v2987_v37, 0.0  ;;  %v3034_v2 = vsel %vm275_vm11, %v2988_v8, 0.0  ;;  %v3169_v37 = vrot.slane %v6208_v16, 3 }
 0x768   :  { %v2858_v29 = vpop.permute.xlu1 %2857  ;;  %v3028_v11 = vadd.f32 %v3027_v36, %v3026_v15  ;;  %v3035_v0 = vadd.f32 %v3034_v2, %v3033_v32  ;;  %v2862_v56 = vpop.permute.xlu0 %2861  ;;  %v2830_v15 = vld [vmem:[#allocation2 + $0x38] sm:$0xff] }
 0x769   :  { %v2983_v21 = vmul.f32 %v2858_v29, %v2823_v5  ;;  %v2984_v35 = vmul.f32 %v2862_v56, %v2824_v45  ;;  %v6233_v5 = vrot.slane %v6222_v7, %v5192_v33  ;;  %v2831_v45 = vld [vmem:[#allocation2 + $0x40] sm:$0xff] }
 0x76a   :  { %v3029_v19 = vrot.slane %v3028_v11, 2  ;;  %v3036_v41 = vrot.slane %v3035_v0, 4 }
 0x76b   :  { %v3015_v10 = vsel %vm275_vm11, %v2983_v21, 0.0  ;;  %v3016_v51 = vsel %vm275_vm11, %v2984_v35, 0.0 }
 0x76c   :  { %v2882_v60 = vpop.permute.xlu1 %2881  ;;  %v3030_v39 = vadd.f32 %v3029_v19, %v3028_v11  ;;  %v3037_v53 = vadd.f32 %v3036_v41, %v3035_v0  ;;  %v3017_v47 = vadd.f32 %v3016_v51, %v3015_v10  ;;  %v2886_v43 = vpop.permute.xlu0 %2885  ;;  %v2297_v10 = vmul.f32 1.442695, %v5995_v38 }
 0x76d   :  { %v2989_v24 = vmul.f32 %v2882_v60, %v2829_v34  ;;  %v2990_v14 = vmul.f32 %v2886_v43, %v2830_v15  ;;  %v2301_v51 = vmul.f32 1.442695, %v5987_v17  ;;  %v2299_v15 = vmul.f32 1.442695, %v5990_v22 }
 0x76e   :  { %v3031_v8 = vrot.slane %v3030_v39, 1  ;;  %v3038_v36 = vrot.slane %v3037_v53, 2  ;;  %v3018_v48 = vrot.slane %v3017_v47, 4 }
 0x76f   :  { %v3042_v32 = vsel %vm275_vm11, %v2989_v24, 0.0  ;;  %v3043_v2 = vsel %vm275_vm11, %v2990_v14, 0.0  ;;  %4954 = vpow2.f32 %v2301_v51 }
 0x770   :  { %v2890_v29 = vpop.permute.xlu1 %2889  ;;  %v3032_v11 = vadd.f32 %v3031_v8, %v3030_v39  ;;  %v3039_v0 = vadd.f32 %v3038_v36, %v3037_v53  ;;  %v3019_v21 = vadd.f32 %v3018_v48, %v3017_v47  ;;  %v3044_v56 = vadd.f32 %v3043_v2, %v3042_v32  ;;  %v2894_v35 = vpop.permute.xlu0 %2893  ;;  %v2833_v48 = vld [vmem:[#allocation2 + $0x50] sm:$0xff] }
 0x771   :  { %v2991_v19 = vmul.f32 %v2890_v29, %v2831_v45  ;;  %v2992_v41 = vmul.f32 %v2894_v35, %v2832_v30  ;;  %v2295_v47 = vmul.f32 1.442695, %v5998_v31  ;;  %4956 = vpow2.f32 %v2297_v10 }
 0x772   :  { %v3198_v60 = vadd.f32 %v3167_v44, %v3032_v11  ;;  %v3040_v34 = vrot.slane %v3039_v0, 1  ;;  %v3020_v62 = vrot.slane %v3019_v21, 2  ;;  %v3045_v24 = vrot.slane %v3044_v56, 4  ;;  %v2834_v44 = vld [vmem:[#allocation2 + $0x58] sm:$0xff] }
 0x773   :  { %v3051_v43 = vsel %vm275_vm11, %v2991_v19, 0.0  ;;  %v3052_v39 = vsel %vm275_vm11, %v2992_v41, 0.0  ;;  %4958 = vpow2.f32 %v2295_v47  ;;  %v2835_v41 = vld [vmem:[#allocation2 + $0x60] sm:$0xff]  ;;  %v2303_v47 = vmul.f32 1.442695, %v6011_v27 }
 0x774   :  { %v2898_v53 = vpop.permute.xlu1 %2897  ;;  %v3292_v14 = vmul.f32 %v6095_v50, %v3198_v60  ;;  %v3041_v8 = vadd.f32 %v3040_v34, %v3039_v0  ;;  %v3021_v36 = vadd.f32 %v3020_v62, %v3019_v21  ;;  %v3046_v38 = vadd.f32 %v3045_v24, %v3044_v56  ;;  %v2902_v17 = vpop.permute.xlu0 %2901 }
 0x775   :  { %v6244_v32 = vadd.f32 %v3052_v39, %v3051_v43  ;;  %v2993_v2 = vmul.f32 %v2898_v53, %v2833_v48  ;;  %v2994_v29 = vmul.f32 %v2902_v17, %v2834_v44  ;;  %v2566_v0 = vcombine.high %v6195_v52, %v6195_v52  ;;  %v4951_v24 = vpop.eup %4950 }
 0x776   :  { %v3199_v11 = vadd.f32 %v3168_v28, %v3041_v8  ;;  %v3022_v45 = vrot.slane %v3021_v36, 1  ;;  %v3047_v35 = vrot.slane %v3046_v38, 2  ;;  %v3308_v21 = vpack.c.bf16 %v3292_v14, %v3292_v14  ;;  %v2836_v28 = vld [vmem:[#allocation2 + $0x68] sm:$0xff] }
 0x777   :  { %v3060_v31 = vsel %vm275_vm11, %v2993_v2, 0.0  ;;  %v3061_v22 = vsel %vm275_vm11, %v2994_v29, 0.0  ;;  %v2305_v62 = vmul.f32 1.442695, %v6008_v46  ;;  %4960 = vpow2.f32 %v2299_v15  ;;  %v2837_v2 = vld [vmem:[#allocation2 + $0x70] sm:$0xff] }
 0x778   :  { %v2906_v50 = vpop.permute.xlu1 %2905  ;;  %v3293_v56 = vmul.f32 %v6112_v63, %v3199_v11  ;;  %v3023_v30 = vadd.f32 %v3022_v45, %v3021_v36  ;;  %v3048_v19 = vadd.f32 %v3047_v35, %v3046_v38  ;;  %v2910_v51 = vpop.permute.xlu0 %2909  ;;  %v6251_v60 = vadd.f32 %v3061_v22, %v3060_v31  ;;  %v2838_v11 = vld [vmem:[#allocation2 + $0x78] sm:$0xff] }
 0x779   :  { %v2995_v10 = vmul.f32 %v2906_v50, %v2835_v41  ;;  %v2996_v34 = vmul.f32 %v2910_v51, %v2836_v28  ;;  %v2309_v36 = vmul.f32 1.442695, %v6024_v57  ;;  %v4953_v38 = vpop.eup %4952  ;;  %v3340_v48 = vunpack.c.l.b16 %v3308_v21 }
 0x77a   :  { %v3309_v43 = vpack.c.bf16 %v3293_v56, %v3293_v56  ;;  %v3197_v39 = vadd.f32 %v6208_v16, %v3023_v30  ;;  %v3049_v53 = vrot.slane %v3048_v19, 1  ;;  %4962 = vpow2.f32 %v2305_v62 }
 0x77b   :  { %v3069_v63 = vsel %vm275_vm11, %v2995_v10, 0.0  ;;  %v3070_v14 = vsel %vm275_vm11, %v2996_v34, 0.0  ;;  %4964 = vpow2.f32 %v2303_v47  ;;  %v2307_v57 = vmul.f32 1.442695, %v6027_v20 }
 0x77c   :  { %v2914_v8 = vpop.permute.xlu1 %2913  ;;  %v3291_v17 = vmul.f32 %v6082_v55, %v3197_v39  ;;  %v3050_v46 = vadd.f32 %v3049_v53, %v3048_v19  ;;  %v6260_v44 = vadd.f32 %v3070_v14, %v3069_v63  ;;  %v2918_v29 = vpop.permute.xlu0 %2917  ;;  %v3341_v45 = vunpack.c.l.b16 %v3309_v43 }
 0x77d   :  { %v2997_v27 = vmul.f32 %v2914_v8, %v2837_v2  ;;  %v2998_v35 = vmul.f32 %v2918_v29, %v2838_v11  ;;  %v2730_v50 = vmul.f32 0.0, %v4951_v24  ;;  %4966 = vpow2.f32 %v2309_v36  ;;  %v4955_v34 = vpop.eup %4954 }
 0x77e   :  { %v3307_v31 = vpack.c.bf16 %v3291_v17, %v3291_v17  ;;  %v3200_v15 = vadd.f32 %v3169_v37, %v3050_v46  ;;  %v3355_v56 = vrot.slane %v3340_v48, 7  ;;  %v3357_v28 = vrot.slane %v3341_v45, 6  ;;  %v4957_v39 = vpop.eup %4956 }
 0x77f   :  { %v3078_v22 = vsel %vm275_vm11, %v2997_v27, 0.0  ;;  %v3079_v55 = vsel %vm275_vm11, %v2998_v35, 0.0  ;;  %v2729_v20 = vmul.f32 0.0, %v4953_v38  ;;  %4968 = vpow2.f32 %v2307_v57 }
 0x780   :  { %v2426_v21 = vpop.permute.xlu1 %2425  ;;  %v3339_v30 = vunpack.c.l.b16 %v3307_v31  ;;  %v3294_v19 = vmul.f32 %v6084_v59, %v3200_v15  ;;  %v6268_v41 = vadd.f32 %v3079_v55, %v3078_v22  ;;  %v2430_v51 = vpop.permute.xlu0 %2429  ;;  %v2313_v24 = vmul.f32 1.442695, %v6039_v1 }
 0x781   :  { %v2712_v37 = vmul.f32 %v6227_v54, %v2430_v51  ;;  %v2711_v10 = vmul.f32 %v6227_v54, %v2426_v21  ;;  %v2311_v63 = vmul.f32 1.442695, %v6042_v49  ;;  %v4959_v8 = vpop.eup %4958  ;;  %v2658_v38 = vrot.slane %v2611_v26, %v5192_v33 }
 0x782   :  { %v3310_v62 = vpack.c.bf16 %v3294_v19, %v3294_v19  ;;  %v3356_v43 = vsel %vm6592_vm4, %v3355_v56, %v3339_v30  ;;  %v2613_v46 = vcombine.high %v6222_v7, %v6222_v7  ;;  %v2580_v2 = vrot.slane %v2566_v0, %v5329_v42 }
 0x783   :  { %v2734_v53 = vadd.f32 %v2730_v50, %v2712_v37  ;;  %v2733_v47 = vadd.f32 %v2729_v20, %v2711_v10  ;;  %v3358_v14 = vsel %vm1671_vm13, %v3357_v28, %v3356_v43  ;;  %4970 = vpow2.f32 %v2313_v24 }
 0x784   :  { %v2438_v59 = vpop.permute.xlu1 %2437  ;;  %v2442_v36 = vpop.permute.xlu0 %2441  ;;  %v3342_v1 = vunpack.c.l.b16 %v3310_v62  ;;  %4972 = vpow2.f32 %v2311_v63  ;;  %v2662_v15 = vrot.slane %v2613_v46, %v5192_v33  ;;  %v2596_v22 = vrot.slane %v2580_v2, %v5329_v42 }
 0x785   :  { %v2713_v54 = vmul.f32 %v6233_v5, %v2438_v59  ;;  %2738 = vst.msk [vmem:[#allocation2 + $0x88] sm:$0xff] %vm275_vm11, %v2734_v53  ;;  %2737 = vst.msk [vmem:[#allocation2 + $0x80] sm:$0xff] %vm275_vm11, %v2733_v47  ;;  %v2714_v48 = vmul.f32 %v6233_v5, %v2442_v36  ;;  %v2742_v17 = vmul.f32 %v4957_v39, %v2734_v53  ;;  %v2315_v5 = vmul.f32 1.442695, %v6048_v3  ;;  %v4961_v27 = vpop.eup %4960 }
 0x786   :  { %v2741_v49 = vmul.f32 %v4959_v8, %v2733_v47  ;;  %v3359_v26 = vrot.slane %v3342_v1, 5  ;;  %v2582_v55 = vcombine.high %v2580_v2, %v2580_v2  ;;  %4974 = vpow2.f32 %v2317_v23 }
 0x787   :  { %v2746_v29 = vadd.f32 %v2742_v17, %v2714_v48  ;;  %v4963_v57 = vpop.eup %4962  ;;  %v2321_v3 = vmul.f32 1.442695, %v6059_v4  ;;  %4976 = vpow2.f32 %v2315_v5  ;;  %v2319_v19 = vmul.f32 1.442695, %v6062_v12 }
 0x788   :  { %v2745_v11 = vadd.f32 %v2741_v49, %v2713_v54  ;;  %v2450_v45 = vpop.permute.xlu1 %2449  ;;  %v2454_v35 = vpop.permute.xlu0 %2453  ;;  %v6293_v7 = vsel %vm1674_vm14, %v3359_v26, %v3358_v14  ;;  %v2666_v62 = vrot.slane %v2596_v22, %v5192_v33  ;;  %v2610_v4 = vrot.slane %v2582_v55, %v5329_v42 }
 0x789   :  { %v2715_v31 = vmul.f32 %v2658_v38, %v2450_v45  ;;  %2750 = vst.msk [vmem:[#allocation2 + $0x98] sm:$0xff] %vm275_vm11, %v2746_v29  ;;  %v2716_v52 = vmul.f32 %v2658_v38, %v2454_v35  ;;  %v2754_v0 = vmul.f32 %v4955_v34, %v2746_v29  ;;  %v4965_v50 = vpop.eup %4964  ;;  %4978 = vpow2.f32 %v2321_v3 }
 0x78a   :  { %2749 = vst.msk [vmem:[#allocation2 + $0x90] sm:$0xff] %vm275_vm11, %v2745_v11  ;;  %v2753_v13 = vmul.f32 %v4961_v27, %v2745_v11  ;;  %v4967_v51 = vpop.eup %4966  ;;  %4980 = vpow2.f32 %v2319_v19  ;;  %v2670_v8 = vrot.slane %v2610_v4, %v5192_v33  ;;  %v2612_v36 = vcombine.high %v2596_v22, %v2596_v22 }
 0x78b   :  { %v2758_v21 = vadd.f32 %v2754_v0, %v2716_v52  ;;  %v2614_v29 = vcombine.high %v2610_v4, %v2610_v4 }
 0x78c   :  { %v2757_v56 = vadd.f32 %v2753_v13, %v2715_v31  ;;  %v2462_v30 = vpop.permute.xlu1 %2461  ;;  %v2466_v28 = vpop.permute.xlu0 %2465  ;;  %v2674_v26 = vrot.slane %v2612_v36, %v5192_v33 }
 0x78d   :  { %v2717_v37 = vmul.f32 %v2662_v15, %v2462_v30  ;;  %2762 = vst.msk [vmem:[#allocation2 + $0xa8] sm:$0xff] %vm275_vm11, %v2758_v21  ;;  %v2718_v10 = vmul.f32 %v2662_v15, %v2466_v28  ;;  %v2766_v20 = vmul.f32 %v4963_v57, %v2758_v21  ;;  %v4969_v24 = vpop.eup %4968  ;;  %v2678_v57 = vrot.slane %v2614_v29, %v5192_v33 }
 0x78e   :  { %2761 = vst.msk [vmem:[#allocation2 + $0xa0] sm:$0xff] %vm275_vm11, %v2757_v56  ;;  %v2765_v34 = vmul.f32 %v4965_v50, %v2757_v56 }
 0x78f   :  { %v2770_v43 = vadd.f32 %v2766_v20, %v2718_v10 }
 0x790   :  { %v2769_v39 = vadd.f32 %v2765_v34, %v2717_v37  ;;  %v2474_v53 = vpop.permute.xlu1 %2473  ;;  %v2478_v12 = vpop.permute.xlu0 %2477  ;;  %v2842_v33 = vld [vmem:[#allocation2 + $0x98] sm:$0xff] }
 0x791   :  { %v2719_v47 = vmul.f32 %v2666_v62, %v2474_v53  ;;  %2774 = vst.msk [vmem:[#allocation2 + $0xb8] sm:$0xff] %vm275_vm11, %v2770_v43  ;;  %v2720_v59 = vmul.f32 %v2666_v62, %v2478_v12  ;;  %v2778_v63 = vmul.f32 %v4967_v51, %v2770_v43  ;;  %v4971_v54 = vpop.eup %4970  ;;  %v2841_v34 = vld [vmem:[#allocation2 + $0x90] sm:$0xff]  ;;  %v3054_v43 = vrot.slane %v6244_v32, 4 }
 0x792   :  { %2773 = vst.msk [vmem:[#allocation2 + $0xb0] sm:$0xff] %vm275_vm11, %v2769_v39  ;;  %v2777_v14 = vmul.f32 %v4969_v24, %v2769_v39  ;;  %v4973_v48 = vpop.eup %4972 }
 0x793   :  { %v2782_v42 = vadd.f32 %v2778_v63, %v2720_v59  ;;  %v4975_v11 = vpop.eup %4974 }
 0x794   :  { %v2781_v38 = vadd.f32 %v2777_v14, %v2719_v47  ;;  %v2486_v1 = vpop.permute.xlu1 %2485  ;;  %v2490_v17 = vpop.permute.xlu0 %2489  ;;  %v2844_v14 = vld [vmem:[#allocation2 + $0xa8] sm:$0xff] }
 0x795   :  { %v2721_v49 = vmul.f32 %v2670_v8, %v2486_v1  ;;  %2786 = vst.msk [vmem:[#allocation2 + $0xc8] sm:$0xff] %vm275_vm11, %v2782_v42  ;;  %v2722_v46 = vmul.f32 %v2670_v8, %v2490_v17  ;;  %v2790_v2 = vmul.f32 %v4971_v54, %v2782_v42  ;;  %v4977_v35 = vpop.eup %4976  ;;  %v2843_v47 = vld [vmem:[#allocation2 + $0xa0] sm:$0xff]  ;;  %v6323_v54 = vmul.f32 %v6201_v25, %v5926_v9 }
 0x796   :  { %2785 = vst.msk [vmem:[#allocation2 + $0xc0] sm:$0xff] %vm275_vm11, %v2781_v38  ;;  %v2789_v23 = vmul.f32 %v4973_v48, %v2781_v38  ;;  %v4979_v22 = vpop.eup %4978  ;;  %v3055_v42 = vadd.f32 %v3054_v43, %v6244_v32 }
 0x797   :  { %v2794_v45 = vadd.f32 %v2790_v2, %v2722_v46  ;;  %v4981_v21 = vpop.eup %4980  ;;  %v3174_v9 = vrot.slane %v6323_v54, 1 }
 0x798   :  { %v2793_v5 = vadd.f32 %v2789_v23, %v2721_v49  ;;  %v2498_v27 = vpop.permute.xlu1 %2497  ;;  %v2502_v31 = vpop.permute.xlu0 %2501  ;;  %v2839_v49 = vld [vmem:[#allocation2 + $0x80] sm:$0xff] }
 0x799   :  { %v2723_v52 = vmul.f32 %v2674_v26, %v2498_v27  ;;  %2798 = vst.msk [vmem:[#allocation2 + $0xd8] sm:$0xff] %vm275_vm11, %v2794_v45  ;;  %v2724_v0 = vmul.f32 %v2674_v26, %v2502_v31  ;;  %v2802_v13 = vmul.f32 %v4975_v11, %v2794_v45  ;;  %v2840_v26 = vld [vmem:[#allocation2 + $0x88] sm:$0xff]  ;;  %v3063_v11 = vrot.slane %v6251_v60, 4 }
 0x79a   :  { %2797 = vst.msk [vmem:[#allocation2 + $0xd0] sm:$0xff] %vm275_vm11, %v2793_v5  ;;  %v2801_v15 = vmul.f32 %v4977_v35, %v2793_v5  ;;  %v3056_v5 = vrot.slane %v3055_v42, 2  ;;  %v3175_v27 = vrot.slane %v6323_v54, 2 }
 0x79b   :  { %v2806_v55 = vadd.f32 %v2802_v13, %v2724_v0  ;;  %v3176_v0 = vrot.slane %v6323_v54, 3  ;;  %v3177_v13 = vrot.slane %v6323_v54, 4 }
 0x79c   :  { %v2805_v3 = vadd.f32 %v2801_v15, %v2723_v52  ;;  %v2510_v50 = vpop.permute.xlu1 %2509  ;;  %v2514_v56 = vpop.permute.xlu0 %2513  ;;  %v2845_v52 = vld [vmem:[#allocation2 + $0xb0] sm:$0xff] }
 0x79d   :  { %v2725_v30 = vmul.f32 %v2678_v57, %v2510_v50  ;;  %2810 = vst.msk [vmem:[#allocation2 + $0xe8] sm:$0xff] %vm275_vm11, %v2806_v55  ;;  %v2726_v19 = vmul.f32 %v2678_v57, %v2514_v56  ;;  %v2814_v51 = vmul.f32 %v4979_v22, %v2806_v55 }
 0x79e   :  { %2809 = vst.msk [vmem:[#allocation2 + $0xe0] sm:$0xff] %vm275_vm11, %v2805_v3  ;;  %v2813_v28 = vmul.f32 %v4981_v21, %v2805_v3  ;;  %v2846_v3 = vld [vmem:[#allocation2 + $0xb8] sm:$0xff]  ;;  %v3064_v21 = vadd.f32 %v3063_v11, %v6251_v60 }
 0x79f   :  { %v2818_v37 = vadd.f32 %v2814_v51, %v2726_v19  ;;  %v3178_v19 = vrot.slane %v6323_v54, 5  ;;  %v3072_v51 = vrot.slane %v6260_v44, 4 }
 0x7a0   :  { %v2817_v10 = vadd.f32 %v2813_v28, %v2725_v30  ;;  %v2930_v20 = vpop.permute.xlu1 %2929  ;;  %v2934_v62 = vpop.permute.xlu0 %2933  ;;  %v3170_v30 = vrot.slane %v6208_v16, 4 }
 0x7a1   :  { %v3001_v4 = vmul.f32 %v2930_v20, %v2841_v34  ;;  %2822 = vst.msk [vmem:[#allocation2 + $0xf8] sm:$0xff] %vm275_vm11, %v2818_v37  ;;  %v3002_v24 = vmul.f32 %v2934_v62, %v2842_v33  ;;  %v3171_v33 = vrot.slane %v6208_v16, 5 }
 0x7a2   :  { %2821 = vst.msk [vmem:[#allocation2 + $0xf0] sm:$0xff] %vm275_vm11, %v2817_v10  ;;  %v3057_v10 = vadd.f32 %v3056_v5, %v3055_v42  ;;  %v2850_v5 = vld [vmem:[#allocation2 + $0xd8] sm:$0xff] }
 0x7a3   :  { %v3096_v39 = vsel %vm275_vm11, %v3001_v4, 0.0  ;;  %v3097_v53 = vsel %vm275_vm11, %v3002_v24, 0.0  ;;  %v3179_v4 = vrot.slane %v6323_v54, 6 }
 0x7a4   :  { %v2938_v12 = vpop.permute.xlu1 %2937  ;;  %v3098_v59 = vadd.f32 %v3097_v53, %v3096_v39  ;;  %v2942_v63 = vpop.permute.xlu0 %2941  ;;  %v2848_v53 = vld [vmem:[#allocation2 + $0xc8] sm:$0xff] }
 0x7a5   :  { %v3003_v8 = vmul.f32 %v2938_v12, %v2843_v47  ;;  %v3004_v36 = vmul.f32 %v2942_v63, %v2844_v14  ;;  %v2847_v12 = vld [vmem:[#allocation2 + $0xc0] sm:$0xff]  ;;  %v3172_v47 = vrot.slane %v6208_v16, 6 }
 0x7a6   :  { %v3099_v38 = vrot.slane %v3098_v59, 4 }
 0x7a7   :  { %v3105_v1 = vsel %vm275_vm11, %v3003_v8, 0.0  ;;  %v3106_v48 = vsel %vm275_vm11, %v3004_v36, 0.0  ;;  %v3180_v8 = vrot.slane %v6323_v54, 7  ;;  %v3073_v36 = vadd.f32 %v3072_v51, %v6260_v44  ;;  %v2851_v51 = vld [vmem:[#allocation2 + $0xe0] sm:$0xff] }
 0x7a8   :  { %v2922_v17 = vpop.permute.xlu1 %2921  ;;  %v3100_v46 = vadd.f32 %v3099_v38, %v3098_v59  ;;  %v3107_v2 = vadd.f32 %v3106_v48, %v3105_v1  ;;  %v2926_v23 = vpop.permute.xlu0 %2925  ;;  %v3065_v59 = vrot.slane %v3064_v21, 2  ;;  %v3058_v1 = vrot.slane %v3057_v10, 1 }
 0x7a9   :  { %v2999_v29 = vmul.f32 %v2922_v17, %v2839_v49  ;;  %v3000_v45 = vmul.f32 %v2926_v23, %v2840_v26  ;;  %v3081_v48 = vrot.slane %v6268_v41, 4  ;;  %v2849_v23 = vld [vmem:[#allocation2 + $0xd0] sm:$0xff] }
 0x7aa   :  { %v3108_v25 = vrot.slane %v3107_v2, 4  ;;  %v3101_v15 = vrot.slane %v3100_v46, 2 }
 0x7ab   :  { %v3087_v32 = vsel %vm275_vm11, %v2999_v29, 0.0  ;;  %v3088_v35 = vsel %vm275_vm11, %v3000_v45, 0.0 }
 0x7ac   :  { %v2946_v31 = vpop.permute.xlu1 %2945  ;;  %v3109_v57 = vadd.f32 %v3108_v25, %v3107_v2  ;;  %v3089_v22 = vadd.f32 %v3088_v35, %v3087_v32  ;;  %v2950_v55 = vpop.permute.xlu0 %2949  ;;  %v3102_v60 = vadd.f32 %v3101_v15, %v3100_v46  ;;  %v3066_v35 = vadd.f32 %v3065_v59, %v3064_v21  ;;  %v2852_v21 = vld [vmem:[#allocation2 + $0xe8] sm:$0xff] }
 0x7ad   :  { %v3005_v50 = vmul.f32 %v2946_v31, %v2845_v52  ;;  %v3006_v56 = vmul.f32 %v2950_v55, %v2846_v3  ;;  %v3173_v31 = vrot.slane %v6208_v16, 7  ;;  %v3074_v52 = vrot.slane %v3073_v36, 2 }
 0x7ae   :  { %v3090_v28 = vrot.slane %v3089_v22, 4  ;;  %v3110_v20 = vrot.slane %v3109_v57, 2  ;;  %v3103_v26 = vrot.slane %v3102_v60, 1  ;;  %v3082_v55 = vadd.f32 %v3081_v48, %v6268_v41 }
 0x7af   :  { %v3114_v37 = vsel %vm275_vm11, %v3005_v50, 0.0  ;;  %v3115_v34 = vsel %vm275_vm11, %v3006_v56, 0.0 }
 0x7b0   :  { %v2954_v62 = vpop.permute.xlu1 %2953  ;;  %v3091_v24 = vadd.f32 %v3090_v28, %v3089_v22  ;;  %v3116_v43 = vadd.f32 %v3115_v34, %v3114_v37  ;;  %v2958_v39 = vpop.permute.xlu0 %2957  ;;  %v3111_v17 = vadd.f32 %v3110_v20, %v3109_v57  ;;  %v3059_v28 = vadd.f32 %v3058_v1, %v3057_v10 }
 0x7b1   :  { %v3008_v63 = vmul.f32 %v2958_v39, %v2848_v53  ;;  %v3007_v14 = vmul.f32 %v2954_v62, %v2847_v12  ;;  %v3104_v37 = vadd.f32 %v3103_v26, %v3102_v60  ;;  %v3067_v12 = vrot.slane %v3066_v35, 1  ;;  %v2853_v60 = vld [vmem:[#allocation2 + $0xf0] sm:$0xff]  ;;  %v2854_v26 = vld [vmem:[#allocation2 + $0xf8] sm:$0xff] }
 0x7b2   :  { %v3092_v42 = vrot.slane %v3091_v24, 2  ;;  %v3117_v38 = vrot.slane %v3116_v43, 4  ;;  %v3112_v3 = vrot.slane %v3111_v17, 1 }
 0x7b3   :  { %v3124_v49 = vsel %vm275_vm11, %v3008_v63, 0.0  ;;  %v3123_v46 = vsel %vm275_vm11, %v3007_v14, 0.0  ;;  %v3075_v14 = vadd.f32 %v3074_v52, %v3073_v36  ;;  %v3068_v52 = vadd.f32 %v3067_v12, %v3066_v35 }
 0x7b4   :  { %v2962_v2 = vpop.permute.xlu1 %2961  ;;  %v3118_v29 = vadd.f32 %v3117_v38, %v3116_v43  ;;  %v3125_v11 = vadd.f32 %v3124_v49, %v3123_v46  ;;  %v2966_v45 = vpop.permute.xlu0 %2965  ;;  %v3093_v44 = vadd.f32 %v3092_v42, %v3091_v24  ;;  %v3083_v42 = vrot.slane %v3082_v55, 2 }
 0x7b5   :  { %v3009_v25 = vmul.f32 %v2962_v2, %v2849_v23  ;;  %v3010_v32 = vmul.f32 %v2966_v45, %v2850_v5  ;;  %v3113_v38 = vadd.f32 %v3112_v3, %v3111_v17  ;;  %v3206_v49 = vadd.f32 %v3174_v9, %v3104_v37 }
 0x7b6   :  { %v3119_v15 = vrot.slane %v3118_v29, 2  ;;  %v3126_v57 = vrot.slane %v3125_v11, 4  ;;  %v3094_v53 = vrot.slane %v3093_v44, 1  ;;  %v3076_v3 = vrot.slane %v3075_v14, 1 }
 0x7b7   :  { %v3132_v22 = vsel %vm275_vm11, %v3009_v25, 0.0  ;;  %v3133_v50 = vsel %vm275_vm11, %v3010_v32, 0.0  ;;  %v3300_v35 = vmul.f32 %v6097_v40, %v3206_v49 }
 0x7b8   :  { %v2970_v56 = vpop.permute.xlu1 %2969  ;;  %v3127_v20 = vadd.f32 %v3126_v57, %v3125_v11  ;;  %v3134_v34 = vadd.f32 %v3133_v50, %v3132_v22  ;;  %v2974_v62 = vpop.permute.xlu0 %2973  ;;  %v3120_v39 = vadd.f32 %v3119_v15, %v3118_v29  ;;  %v3095_v5 = vadd.f32 %v3094_v53, %v3093_v44 }
 0x7b9   :  { %v3011_v24 = vmul.f32 %v2970_v56, %v2851_v51  ;;  %v3012_v43 = vmul.f32 %v2974_v62, %v2852_v21  ;;  %v3207_v15 = vadd.f32 %v3175_v27, %v3113_v38 }
 0x7ba   :  { %v3128_v59 = vrot.slane %v3127_v20, 2  ;;  %v3135_v63 = vrot.slane %v3134_v34, 4  ;;  %v3121_v1 = vrot.slane %v3120_v39, 1 }
 0x7bb   :  { %v3141_v41 = vsel %vm275_vm11, %v3011_v24, 0.0  ;;  %v3142_v48 = vsel %vm275_vm11, %v3012_v43, 0.0  ;;  %v3201_v24 = vadd.f32 %v3170_v30, %v3059_v28 }
 0x7bc   :  { %v2978_v10 = vpop.permute.xlu1 %2977  ;;  %v3136_v46 = vadd.f32 %v3135_v63, %v3134_v34  ;;  %v3143_v2 = vadd.f32 %v3142_v48, %v3141_v41  ;;  %v2982_v23 = vpop.permute.xlu0 %2981  ;;  %v3122_v45 = vadd.f32 %v3121_v1, %v3120_v39  ;;  %v3129_v25 = vadd.f32 %v3128_v59, %v3127_v20 }
 0x7bd   :  { %v3013_v29 = vmul.f32 %v2978_v10, %v2853_v60  ;;  %v3014_v11 = vmul.f32 %v2982_v23, %v2854_v26  ;;  %v3084_v34 = vadd.f32 %v3083_v42, %v3082_v55  ;;  %v3205_v20 = vadd.f32 %v6323_v54, %v3095_v5 }
 0x7be   :  { %v3137_v36 = vrot.slane %v3136_v46, 2  ;;  %v3144_v32 = vrot.slane %v3143_v2, 4  ;;  %v3130_v22 = vrot.slane %v3129_v25, 1  ;;  %v3208_v44 = vadd.f32 %v3176_v0, %v3122_v45 }
 0x7bf   :  { %v3150_v17 = vsel %vm275_vm11, %v3013_v29, 0.0  ;;  %v3151_v57 = vsel %vm275_vm11, %v3014_v11, 0.0  ;;  %v3301_v39 = vmul.f32 %v6114_v58, %v3207_v15  ;;  %v3077_v59 = vadd.f32 %v3076_v3, %v3075_v14 }
 0x7c0   :  { %v3260_v9 = vpop.permute.xlu1 %3259  ;;  %v3145_v50 = vadd.f32 %v3144_v32, %v3143_v2  ;;  %v3152_v56 = vadd.f32 %v3151_v57, %v3150_v17  ;;  %v3266_v51 = vpop.permute.xlu0 %3265  ;;  %v3138_v37 = vadd.f32 %v3137_v36, %v3136_v46  ;;  %v3131_v62 = vadd.f32 %v3130_v22, %v3129_v25 }
 0x7c1   :  { %v3299_v53 = vmul.f32 %v3260_v9, %v3205_v20  ;;  %v3085_v40 = vrot.slane %v3084_v34, 1  ;;  %v3302_v38 = vmul.f32 %v3266_v51, %v3208_v44  ;;  %v3316_v48 = vpack.c.bf16 %v3300_v35, %v3300_v35 }
 0x7c2   :  { %v3146_v21 = vrot.slane %v3145_v50, 2  ;;  %v3153_v27 = vrot.slane %v3152_v56, 4  ;;  %v3139_v43 = vrot.slane %v3138_v37, 1  ;;  %v3209_v55 = vadd.f32 %v3177_v13, %v3131_v62 }
 0x7c3   :  { %v3202_v10 = vadd.f32 %v3171_v33, %v3068_v52  ;;  %v3315_v13 = vpack.c.bf16 %v3299_v53, %v3299_v53  ;;  %v3317_v49 = vpack.c.bf16 %v3301_v39, %v3301_v39  ;;  %v3203_v2 = vadd.f32 %v3172_v47, %v3077_v59 }
 0x7c4   :  { %v3252_v12 = vpop.permute.xlu1 %3251  ;;  %v3154_v0 = vadd.f32 %v3153_v27, %v3152_v56  ;;  %v3268_v63 = vpop.permute.xlu0 %3267  ;;  %v3140_v42 = vadd.f32 %v3139_v43, %v3138_v37  ;;  %v3147_v30 = vadd.f32 %v3146_v21, %v3145_v50  ;;  %v3086_v45 = vadd.f32 %v3085_v40, %v3084_v34 }
 0x7c5   :  { %v3295_v41 = vmul.f32 %v3252_v12, %v3201_v24  ;;  %v3303_v60 = vmul.f32 %v3268_v63, %v3209_v55  ;;  %v3318_v33 = vpack.c.bf16 %v3302_v38, %v3302_v38  ;;  %v3348_v5 = vunpack.c.l.b16 %v3316_v48 }
 0x7c6   :  { %v3155_v28 = vrot.slane %v3154_v0, 2  ;;  %v3210_v1 = vadd.f32 %v3178_v19, %v3140_v42  ;;  %v3148_v46 = vrot.slane %v3147_v30, 1  ;;  %v3347_v15 = vunpack.c.l.b16 %v3315_v13 }
 0x7c7   :  { %v3311_v58 = vpack.c.bf16 %v3295_v41, %v3295_v41  ;;  %v3319_v32 = vpack.c.bf16 %v3303_v60, %v3303_v60  ;;  %v3349_v57 = vunpack.c.l.b16 %v3317_v49  ;;  %v3350_v34 = vunpack.c.l.b16 %v3318_v33 }
 0x7c8   :  { %v3254_v14 = vpop.permute.xlu1 %3253  ;;  %v3270_v26 = vpop.permute.xlu0 %3269  ;;  %v3156_v11 = vadd.f32 %v3155_v28, %v3154_v0  ;;  %v3149_v36 = vadd.f32 %v3148_v46, %v3147_v30  ;;  %v3369_v44 = vrot.slane %v3348_v5, 7  ;;  %v3204_v35 = vadd.f32 %v3173_v31, %v3086_v45 }
 0x7c9   :  { %v3343_v23 = vunpack.c.l.b16 %v3311_v58  ;;  %v3296_v29 = vmul.f32 %v3254_v14, %v3202_v10  ;;  %v3304_v25 = vmul.f32 %v3270_v26, %v3210_v1  ;;  %v3351_v62 = vunpack.c.l.b16 %v3319_v32  ;;  %v4786_v26 = vld [vmem:[#allocation6 + $0xa8] sm:$0xff]  }
 0x7ca   :  { %v3157_v19 = vrot.slane %v3156_v11, 1  ;;  %v3211_v22 = vadd.f32 %v3179_v4, %v3149_v36  ;;  %v3370_v24 = vsel %vm6593_vm5, %v3369_v44, %v3347_v15  ;;  %v3371_v53 = vrot.slane %v3349_v57, 6  ;;  %4657 = vmatpush3.bf16.msra.mxu0 %v4786_v26 }
 0x7cb   :  { %v3361_v17 = vrot.slane %v3343_v23, 4  ;;  %v3312_v52 = vpack.c.bf16 %v3296_v29, %v3296_v29  ;;  %v3320_v9 = vpack.c.bf16 %v3304_v25, %v3304_v25  ;;  %v3373_v63 = vrot.slane %v3350_v34, 5  ;;  %4658 = vmatprep.subr.bf16.mxu0 %v6579_v6  ;;  %v4787_v29 = vld [vmem:[#allocation6 + $0xa0] sm:$0xff]  }
 0x7cc   :  { %v3256_v47 = vpop.permute.xlu1 %3255  ;;  %v3272_v56 = vpop.permute.xlu0 %3271  ;;  %v3158_v37 = vadd.f32 %v3157_v19, %v3156_v11  ;;  %v3372_v41 = vsel %vm1671_vm13, %v3371_v53, %v3370_v24  ;;  %v3375_v42 = vrot.slane %v3351_v62, 4  ;;  %v6594_v62 = vlaneseq }
 0x7cd   :  { %v3362_v3 = vsel %vm1677_vm15, %v3361_v17, %v6293_v7  ;;  %v3344_v50 = vunpack.c.l.b16 %v3312_v52  ;;  %v3297_v51 = vmul.f32 %v3256_v47, %v3203_v2  ;;  %v3305_v20 = vmul.f32 %v3272_v56, %v3211_v22  ;;  %v4496_v17 = vld [vmem:[#allocation8 + $0x70] ss:$0 sm:$0xff] }
 0x7ce   :  { %v3212_v4 = vadd.f32 %v3180_v8, %v3158_v37  ;;  %v3352_v43 = vunpack.c.l.b16 %v3320_v9  ;;  %v3374_v28 = vsel %vm1674_vm14, %v3373_v63, %v3372_v41  ;;  %4659 = vmatpush3.bf16.msra.mxu0 %v4787_v29 }
 0x7cf   :  { %v3363_v21 = vrot.slane %v3344_v50, 3  ;;  %v3313_v27 = vpack.c.bf16 %v3297_v51, %v3297_v51  ;;  %v3321_v7 = vpack.c.bf16 %v3305_v20, %v3305_v20  ;;  %v3376_v58 = vsel %vm1677_vm15, %v3375_v42, %v3374_v28 }
 0x7d0   :  { %v3258_v39 = vpop.permute.xlu1 %3257  ;;  %v3274_v59 = vpop.permute.xlu0 %3273  ;;  %v3377_v8 = vrot.slane %v3352_v43, 3  ;;  %v6596_v43 = vld [vmem:[#allocation13_spill] sm:$0xff] }
 0x7d1   :  { %v3364_v55 = vsel %vm1680_vm10, %v3363_v21, %v3362_v3  ;;  %v3345_v12 = vunpack.c.l.b16 %v3313_v27  ;;  %v3298_v0 = vmul.f32 %v3258_v39, %v3204_v35  ;;  %v3353_v16 = vunpack.c.l.b16 %v3321_v7  ;;  %v6595_v27 = vld [vmem:[#allocation14_spill] sm:$0xff] }
 0x7d2   :  { %v3306_v31 = vmul.f32 %v3274_v59, %v3212_v4  ;;  %v3378_v13 = vsel %vm1680_vm10, %v3377_v8, %v3376_v58  ;;  %v3526_v21 = vand.u32 127, %v6594_v62  ;;  %v3528_v4 = vshra.s32 %v6595_v27, 3 }
 0x7d3   :  { %v3365_v40 = vrot.slane %v3345_v12, 2  ;;  %v3314_v54 = vpack.c.bf16 %v3298_v0, %v3298_v0  ;;  %v3379_v48 = vrot.slane %v3353_v16, 2  ;;  %v3527_v7 = vshra.s32 %v6596_v43, 3 }
 0x7d4   :  { %v3322_v38 = vpack.c.bf16 %v3306_v31, %v3306_v31  ;;  %v3529_v24 = vshra.s32 %v3526_v21, 3 }
 0x7d5   :  { %v3366_v10 = vsel %vm1683_vm12, %v3365_v40, %v3364_v55  ;;  %v3346_v30 = vunpack.c.l.b16 %v3314_v54  ;;  %v3380_v14 = vsel %vm1683_vm12, %v3379_v48, %v3378_v13 }
 0x7d6   :  { %v3354_v60 = vunpack.c.l.b16 %v3322_v38  ;;  %vm6442_vm7 = vcmp.eq.s32.totalorder %v3528_v4, %v3529_v24 }
 0x7d7   :  { %v3367_v1 = vrot.slane %v3346_v30, 1 }
 0x7d8   :  { %v3381_v49 = vrot.slane %v3354_v60, 1 }
 0x7d9   :  { %v3368_v46 = vsel %vm1686_vm9, %v3367_v1, %v3366_v10 }
 0x7da   :  { %v3382_v2 = vsel %vm1686_vm9, %v3381_v49, %v3380_v14  ;;  %vm6446_vm9 = vcmp.eq.s32.totalorder %v3527_v7, %v3529_v24 }
 0x7db   :  { %v3383_v23 = vpack.c.b16 %v3382_v2, %v3368_v46 }
 0x7dd   :  { %4653 = vmatmul.mubr.msk.bf16.vlgmr.msra.gmra.mxu1 %vm275_vm11, %v3383_v23 }
 0x89d   :  { %v3445_v11 = vpop.f32.mrf.mxu1 }
 0x89e   :  { %v3446_v5 = vadd.f32 %v3445_v11, %v5853_v61 }
 0x89f   :  { %v4654_v45 = vpop.f32.mrf.mxu1 }
 0x8a1   :  { %v3448_v33 = vpop.f32.mrf.mxu1 }
 0x8a2   :  { %v3449_v25 = vadd.f32 %v3448_v33, %v5857_v18 }
 0x8a3   :  { %v4655_v36 = vpop.f32.mrf.mxu1 }
 0x8a4   :  { %v3462_v32 = vpack.c.bf16 %v3449_v25, %v3446_v5 }
 0x8a6   :  { %4661 = vmatmul.mubr.msk.bf16.vlgmr.msra.gmra.mxu0 %vm88_vm0, %v3462_v32 }
 0x966   :  { %v3516_v52 = vpop.f32.mrf.mxu0 }
 0x967   :  { %v6399_v19 = vadd.f32 %v4496_v17, %v3516_v52 }
 0x968   :  { %v4662_v15 = vpop.f32.mrf.mxu0 }
 0x969   :  { %v6402_v57 = vmul.f32 0.35355338, %v6399_v19 }
 0x96a   :  { %v3519_v9 = vpop.f32.mrf.mxu0 }
 0x96b   :  { %v6404_v22 = vadd.f32 %v4496_v17, %v3519_v9  ;;  %4668 = vmatprep.mubr.msk.f32.mxu1 %vm3538_vm6, %v6402_v57 }
 0x96c   :  { %v4663_v61 = vpop.f32.mrf.mxu0 }
 0x96d   :  { %3742 = vrot.lane.b32.xlu0 %v6404_v22, %s5112_s0  ;;  %3536 = vrot.lane.b32.xlu1 %v6404_v22, %s5113_s2  ;;  %v6415_v18 = vmul.f32 0.35355338, %v6404_v22 }
 0x971   :  { %3740 = vrot.lane.b32.xlu0 %v6399_v19, %s5112_s0  ;;  %3534 = vrot.lane.b32.xlu1 %v6399_v19, %s5113_s2 }
 0x975   :  { %3944 = vrot.lane.b32.xlu0 %v6404_v22, %s5114_s30  ;;  %3736 = vrot.lane.b32.xlu1 %v6402_v57, %s5115_s4 }
 0x979   :  { %3942 = vrot.lane.b32.xlu0 %v6399_v19, %s5114_s30  ;;  %3738 = vrot.lane.b32.xlu1 %v6415_v18, %s5115_s4 }
 0x97d   :  { %3940 = vrot.lane.b32.xlu0 %v6415_v18, %s5116_s5  ;;  %3938 = vrot.lane.b32.xlu1 %v6402_v57, %s5116_s5 }
 0x9df   :  { %v3743_v47 = vpop.permute.xlu0 %3742  ;;  %v3537_v3 = vpop.permute.xlu1 %3536 }
 0x9e0   :  { %4664 = vmatprep.subr.msk.mxu1 %vm3538_vm6, %v3537_v3  ;;  %4678 = vmatprep.subr.msk.mxu0 %vm3538_vm6, %v3743_v47 }
 0x9e1   :  { %4665 = vmatpush3.xpose.msk.msra.mxu1 %vm3538_vm6, %v3537_v3  ;;  %4679 = vmatpush3.xpose.msk.msra.mxu0 %vm3538_vm6, %v3743_v47 }
 0x9e3   :  { %v3741_v50 = vpop.permute.xlu0 %3740  ;;  %v3535_v56 = vpop.permute.xlu1 %3534 }
 0x9e4   :  { %4666 = vmatprep.subr.msk.mxu1 %vm3538_vm6, %v3535_v56  ;;  %4680 = vmatprep.subr.msk.mxu0 %vm3538_vm6, %v3741_v50 }
 0x9e5   :  { %4667 = vmatpush3.xpose.msk.msra.mxu1 %vm3538_vm6, %v3535_v56  ;;  %4681 = vmatpush3.xpose.msk.msra.mxu0 %vm3538_vm6, %v3741_v50 }
 0x9e7   :  { %v3945_v51 = vpop.permute.xlu0 %3944  ;;  %v3737_v37 = vpop.permute.xlu1 %3736 }
 0x9e8   :  { %4669 = vmatmul.mubr.msk.f32.vlgmr.msra.gmra.mxu1 %vm3538_vm6, %v6415_v18  ;;  %4682 = vmatprep.mubr.msk.f32.mxu0 %vm3538_vm6, %v3737_v37 }
 0x9e9   :  { %4692 = vmatprep.subr.msk.mxu0 %vm3538_vm6, %v3945_v51 }
 0x9eb   :  { %v3943_v34 = vpop.permute.xlu0 %3942  ;;  %v3739_v44 = vpop.permute.xlu1 %3738 }
 0x9ec   :  { %4683 = vmatmul.mubr.msk.f32.vlgmr.msra.gmra.mxu0 %vm3538_vm6, %v3739_v44 }
 0x9ed   :  { %4693 = vmatpush3.xpose.msk.msra.mxu0 %vm3538_vm6, %v3945_v51 }
 0x9ee   :  { %4694 = vmatprep.subr.msk.mxu0 %vm3538_vm6, %v3943_v34 }
 0x9ef   :  { %v3939_v20 = vpop.permute.xlu1 %3938  ;;  %v3941_v35 = vpop.permute.xlu0 %3940 }
 0x9f0   :  { %4696 = vmatprep.mubr.msk.f32.mxu0 %vm3538_vm6, %v3939_v20 }
 0x9f1   :  { %4695 = vmatpush3.xpose.msk.msra.mxu0 %vm3538_vm6, %v3943_v34 }
 0x9f4   :  { %4697 = vmatmul.mubr.msk.f32.vlgmr.msra.gmra.mxu0 %vm3538_vm6, %v3941_v35 }
 0xaa8   :  { %v4670_v53 = vpop.f32.mrf.mxu1 }
 0xaa9   :  { %v3625_v12 = vsel %vm6442_vm7, %v4670_v53, -1e+30 }
 0xaaa   :  { %v3630_v59 = vsel %vm3626_vm8, %v3625_v12, -inf  ;;  %v3615_v0 = vpop.f32.mrf.mxu1 }
 0xaab   :  { %v3624_v63 = vsel %vm6446_vm9, %v3615_v0, -1e+30  ;;  %3631 = vmax.xlane.f32.xlu0 %v3630_v59 }
 0xaac   :  { %v3627_v16 = vsel %vm3626_vm8, %v3624_v63, -inf  ;;  %v4684_v31 = vpop.f32.mrf.mxu0 }
 0xaad   :  { %v3828_v41 = vsel %vm6442_vm7, %v4684_v31, -1e+30  ;;  %3628 = vmax.xlane.f32.xlu1 %v3627_v16 }
 0xaae   :  { %v3818_v42 = vpop.f32.mrf.mxu0  ;;  %v3832_v54 = vsel %vm3626_vm8, %v3828_v41, -inf }
 0xaaf   :  { %v3827_v40 = vsel %vm6446_vm9, %v3818_v42, -1e+30 }
 0xab0   :  { %v3829_v8 = vsel %vm3626_vm8, %v3827_v40, -inf }
 0xab1   :  { %3830 = vmax.xlane.f32.xlu0 %v3829_v8  ;;  %3833 = vmax.xlane.f32.xlu1 %v3832_v54 }
 0xab4   :  { %v4698_v38 = vpop.f32.mrf.mxu0 }
 0xab5   :  { %v4030_v48 = vsel %vm6442_vm7, %v4698_v38, -1e+30 }
 0xab6   :  { %v4034_v10 = vsel %vm3626_vm8, %v4030_v48, -inf  ;;  %v4020_v30 = vpop.f32.mrf.mxu0 }
 0xab7   :  { %v4029_v28 = vsel %vm6446_vm9, %v4020_v30, -1e+30  ;;  %4035 = vmax.xlane.f32.xlu1 %v4034_v10 }
 0xab8   :  { %v4031_v60 = vsel %vm3626_vm8, %v4029_v28, -inf }
 0xab9   :  { %4032 = vmax.xlane.f32.xlu0 %v4031_v60 }
 0xac8   :  { %3649 = vrot.lane.b32.xlu1 %v6399_v19, %s5103_s15 }
 0xacc   :  { %3853 = vrot.lane.b32.xlu1 %v6404_v22, %s5117_s6 }
 0xacf   :  { %3651 = vrot.lane.b32.xlu0 %v6404_v22, %s5103_s15  ;;  %s5076_s15 = scalar_lea.vmem %s4442_s14, 256 }
 0xad0   :  { %4055 = vrot.lane.b32.xlu1 %v6404_v22, %s5118_s7  ;;  %p5077_p1 = scmp.ne.s32.totalorder %s4442_s14, %s5076_s15  ;;  %p5082_p3 = scmp.lt.s32.totalorder %s5076_s15, %s5076_s15 }
 0xad2   :  { %p5083_p4 = por %p5082_p3, %p5081_p2 }
 0xad3   :  { %3851 = vrot.lane.b32.xlu0 %v6399_v19, %s5117_s6 }
 0xad4   :  { %p5084_p5 = pnand %p5083_p4, %p5077_p1 }
 0xb34   :  { %v3632_v58 = vpop.xlane.xlu0 %3631 }
 0xb35   :  { %v3634_v1 = vsub.f32 %v3625_v12, %v3632_v58 }
 0xb36   :  { %v3629_v13 = vpop.xlane.xlu1 %3628 }
 0xb37   :  { %v3637_v49 = vmul.f32 1.442695, %v3634_v1  ;;  %v3633_v14 = vsub.f32 %v3624_v63, %v3629_v13 }
 0xb39   :  { %4982 = vpow2.f32 %v3637_v49  ;;  %v3635_v46 = vmul.f32 1.442695, %v3633_v14 }
 0xb3a   :  { %v3831_v2 = vpop.xlane.xlu0 %3830  ;;  %v3834_v23 = vpop.xlane.xlu1 %3833 }
 0xb3b   :  { %4984 = vpow2.f32 %v3635_v46  ;;  %v3835_v26 = vsub.f32 %v3827_v40, %v3831_v2  ;;  %v3836_v29 = vsub.f32 %v3828_v41, %v3834_v23 }
 0xb3d   :  { %v3837_v11 = vmul.f32 1.442695, %v3835_v26  ;;  %v3839_v45 = vmul.f32 1.442695, %v3836_v29 }
 0xb3f   :  { %4986 = vpow2.f32 %v3837_v11 }
 0xb40   :  { %4988 = vpow2.f32 %v3839_v45  ;;  %v4036_v33 = vpop.xlane.xlu1 %4035 }
 0xb41   :  { %v4038_v5 = vsub.f32 %v4030_v48, %v4036_v33 }
 0xb42   :  { %v4033_v25 = vpop.xlane.xlu0 %4032 }
 0xb43   :  { %v4041_v36 = vmul.f32 1.442695, %v4038_v5  ;;  %v4037_v32 = vsub.f32 %v4029_v28, %v4033_v25 }
 0xb44   :  { %v3650_v17 = vpop.permute.xlu1 %3649 }
 0xb45   :  { %4990 = vpow2.f32 %v4041_v36  ;;  %v4039_v52 = vmul.f32 1.442695, %v4037_v32 }
 0xb46   :  { %v4983_v15 = vpop.eup %4982  ;;  %v3652_v9 = vpop.permute.xlu0 %3651 }
 0xb47   :  { %4992 = vpow2.f32 %v4039_v52  ;;  %4671 = vmatprep.subr.mxu1 %v3652_v9  ;;  %v3642_v61 = vsel %vm3626_vm8, %v4983_v15, 0.0 }
 0xb48   :  { %v4985_v47 = vpop.eup %4984  ;;  %4672 = vmatpush3.msra.mxu1 %v3652_v9  ;;  %3643 = vadd.xlane.f32.xlu1 %v3642_v61  ;;  %v3854_v50 = vpop.permute.xlu1 %3853 }
 0xb49   :  { %4673 = vmatprep.subr.mxu1 %v3650_v17  ;;  %v3639_v3 = vsel %vm3626_vm8, %v4985_v47, 0.0 }
 0xb4a   :  { %4674 = vmatpush3.msra.mxu1 %v3650_v17  ;;  %3640 = vadd.xlane.f32.xlu0 %v3639_v3  ;;  %v3852_v27 = vpop.permute.xlu0 %3851 }
 0xb4b   :  { %4685 = vmatprep.subr.mxu1 %v3854_v50 }
 0xb4c   :  { %v4987_v56 = vpop.eup %4986  ;;  %v4056_v21 = vpop.permute.xlu1 %4055 }
 0xb4d   :  { %v4989_v51 = vpop.eup %4988  ;;  %v3841_v37 = vsel %vm3626_vm8, %v4987_v56, 0.0 }
 0xb4e   :  { %3842 = vadd.xlane.f32.xlu0 %v3841_v37  ;;  %v3844_v34 = vsel %vm3626_vm8, %v4989_v51, 0.0 }
 0xb4f   :  { %3845 = vadd.xlane.f32.xlu1 %v3844_v34  ;;  %v4789_v34 = vld [vmem:[#allocation6 + $0xb0] sm:$0xff]  }
 0xb52   :  { %v4991_v44 = vpop.eup %4990 }
 0xb53   :  { %v4046_v20 = vsel %vm3626_vm8, %v4991_v44, 0.0 }
 0xb54   :  { %v4993_v35 = vpop.eup %4992  ;;  %4047 = vadd.xlane.f32.xlu1 %v4046_v20 }
 0xb55   :  { %v4043_v62 = vsel %vm3626_vm8, %v4993_v35, 0.0 }
 0xb56   :  { %4044 = vadd.xlane.f32.xlu0 %v4043_v62 }
 0xb65   :  { %4146 = vrot.lane.b32.xlu1 %v6404_v22, %s5119_s8 }
 0xb69   :  { %4140 = vrot.lane.b32.xlu1 %v6402_v57, %s5120_s9 }
 0xb6c   :  { %4053 = vrot.lane.b32.xlu0 %v6399_v19, %s5118_s7 }
 0xb70   :  { %4144 = vrot.lane.b32.xlu0 %v6399_v19, %s5119_s8 }
 0xb74   :  { %4142 = vrot.lane.b32.xlu0 %v6415_v18, %s5120_s9 }
 0xbd1   :  { %v3644_v4 = vpop.xlane.xlu1 %3643 }
 0xbd2   :  { %4994 = vrcp.f32 %v3644_v4 }
 0xbd3   :  { %v3641_v24 = vpop.xlane.xlu0 %3640 }
 0xbd4   :  { %4996 = vrcp.f32 %v3641_v24 }
 0xbd7   :  { %v3843_v43 = vpop.xlane.xlu0 %3842 }
 0xbd8   :  { %4998 = vrcp.f32 %v3843_v43  ;;  %v3846_v7 = vpop.xlane.xlu1 %3845 }
 0xbd9   :  { %5000 = vrcp.f32 %v3846_v7 }
 0xbdd   :  { %v4048_v53 = vpop.xlane.xlu1 %4047 }
 0xbde   :  { %5002 = vrcp.f32 %v4048_v53 }
 0xbdf   :  { %v4045_v57 = vpop.xlane.xlu0 %4044  ;;  %v4995_v12 = vpop.eup %4994 }
 0xbe0   :  { %5004 = vrcp.f32 %v4045_v57  ;;  %v3648_v63 = vmul.f32 %v4995_v12, %v4983_v15 }
 0xbe1   :  { %v4997_v59 = vpop.eup %4996  ;;  %v4147_v40 = vpop.permute.xlu1 %4146 }
 0xbe2   :  { %v3647_v0 = vmul.f32 %v4997_v59, %v4985_v47 }
 0xbe3   :  { %v4054_v42 = vpop.permute.xlu0 %4053 }
 0xbe4   :  { %4675 = vmatprep.mubr.msk.f32.mxu1 %vm3626_vm8, %v3647_v0 }
 0xbe5   :  { %v4999_v18 = vpop.eup %4998  ;;  %4676 = vmatmul.mubr.msk.f32.vlgmr.msra.gmra.mxu1 %vm3626_vm8, %v3648_v63  ;;  %v4141_v10 = vpop.permute.xlu1 %4140 }
 0xbe6   :  { %v5001_v16 = vpop.eup %5000  ;;  %4686 = vmatpush3.msra.mxu1 %v3854_v50  ;;  %v3849_v31 = vmul.f32 %v4999_v18, %v4987_v56 }
 0xbe7   :  { %4687 = vmatprep.subr.mxu1 %v3852_v27  ;;  %v3850_v41 = vmul.f32 %v5001_v16, %v4989_v51  ;;  %v4145_v30 = vpop.permute.xlu0 %4144 }
 0xbe8   :  { %4688 = vmatpush3.msra.mxu1 %v3852_v27  ;;  %4689 = vmatprep.mubr.msk.f32.mxu1 %vm3626_vm8, %v3849_v31  ;;  %v4524_v31 = vld [vmem:[#allocation8 + $0x78] ss:$0 sm:$0xff] }
 0xbe9   :  { %4699 = vmatprep.subr.mxu1 %v4056_v21  ;;  %4690 = vmatmul.mubr.msk.f32.vlgmr.msra.gmra.mxu1 %vm3626_vm8, %v3850_v41 }
 0xbea   :  { %4700 = vmatpush3.msra.mxu1 %v4056_v21 }
 0xbeb   :  { %4701 = vmatprep.subr.mxu1 %v4054_v42  ;;  %v5003_v54 = vpop.eup %5002  ;;  %v4143_v28 = vpop.permute.xlu0 %4142 }
 0xbec   :  { %4702 = vmatpush3.msra.mxu1 %v4054_v42  ;;  %v4052_v48 = vmul.f32 %v5003_v54, %v4991_v44 }
 0xbed   :  { %v5005_v8 = vpop.eup %5004  ;;  %4706 = vmatprep.subr.msk.mxu1 %vm3538_vm6, %v4147_v40 }
 0xbee   :  { %v4051_v38 = vmul.f32 %v5005_v8, %v4993_v35 }
 0xbf0   :  { %4703 = vmatprep.mubr.msk.f32.mxu1 %vm3626_vm8, %v4051_v38 }
 0xbf1   :  { %4704 = vmatmul.mubr.msk.f32.vlgmr.msra.gmra.mxu1 %vm3626_vm8, %v4052_v48 }
 0xbf2   :  { %4707 = vmatpush3.xpose.msk.msra.mxu1 %vm3538_vm6, %v4147_v40  ;;  %4710 = vmatprep.mubr.msk.f32.mxu1 %vm3538_vm6, %v4141_v10 }
 0xbf3   :  { %4708 = vmatprep.subr.msk.mxu1 %vm3538_vm6, %v4145_v30 }
 0xbf6   :  { %4709 = vmatpush3.xpose.msk.msra.mxu1 %vm3538_vm6, %v4145_v30 }
 0xbf9   :  { %4711 = vmatmul.mubr.msk.f32.vlgmr.msra.gmra.mxu1 %vm3538_vm6, %v4143_v28 }
 0xca5   :  { %v6500_v60 = vpop.f32.mrf.mxu1 }
 0xca7   :  { %v6502_v58 = vpop.f32.mrf.mxu1 }
 0xca9   :  { %v4691_v1 = vpop.f32.mrf.mxu1 }
 0xcab   :  { %v3929_v13 = vpop.f32.mrf.mxu1 }
 0xcac   :  { %v4751_v49 = vpack.i.bf16 %v4691_v1, %v3929_v13 }
 0xcb1   :  { %v4705_v14 = vpop.f32.mrf.mxu1 }
 0xcb3   :  { %v4131_v46 = vpop.f32.mrf.mxu1 }
 0xcb4   :  { %v4756_v2 = vpack.i.bf16 %v4705_v14, %v4131_v46 }
 0xcb9   :  { %v4712_v23 = vpop.f32.mrf.mxu1 }
 0xcba   :  { %v4232_v26 = vsel %vm6442_vm7, %v4712_v23, -1e+30 }
 0xcbb   :  { %v4236_v29 = vsel %vm3626_vm8, %v4232_v26, -inf  ;;  %v4222_v11 = vpop.f32.mrf.mxu1 }
 0xcbc   :  { %v4231_v45 = vsel %vm6446_vm9, %v4222_v11, -1e+30  ;;  %4237 = vmax.xlane.f32.xlu0 %v4236_v29 }
 0xcbd   :  { %v4233_v33 = vsel %vm3626_vm8, %v4231_v45, -inf }
 0xcbe   :  { %4234 = vmax.xlane.f32.xlu1 %v4233_v33 }
 0xd45   :  { %v4238_v5 = vpop.xlane.xlu0 %4237 }
 0xd46   :  { %v4240_v25 = vsub.f32 %v4232_v26, %v4238_v5 }
 0xd47   :  { %v4235_v36 = vpop.xlane.xlu1 %4234 }
 0xd48   :  { %v4243_v32 = vmul.f32 1.442695, %v4240_v25  ;;  %v4239_v17 = vsub.f32 %v4231_v45, %v4235_v36 }
 0xd4a   :  { %5006 = vpow2.f32 %v4243_v32  ;;  %v4241_v52 = vmul.f32 1.442695, %v4239_v17 }
 0xd4c   :  { %5008 = vpow2.f32 %v4241_v52 }
 0xd57   :  { %v5007_v39 = vpop.eup %5006 }
 0xd58   :  { %v4248_v15 = vsel %vm3626_vm8, %v5007_v39, 0.0 }
 0xd59   :  { %v5009_v9 = vpop.eup %5008  ;;  %4249 = vadd.xlane.f32.xlu1 %v4248_v15 }
 0xd5a   :  { %v4245_v55 = vsel %vm3626_vm8, %v5009_v9, 0.0 }
 0xd5b   :  { %4246 = vadd.xlane.f32.xlu0 %v4245_v55 }
 0xd6a   :  { %4255 = vrot.lane.b32.xlu1 %v6399_v19, %s5121_s10 }
 0xd6e   :  { %4752 = vrot.lane.b32.xlu1 %v4751_v49, %s5107_s23 }
 0xd71   :  { %4257 = vrot.lane.b32.xlu0 %v6404_v22, %s5121_s10  ;;  %v4788_v22 = vld [vmem:[#allocation6 + $0xb8] sm:$0xff]  }
 0xd75   :  { %4757 = vrot.lane.b32.xlu0 %v4756_v2, %s5122_s11 }
 0xde2   :  { %v4250_v61 = vpop.xlane.xlu1 %4249 }
 0xde3   :  { %5010 = vrcp.f32 %v4250_v61 }
 0xde4   :  { %v4247_v47 = vpop.xlane.xlu0 %4246 }
 0xde5   :  { %5012 = vrcp.f32 %v4247_v47 }
 0xde6   :  { %v4256_v50 = vpop.permute.xlu1 %4255 }
 0xde8   :  { %v4258_v3 = vpop.permute.xlu0 %4257 }
 0xde9   :  { %4713 = vmatprep.subr.mxu0 %v4258_v3 }
 0xdea   :  { %4714 = vmatpush3.msra.mxu0 %v4258_v3  ;;  %v4753_v62 = vpop.permute.xlu1 %4752 }
 0xdeb   :  { %4715 = vmatprep.subr.mxu0 %v4256_v50  ;;  %v4755_v21 = vunpack.i.h.bf16 %v4753_v62  ;;  %v4754_v27 = vunpack.i.l.bf16 %v4753_v62 }
 0xdec   :  { %4716 = vmatpush3.msra.mxu0 %v4256_v50  ;;  %v4758_v4 = vpop.permute.xlu0 %4757 }
 0xded   :  { %4720 = vmatprep.subr.bf16.mxu0 %v6579_v6  ;;  %v4760_v24 = vunpack.i.h.bf16 %v4758_v4  ;;  %v4759_v43 = vunpack.i.l.bf16 %v4758_v4  ;;  %v4367_v7 = vsel %vm3538_vm6, %v6500_v60, %v4755_v21  ;;  %v4366_v53 = vsel %vm3538_vm6, %v6502_v58, %v4754_v27 }
 0xdef   :  { %v4368_v59 = vsel %vm3626_vm8, %v4366_v53, %v4759_v43  ;;  %v4369_v0 = vsel %vm3626_vm8, %v4367_v7, %v4760_v24 }
 0xdf0   :  { %v5011_v56 = vpop.eup %5010 }
 0xdf1   :  { %v4254_v37 = vmul.f32 %v5011_v56, %v5007_v39 }
 0xdf2   :  { %v5013_v19 = vpop.eup %5012 }
 0xdf3   :  { %v4253_v51 = vmul.f32 %v5013_v19, %v5009_v9 }
 0xdf5   :  { %4717 = vmatprep.mubr.msk.f32.mxu0 %vm3626_vm8, %v4253_v51 }
 0xdf6   :  { %4718 = vmatmul.mubr.msk.f32.vlgmr.msra.gmra.mxu0 %vm3626_vm8, %v4254_v37 }
 0xdf7   :  { %4724 = vmatprep.mubr.msk.bf16.mxu0 %vm5110_vm1, %v6579_v6  ;;  %4721 = vmatpush3.bf16.msra.mxu0 %v4788_v22  ;;  %vm4370_vm1 = vcmask 195584  }
 0xdf8   :  { %4722 = vmatprep.subr.bf16.mxu0 %v6579_v6 }
 0xdfb   :  { %4723 = vmatpush3.bf16.msra.mxu0 %v4789_v34 }
 0xeb6   :  { %v4719_v44 = vpop.f32.mrf.mxu0 }
 0xeb8   :  { %v4333_v20 = vpop.f32.mrf.mxu0 }
 0xeb9   :  { %v4761_v35 = vpack.i.bf16 %v4719_v44, %v4333_v20 }
 0xebb   :  { %4762 = vrot.lane.b32.xlu1 %v4761_v35, %s5123_s12 }
 0xf2d   :  { %v4763_v6 = vpop.permute.xlu1 %4762 }
 0xf2e   :  { %v4765_v57 = vunpack.i.h.bf16 %v4763_v6  ;;  %v4764_v12 = vunpack.i.l.bf16 %v4763_v6 }
 0xf30   :  { %v4371_v63 = vsel %vm4370_vm1, %v4368_v59, %v4764_v12  ;;  %v4372_v18 = vsel %vm4370_vm1, %v4369_v0, %v4765_v57 }
 0xf31   :  { %v4373_v16 = vpack.c.bf16 %v4372_v18, %v4371_v63 }
 0xf33   :  { %4725 = vmatmul.mubr.msk.bf16.vlgmr.msra.gmra.mxu0 %vm88_vm0, %v4373_v16 }
 0xff3   :  { %v4427_v41 = vpop.f32.mrf.mxu0 }
 0xff4   :  { %v4428_v42 = vadd.f32 %v4524_v31, %v4427_v41 }
 0xff5   :  { %v4726_v40 = vpop.f32.mrf.mxu0 }
 0xff6   :  { %4434 = vst.msk [vmem:[#allocation9] sm:$0xff] %vm88_vm0, %v4428_v42 }
 0xff7   :  { %v4430_v54 = vpop.f32.mrf.mxu0 }
 0xff8   :  { %v4431_v8 = vadd.f32 %v4524_v31, %v4430_v54 }
 0xff9   :  { %v4727_v38 = vpop.f32.mrf.mxu0 }
 0xffa   :  { %4435 = vst.msk [vmem:[#allocation9 + $0x8] sm:$0xff] %vm88_vm0, %v4431_v8 }
 0xffb   :  { %5087 = shalt.err (!%p5084_p5)
}
 0xffc   :  { %4447 = dma.vmem_to_hbm [thread:$0]  %s4442_s14, 256, %s6539_s3, [#allocation5], %s5106_s22, %s5106_s22, %s5107_s23  }
 0xffd   :  { %5100 = dma.done.wait [#allocation5], 256  }
 0xffe   :  { %5101 = vsyncadd [#allocation5], 4294967040 }
 0xfff   :  { %4451 = vsyncpa [#allocation4], 1 }
0x1000   :  { %4452 = vsyncpa [#allocation7], 1 }
0x1001   :  { %4453 = vsyncpa [#allocation5], 1 }

</bundles_post_ra>
